<compile_context>
chip_gen: v7x
topology: tpu7x:2x2x1
jax: 0.10.0
libtpu: 0.0.40
codegen_flags: <defaults>
</compile_context>

<pallas_src>
import jax
import jax.numpy as jnp
import numpy as np
from jax import lax
from jax.experimental import pallas as pl
from jax.experimental.pallas import tpu as pltpu


def _softplus(x):
    # numerically-stable softplus; -logsigmoid(x) == softplus(-x)
    return jnp.maximum(x, 0.0) + jnp.log1p(jnp.exp(-jnp.abs(x)))


def _round_up(x, m):
    return ((x + m - 1) // m) * m


def _make_kernel(*, wn_negative_sample, group_widths, c_pad, b_real,
                 mismatch_weight, w2v_loss_weight, wn_loss_weight, margin):
    """Builds the kernel body.  group_widths are the original (unpadded)
    context widths in order [v, neg, wn] (+ [sim, not_sim, mismatch])."""
    mismatch_weight = float(mismatch_weight)
    w2v_loss_weight = float(w2v_loss_weight)
    wn_loss_weight = float(wn_loss_weight)
    margin = float(margin)

    def kernel(idx_flat_ref, idx2d_ref, emb_u_ref, vt_ref, out_ref):
        V, D = vt_ref.shape
        TB = emb_u_ref.shape[0]
        Ct = idx2d_ref.shape[1]
        N = TB * Ct

        # ---- in-kernel embedding gather on the MXU (one-hot matmul) ----
        idx_col = idx_flat_ref[...]                              # (N, 1) int32
        vocab_iota = lax.broadcasted_iota(jnp.int32, (N, V), 1)
        onehot = (vocab_iota == idx_col).astype(jnp.float32)     # (N, V)
        emb = jnp.dot(onehot, vt_ref[...],
                      preferred_element_type=jnp.float32)        # (N, D)
        emb3 = emb.reshape(TB, Ct, D)                            # (TB, Ct, D)

        emb_u = emb_u_ref[...]                                   # (TB, D)
        # hoist the broadcast once; every group reuses it (no CSE in JAX)
        u_b = jnp.broadcast_to(emb_u[:, None, :], (TB, c_pad, D))

        def group(g):
            off = g * c_pad                                      # mult of 8
            e = emb3[:, off:off + c_pad, :]                      # (TB, c_pad, D)
            m = idx2d_ref[:, off:off + c_pad] != 0               # (TB, c_pad)
            return e, m

        def zero_pad_cols(x, c_orig):
            # zero contributions from columns added only for 8-alignment
            if c_orig == c_pad:
                return x
            col = lax.broadcasted_iota(jnp.int32, x.shape, 1)
            return jnp.where(col < c_orig, x, 0.0)

        # ---------------- word2vec losses ----------------
        cv, cn, cw = group_widths[0], group_widths[1], group_widths[2]

        e_v, m_v = group(0)
        dot_v = jnp.sum(e_v * u_b, axis=-1)                      # (TB, c_pad)
        term_v = zero_pad_cols(jnp.where(m_v, _softplus(-dot_v), dot_v), cv)
        cnt_v = jnp.sum(m_v.astype(jnp.float32), axis=1, keepdims=True)
        w2v_pos = jnp.sum(term_v, axis=1, keepdims=True) / cnt_v

        e_n, _m_n = group(1)
        dot_n = jnp.sum(e_n * u_b, axis=-1)
        term_n = zero_pad_cols(_softplus(dot_n), cn)
        w2v_neg = jnp.sum(term_n, axis=1, keepdims=True) / float(cn)

        e_w, m_w = group(2)
        dot_w = jnp.sum(e_w * u_b, axis=-1)
        if wn_negative_sample:
            term_w = zero_pad_cols(jnp.where(m_w, _softplus(dot_w), dot_w), cw)
            w2v_mis = (mismatch_weight
                       * jnp.sum(term_w, axis=1, keepdims=True) / float(cw))
        else:
            term_w = zero_pad_cols(_softplus(dot_w), cw)
            w2v_mis = mismatch_weight * jnp.sum(term_w, axis=1, keepdims=True)

        w2v_loss = w2v_pos + w2v_neg + w2v_mis                   # (TB, 1)

        if wn_negative_sample:
            # ------------- wordnet (triplet-style) losses -------------
            def dist2(e):                                        # (TB, c_pad)
                d = e - u_b
                return jnp.sum(d * d, axis=-1)

            e_s, m_s = group(3)
            e_ns, m_ns = group(4)
            e_mm, m_mm = group(5)
            cns, cmm = group_widths[4], group_widths[5]

            # positive branch: (sqrt(d2+eps))**2 == d2+eps -> skip the sqrt
            pos_sq = jnp.where(m_s, dist2(e_s) + 1e-9, 0.0)
            wn_pos = 0.5 * jnp.sum(pos_sq, axis=1, keepdims=True)

            def hinge(e, m, c_orig):
                d = jnp.sqrt(dist2(e) + 1e-9)
                t = jnp.maximum(margin - jnp.where(m, d, 0.0), 0.0)
                t = zero_pad_cols(t, c_orig)
                return 0.5 * jnp.sum(t * t, axis=1, keepdims=True)

            wn_neg = hinge(e_ns, m_ns, cns)
            wn_mis = mismatch_weight * hinge(e_mm, m_mm, cmm)

            def cond_div(x, m):
                c = jnp.sum(m.astype(jnp.float32), axis=1, keepdims=True)
                return jnp.where(c != 0.0, x / jnp.maximum(c, 1.0), x)

            wn_pos = cond_div(wn_pos, m_s)
            wn_neg = cond_div(wn_neg, m_ns)
            wn_mis = cond_div(wn_mis, m_mm)
            wn_loss = wn_pos + wn_neg + wn_mis                   # (TB, 1)

            row = wn_loss_weight * wn_loss + w2v_loss_weight * w2v_loss
        else:
            row = w2v_loss

        # mask padded batch rows, reduce to a per-tile partial sum and emit a
        # lane-dense (8, 128) block (masked single-lane stores avoided)
        row_id = (lax.broadcasted_iota(jnp.int32, (TB, 1), 0)
                  + pl.program_id(0) * TB)
        row = jnp.where(row_id < b_real, row, 0.0)
        out_ref[...] = jnp.full((8, 128), jnp.sum(row), jnp.float32)

    return kernel


def skipgram_wordnet_forward(u_table, v_table, u, v, neg, wn, sim, not_sim,
                             mismatch, *, wn_negative_sample=True,
                             mismatch_weight=1.0, w2v_loss_weight=1.0,
                             wn_loss_weight=1.0, margin=1.0, tile_b=256):
    B = int(u.shape[0])
    V, D = int(v_table.shape[0]), int(v_table.shape[1])

    if wn_negative_sample:
        groups = [v, neg, wn, sim, not_sim, mismatch]
    else:
        groups = [v, neg, wn]
    widths = [int(g.shape[1]) for g in groups]
    c_pad = max(8, _round_up(max(widths), 8))

    # pad every group to a common, 8-aligned column count with padding idx 0;
    # extra columns are masked out in-kernel
    def pad_cols(g):
        return jnp.pad(g.astype(jnp.int32),
                       ((0, 0), (0, c_pad - g.shape[1])))

    idx_all = jnp.concatenate([pad_cols(g) for g in groups], axis=1)  # (B, Ct)
    Ct = int(idx_all.shape[1])

    # emb_u gather stays in the wrapper (tiny, (B, D)); the six (B, C, D)
    # context gathers happen inside the kernel against the VMEM-resident
    # v_table, so no (B, C, D) intermediates ever hit HBM.
    emb_u = jnp.take(u_table, u.astype(jnp.int32), axis=0).astype(jnp.float32)

    # ---- batch tiling ----
    TB = max(8, (min(int(tile_b), _round_up(B, 8)) // 8) * 8)
    if B > 8:
        # keep at least 2 tiles so the "parallel" batch axis can feed both
        # TensorCores on v7x
        TB = min(TB, max(8, _round_up((B + 1) // 2, 8)))
    # keep the in-kernel one-hot temporary (TB*Ct, V) modest (<= 8 MiB)
    cap = max(8, ((8 * 1024 * 1024) // (Ct * V * 4)) // 8 * 8)
    TB = min(TB, cap)
    n_tiles = int(pl.cdiv(B, TB))
    B_pad = n_tiles * TB

    def pad_rows(x):
        p = B_pad - x.shape[0]
        if p == 0:
            return x
        return jnp.pad(x, ((0, p),) + ((0, 0),) * (x.ndim - 1))

    idx_all = pad_rows(idx_all)                          # (B_pad, Ct) int32
    emb_u = pad_rows(emb_u)                              # (B_pad, D) f32
    idx_flat = idx_all.reshape(B_pad * Ct, 1)            # (B_pad*Ct, 1) int32
    vt = v_table.astype(jnp.float32)

    kernel = _make_kernel(
        wn_negative_sample=wn_negative_sample, group_widths=widths,
        c_pad=c_pad, b_real=B, mismatch_weight=mismatch_weight,
        w2v_loss_weight=w2v_loss_weight, wn_loss_weight=wn_loss_weight,
        margin=margin)

    out = pl.pallas_call(
        kernel,
        out_shape=jax.ShapeDtypeStruct((n_tiles * 8, 128), jnp.float32),
        grid=(n_tiles,),
        in_specs=[
            pl.BlockSpec((TB * Ct, 1), lambda i: (i, 0)),   # flat indices
            pl.BlockSpec((TB, Ct), lambda i: (i, 0)),       # indices for masks
            pl.BlockSpec((TB, D), lambda i: (i, 0)),        # emb_u tile
            pl.BlockSpec((V, D), lambda i: (0, 0)),         # VMEM-resident table
        ],
        out_specs=pl.BlockSpec((8, 128), lambda i: (i, 0)),
        compiler_params=pltpu.CompilerParams(
            dimension_semantics=("parallel",),
            vmem_limit_bytes=32 * 1024 * 1024),
    )(idx_flat, idx_all, emb_u, vt)

    per_tile = out[::8, 0]                               # one value per tile
    return jnp.sum(per_tile) / float(B)


def reference_forward(u_table, v_table, u, v, neg, wn, sim, not_sim, mismatch,
                      wn_negative_sample=True, mismatch_weight=1.0,
                      w2v_loss_weight=1.0, wn_loss_weight=1.0, margin=1.0):
    """Pure-JAX mirror of the PyTorch forward (diff-based distances)."""
    emb_u = u_table[u]
    emb_v, emb_neg, emb_wn = v_table[v], v_table[neg], v_table[wn]

    def bdot(emb):
        return jnp.sum(emb * emb_u[:, None, :], axis=-1)

    dot_v = bdot(emb_v)
    pos = jnp.where(v != 0, _softplus(-dot_v), dot_v)
    w2v_pos = (jnp.sum(pos, 1, keepdims=True) /
               jnp.sum(v != 0, 1, keepdims=True).astype(jnp.float32))

    dot_neg = bdot(emb_neg)
    w2v_neg = jnp.sum(_softplus(dot_neg), 1, keepdims=True) / neg.shape[1]

    dot_wn = bdot(emb_wn)
    if wn_negative_sample:
        mis = jnp.where(wn != 0, _softplus(dot_wn), dot_wn)
        w2v_mis = mismatch_weight * jnp.sum(mis, 1, keepdims=True) / wn.shape[1]
    else:
        w2v_mis = mismatch_weight * jnp.sum(_softplus(dot_wn), 1, keepdims=True)
    w2v_loss = w2v_pos + w2v_neg + w2v_mis

    if not wn_negative_sample:
        return jnp.mean(w2v_loss)

    def dist(tbl_idx):
        emb = v_table[tbl_idx]
        return jnp.sqrt(jnp.sum((emb_u[:, None, :] - emb) ** 2, -1) + 1e-9)

    pos_d, neg_d, mis_d = dist(sim), dist(not_sim), dist(mismatch)
    pos_d2 = jnp.where(sim != 0, pos_d, 0.0)
    neg_d2 = jnp.maximum(margin - jnp.where(not_sim != 0, neg_d, 0.0), 0.0)
    mis_d2 = jnp.maximum(margin - jnp.where(mismatch != 0, mis_d, 0.0), 0.0)

    wn_pos = jnp.sum(0.5 * pos_d2 ** 2, 1, keepdims=True)
    wn_neg = jnp.sum(0.5 * neg_d2 ** 2, 1, keepdims=True)
    wn_mis = mismatch_weight * jnp.sum(0.5 * mis_d2 ** 2, 1, keepdims=True)

    c_sim = jnp.sum(sim != 0, 1, keepdims=True).astype(jnp.float32)
    c_ns = jnp.sum(not_sim != 0, 1, keepdims=True).astype(jnp.float32)
    c_mm = jnp.sum(mismatch != 0, 1, keepdims=True).astype(jnp.float32)
    wn_pos = jnp.where(c_sim != 0, wn_pos / jnp.maximum(c_sim, 1.0), wn_pos)
    wn_neg = jnp.where(c_ns != 0, wn_neg / jnp.maximum(c_ns, 1.0), wn_neg)
    wn_mis = jnp.where(c_mm != 0, wn_mis / jnp.maximum(c_mm, 1.0), wn_mis)
    wn_loss = wn_pos + wn_neg + wn_mis

    return jnp.mean(wn_loss_weight * wn_loss + w2v_loss_weight * w2v_loss)


if __name__ == "__main__":
    vocab_size, emb_dim, batch = 512, 128, 16   # D lane-dense (multiple of 128)
    Cv = Cn = Cw = Cs = Cns = Cm = 8

    keys = jax.random.split(jax.random.PRNGKey(0), 10)
    initrange = 1.0 / emb_dim
    # u_embeddings: uniform(-1/D, 1/D), padding row 0 zeroed (as in __init__).
    u_table = jax.random.uniform(keys[0], (vocab_size, emb_dim), jnp.float32,
                                 -initrange, initrange).at[0].set(0.0)
    # v_embeddings: __init__ zero-inits these (degenerate forward); use small
    # random values so the math is exercised, keeping padding row 0 at zero.
    v_table = jax.random.uniform(keys[1], (vocab_size, emb_dim), jnp.float32,
                                 -initrange, initrange).at[0].set(0.0)

    u = jax.random.randint(keys[2], (batch,), 1, vocab_size)
    v = jax.random.randint(keys[3], (batch, Cv), 0, vocab_size)
    v = v.at[:, 0].set(jax.random.randint(keys[4], (batch,), 1, vocab_size))
    neg = jax.random.randint(keys[5], (batch, Cn), 1, vocab_size)
    wn = jax.random.randint(keys[6], (batch, Cw), 0, vocab_size)
    sim = jax.random.randint(keys[7], (batch, Cs), 0, vocab_size)
    not_sim = jax.random.randint(keys[8], (batch, Cns), 0, vocab_size)
    mismatch = jax.random.randint(keys[9], (batch, Cm), 0, vocab_size)

    for wn_ns in (True, False):
        loss = skipgram_wordnet_forward(
            u_table, v_table, u, v, neg, wn, sim, not_sim, mismatch,
            wn_negative_sample=wn_ns, mismatch_weight=1.0,
            w2v_loss_weight=1.0, wn_loss_weight=1.0, margin=1.0,
            tile_b=8)                      # TB=8 -> grid=(2,), exercises tiling
        loss = jax.block_until_ready(loss)

        ref = reference_forward(u_table, v_table, u, v, neg, wn, sim, not_sim,
                                mismatch, wn_negative_sample=wn_ns)
        ref = jax.block_until_ready(ref)

        assert np.isfinite(float(loss))
        np.testing.assert_allclose(float(loss), float(ref),
                                   rtol=1e-5, atol=1e-5)

    print("KERNEL_OK")
</pallas_src>

<mosaic_0001>
module attributes {stable_mosaic.version = 11 : i64} {
  func.func @kernel(%arg0: i32, %arg1: memref<384x1xi32, #tpu.memory_space<vmem>>, %arg2: memref<8x48xi32, #tpu.memory_space<vmem>>, %arg3: memref<8x128xf32, #tpu.memory_space<vmem>>, %arg4: memref<512x128xf32, #tpu.memory_space<vmem>>, %arg5: memref<8x128xf32, #tpu.memory_space<vmem>>) attributes {dimension_semantics = [#tpu.dimension_semantics<parallel>], iteration_bounds = array<i64: 2>, scalar_prefetch = 0 : i64, scratch_operands = 0 : i64, tpu.core_type = #tpu.core_type<tc>, window_params = [{transform_indices = @transform_0, window_bounds = array<i64: 384, 1>}, {transform_indices = @transform_1, window_bounds = array<i64: 8, 48>}, {transform_indices = @transform_2, window_bounds = array<i64: 8, 128>}, {pipeline_mode = #tpu.pipeline_mode<synchronous>, transform_indices = @transform_3, window_bounds = array<i64: 512, 128>}, {transform_indices = @transform_4, window_bounds = array<i64: 8, 128>}]} {
    %c0 = arith.constant 0 : index
    %c0_0 = arith.constant 0 : index
    %0 = vector.load %arg1[%c0, %c0_0] : memref<384x1xi32, #tpu.memory_space<vmem>>, vector<384x1xi32>
    %1 = tpu.iota {dimensions = array<i32: 1>} : vector<384x512xi32>
    %2 = vector.broadcast %0 : vector<384x1xi32> to vector<384x512xi32>
    %3 = arith.cmpi eq, %1, %2 : vector<384x512xi32>
    %4 = arith.extui %3 : vector<384x512xi1> to vector<384x512xi32>
    %5 = arith.sitofp %4 : vector<384x512xi32> to vector<384x512xf32>
    %c0_1 = arith.constant 0 : index
    %c0_2 = arith.constant 0 : index
    %6 = vector.load %arg4[%c0_1, %c0_2] : memref<512x128xf32, #tpu.memory_space<vmem>>, vector<512x128xf32>
    %cst = arith.constant dense<0.000000e+00> : vector<384x128xf32>
    %7 = tpu.matmul %5, %6, %cst {dimension_numbers = #tpu.dot_dimension_numbers<[1], [0], [0], [1], [0, 0, 1, 1], [], []>} : vector<384x512xf32>, vector<512x128xf32>, vector<384x128xf32> -> vector<384x128xf32>
    %8 = vector.shape_cast %7 : vector<384x128xf32> to vector<8x48x128xf32>
    %c0_3 = arith.constant 0 : index
    %c0_4 = arith.constant 0 : index
    %9 = vector.load %arg3[%c0_3, %c0_4] : memref<8x128xf32, #tpu.memory_space<vmem>>, vector<8x128xf32>
    %10 = vector.shape_cast %9 : vector<8x128xf32> to vector<8x1x128xf32>
    %11 = vector.shape_cast %10 : vector<8x1x128xf32> to vector<8x1x128xf32>
    %12 = vector.broadcast %11 : vector<8x1x128xf32> to vector<8x8x128xf32>
    %13 = vector.extract_strided_slice %8 {offsets = [0, 0, 0], sizes = [8, 8, 128], strides = [1, 1, 1]} : vector<8x48x128xf32> to vector<8x8x128xf32>
    %c0_5 = arith.constant 0 : index
    %c0_6 = arith.constant 0 : index
    %14 = vector.load %arg2[%c0_5, %c0_6] : memref<8x48xi32, #tpu.memory_space<vmem>>, vector<8x8xi32>
    %c0_i32 = arith.constant 0 : i32
    %15 = vector.broadcast %c0_i32 : i32 to vector<8x8xi32>
    %16 = arith.cmpi ne, %14, %15 : vector<8x8xi32>
    %17 = arith.mulf %13, %12 : vector<8x8x128xf32>
    %cst_7 = arith.constant dense<0.000000e+00> : vector<8x8xf32>
    %18 = vector.multi_reduction <add>, %17, %cst_7 [2] : vector<8x8x128xf32> to vector<8x8xf32>
    %cst_8 = arith.constant 0.000000e+00 : f32
    %19 = vector.broadcast %cst_8 : f32 to vector<8x8xf32>
    %20 = arith.subf %19, %18 : vector<8x8xf32>
    %cst_9 = arith.constant 0.000000e+00 : f32
    %21 = vector.broadcast %cst_9 : f32 to vector<8x8xf32>
    %22 = arith.maximumf %20, %21 : vector<8x8xf32>
    %23 = math.absf %20 : vector<8x8xf32>
    %cst_10 = arith.constant 0.000000e+00 : f32
    %24 = vector.broadcast %cst_10 : f32 to vector<8x8xf32>
    %25 = arith.subf %24, %23 : vector<8x8xf32>
    %26 = math.exp %25 : vector<8x8xf32>
    %27 = math.log1p %26 : vector<8x8xf32>
    %28 = arith.addf %22, %27 : vector<8x8xf32>
    %29 = arith.select %16, %28, %18 : vector<8x8xi1>, vector<8x8xf32>
    %30 = arith.extui %16 : vector<8x8xi1> to vector<8x8xi32>
    %31 = arith.sitofp %30 : vector<8x8xi32> to vector<8x8xf32>
    %cst_11 = arith.constant dense<0.000000e+00> : vector<8xf32>
    %32 = vector.multi_reduction <add>, %31, %cst_11 [1] : vector<8x8xf32> to vector<8xf32>
    %33 = vector.shape_cast %32 : vector<8xf32> to vector<8x1xf32>
    %cst_12 = arith.constant dense<0.000000e+00> : vector<8xf32>
    %34 = vector.multi_reduction <add>, %29, %cst_12 [1] : vector<8x8xf32> to vector<8xf32>
    %35 = vector.shape_cast %34 : vector<8xf32> to vector<8x1xf32>
    %36 = arith.divf %35, %33 : vector<8x1xf32>
    %37 = vector.extract_strided_slice %8 {offsets = [0, 8, 0], sizes = [8, 8, 128], strides = [1, 1, 1]} : vector<8x48x128xf32> to vector<8x8x128xf32>
    %38 = arith.mulf %37, %12 : vector<8x8x128xf32>
    %cst_13 = arith.constant dense<0.000000e+00> : vector<8x8xf32>
    %39 = vector.multi_reduction <add>, %38, %cst_13 [2] : vector<8x8x128xf32> to vector<8x8xf32>
    %cst_14 = arith.constant 0.000000e+00 : f32
    %40 = vector.broadcast %cst_14 : f32 to vector<8x8xf32>
    %41 = arith.maximumf %39, %40 : vector<8x8xf32>
    %42 = math.absf %39 : vector<8x8xf32>
    %cst_15 = arith.constant 0.000000e+00 : f32
    %43 = vector.broadcast %cst_15 : f32 to vector<8x8xf32>
    %44 = arith.subf %43, %42 : vector<8x8xf32>
    %45 = math.exp %44 : vector<8x8xf32>
    %46 = math.log1p %45 : vector<8x8xf32>
    %47 = arith.addf %41, %46 : vector<8x8xf32>
    %cst_16 = arith.constant dense<0.000000e+00> : vector<8xf32>
    %48 = vector.multi_reduction <add>, %47, %cst_16 [1] : vector<8x8xf32> to vector<8xf32>
    %49 = vector.shape_cast %48 : vector<8xf32> to vector<8x1xf32>
    %cst_17 = arith.constant 8.000000e+00 : f32
    %50 = vector.broadcast %cst_17 : f32 to vector<8x1xf32>
    %51 = arith.divf %49, %50 : vector<8x1xf32>
    %52 = vector.extract_strided_slice %8 {offsets = [0, 16, 0], sizes = [8, 8, 128], strides = [1, 1, 1]} : vector<8x48x128xf32> to vector<8x8x128xf32>
    %c0_18 = arith.constant 0 : index
    %c16 = arith.constant 16 : index
    %53 = vector.load %arg2[%c0_18, %c16] : memref<8x48xi32, #tpu.memory_space<vmem>>, vector<8x8xi32>
    %c0_i32_19 = arith.constant 0 : i32
    %54 = vector.broadcast %c0_i32_19 : i32 to vector<8x8xi32>
    %55 = arith.cmpi ne, %53, %54 : vector<8x8xi32>
    %56 = arith.mulf %52, %12 : vector<8x8x128xf32>
    %cst_20 = arith.constant dense<0.000000e+00> : vector<8x8xf32>
    %57 = vector.multi_reduction <add>, %56, %cst_20 [2] : vector<8x8x128xf32> to vector<8x8xf32>
    %cst_21 = arith.constant 0.000000e+00 : f32
    %58 = vector.broadcast %cst_21 : f32 to vector<8x8xf32>
    %59 = arith.maximumf %57, %58 : vector<8x8xf32>
    %60 = math.absf %57 : vector<8x8xf32>
    %cst_22 = arith.constant 0.000000e+00 : f32
    %61 = vector.broadcast %cst_22 : f32 to vector<8x8xf32>
    %62 = arith.subf %61, %60 : vector<8x8xf32>
    %63 = math.exp %62 : vector<8x8xf32>
    %64 = math.log1p %63 : vector<8x8xf32>
    %65 = arith.addf %59, %64 : vector<8x8xf32>
    %66 = arith.select %55, %65, %57 : vector<8x8xi1>, vector<8x8xf32>
    %cst_23 = arith.constant dense<0.000000e+00> : vector<8xf32>
    %67 = vector.multi_reduction <add>, %66, %cst_23 [1] : vector<8x8xf32> to vector<8xf32>
    %68 = vector.shape_cast %67 : vector<8xf32> to vector<8x1xf32>
    %cst_24 = arith.constant 1.000000e+00 : f32
    %69 = vector.broadcast %cst_24 : f32 to vector<8x1xf32>
    %70 = arith.mulf %69, %68 : vector<8x1xf32>
    %cst_25 = arith.constant 8.000000e+00 : f32
    %71 = vector.broadcast %cst_25 : f32 to vector<8x1xf32>
    %72 = arith.divf %70, %71 : vector<8x1xf32>
    %73 = arith.addf %36, %51 : vector<8x1xf32>
    %74 = arith.addf %73, %72 : vector<8x1xf32>
    %75 = vector.extract_strided_slice %8 {offsets = [0, 24, 0], sizes = [8, 8, 128], strides = [1, 1, 1]} : vector<8x48x128xf32> to vector<8x8x128xf32>
    %c0_26 = arith.constant 0 : index
    %c24 = arith.constant 24 : index
    %76 = vector.load %arg2[%c0_26, %c24] : memref<8x48xi32, #tpu.memory_space<vmem>>, vector<8x8xi32>
    %c0_i32_27 = arith.constant 0 : i32
    %77 = vector.broadcast %c0_i32_27 : i32 to vector<8x8xi32>
    %78 = arith.cmpi ne, %76, %77 : vector<8x8xi32>
    %79 = vector.extract_strided_slice %8 {offsets = [0, 32, 0], sizes = [8, 8, 128], strides = [1, 1, 1]} : vector<8x48x128xf32> to vector<8x8x128xf32>
    %c0_28 = arith.constant 0 : index
    %c32 = arith.constant 32 : index
    %80 = vector.load %arg2[%c0_28, %c32] : memref<8x48xi32, #tpu.memory_space<vmem>>, vector<8x8xi32>
    %c0_i32_29 = arith.constant 0 : i32
    %81 = vector.broadcast %c0_i32_29 : i32 to vector<8x8xi32>
    %82 = arith.cmpi ne, %80, %81 : vector<8x8xi32>
    %83 = vector.extract_strided_slice %8 {offsets = [0, 40, 0], sizes = [8, 8, 128], strides = [1, 1, 1]} : vector<8x48x128xf32> to vector<8x8x128xf32>
    %c0_30 = arith.constant 0 : index
    %c40 = arith.constant 40 : index
    %84 = vector.load %arg2[%c0_30, %c40] : memref<8x48xi32, #tpu.memory_space<vmem>>, vector<8x8xi32>
    %c0_i32_31 = arith.constant 0 : i32
    %85 = vector.broadcast %c0_i32_31 : i32 to vector<8x8xi32>
    %86 = arith.cmpi ne, %84, %85 : vector<8x8xi32>
    %87 = arith.subf %75, %12 : vector<8x8x128xf32>
    %88 = arith.mulf %87, %87 : vector<8x8x128xf32>
    %cst_32 = arith.constant dense<0.000000e+00> : vector<8x8xf32>
    %89 = vector.multi_reduction <add>, %88, %cst_32 [2] : vector<8x8x128xf32> to vector<8x8xf32>
    %cst_33 = arith.constant 9.99999971E-10 : f32
    %90 = vector.broadcast %cst_33 : f32 to vector<8x8xf32>
    %91 = arith.addf %89, %90 : vector<8x8xf32>
    %cst_34 = arith.constant 0.000000e+00 : f32
    %92 = vector.broadcast %cst_34 : f32 to vector<8x8xf32>
    %93 = arith.select %78, %91, %92 : vector<8x8xi1>, vector<8x8xf32>
    %cst_35 = arith.constant dense<0.000000e+00> : vector<8xf32>
    %94 = vector.multi_reduction <add>, %93, %cst_35 [1] : vector<8x8xf32> to vector<8xf32>
    %95 = vector.shape_cast %94 : vector<8xf32> to vector<8x1xf32>
    %cst_36 = arith.constant 5.000000e-01 : f32
    %96 = vector.broadcast %cst_36 : f32 to vector<8x1xf32>
    %97 = arith.mulf %96, %95 : vector<8x1xf32>
    %98 = arith.subf %79, %12 : vector<8x8x128xf32>
    %99 = arith.mulf %98, %98 : vector<8x8x128xf32>
    %cst_37 = arith.constant dense<0.000000e+00> : vector<8x8xf32>
    %100 = vector.multi_reduction <add>, %99, %cst_37 [2] : vector<8x8x128xf32> to vector<8x8xf32>
    %cst_38 = arith.constant 9.99999971E-10 : f32
    %101 = vector.broadcast %cst_38 : f32 to vector<8x8xf32>
    %102 = arith.addf %100, %101 : vector<8x8xf32>
    %103 = math.sqrt %102 : vector<8x8xf32>
    %cst_39 = arith.constant 0.000000e+00 : f32
    %104 = vector.broadcast %cst_39 : f32 to vector<8x8xf32>
    %105 = arith.select %82, %103, %104 : vector<8x8xi1>, vector<8x8xf32>
    %cst_40 = arith.constant 1.000000e+00 : f32
    %106 = vector.broadcast %cst_40 : f32 to vector<8x8xf32>
    %107 = arith.subf %106, %105 : vector<8x8xf32>
    %cst_41 = arith.constant 0.000000e+00 : f32
    %108 = vector.broadcast %cst_41 : f32 to vector<8x8xf32>
    %109 = arith.maximumf %107, %108 : vector<8x8xf32>
    %110 = arith.mulf %109, %109 : vector<8x8xf32>
    %cst_42 = arith.constant dense<0.000000e+00> : vector<8xf32>
    %111 = vector.multi_reduction <add>, %110, %cst_42 [1] : vector<8x8xf32> to vector<8xf32>
    %112 = vector.shape_cast %111 : vector<8xf32> to vector<8x1xf32>
    %cst_43 = arith.constant 5.000000e-01 : f32
    %113 = vector.broadcast %cst_43 : f32 to vector<8x1xf32>
    %114 = arith.mulf %113, %112 : vector<8x1xf32>
    %115 = arith.subf %83, %12 : vector<8x8x128xf32>
    %116 = arith.mulf %115, %115 : vector<8x8x128xf32>
    %cst_44 = arith.constant dense<0.000000e+00> : vector<8x8xf32>
    %117 = vector.multi_reduction <add>, %116, %cst_44 [2] : vector<8x8x128xf32> to vector<8x8xf32>
    %cst_45 = arith.constant 9.99999971E-10 : f32
    %118 = vector.broadcast %cst_45 : f32 to vector<8x8xf32>
    %119 = arith.addf %117, %118 : vector<8x8xf32>
    %120 = math.sqrt %119 : vector<8x8xf32>
    %cst_46 = arith.constant 0.000000e+00 : f32
    %121 = vector.broadcast %cst_46 : f32 to vector<8x8xf32>
    %122 = arith.select %86, %120, %121 : vector<8x8xi1>, vector<8x8xf32>
    %cst_47 = arith.constant 1.000000e+00 : f32
    %123 = vector.broadcast %cst_47 : f32 to vector<8x8xf32>
    %124 = arith.subf %123, %122 : vector<8x8xf32>
    %cst_48 = arith.constant 0.000000e+00 : f32
    %125 = vector.broadcast %cst_48 : f32 to vector<8x8xf32>
    %126 = arith.maximumf %124, %125 : vector<8x8xf32>
    %127 = arith.mulf %126, %126 : vector<8x8xf32>
    %cst_49 = arith.constant dense<0.000000e+00> : vector<8xf32>
    %128 = vector.multi_reduction <add>, %127, %cst_49 [1] : vector<8x8xf32> to vector<8xf32>
    %129 = vector.shape_cast %128 : vector<8xf32> to vector<8x1xf32>
    %cst_50 = arith.constant 5.000000e-01 : f32
    %130 = vector.broadcast %cst_50 : f32 to vector<8x1xf32>
    %131 = arith.mulf %130, %129 : vector<8x1xf32>
    %cst_51 = arith.constant 1.000000e+00 : f32
    %132 = vector.broadcast %cst_51 : f32 to vector<8x1xf32>
    %133 = arith.mulf %132, %131 : vector<8x1xf32>
    %134 = arith.extui %78 : vector<8x8xi1> to vector<8x8xi32>
    %135 = arith.sitofp %134 : vector<8x8xi32> to vector<8x8xf32>
    %cst_52 = arith.constant dense<0.000000e+00> : vector<8xf32>
    %136 = vector.multi_reduction <add>, %135, %cst_52 [1] : vector<8x8xf32> to vector<8xf32>
    %137 = vector.shape_cast %136 : vector<8xf32> to vector<8x1xf32>
    %cst_53 = arith.constant 0.000000e+00 : f32
    %138 = vector.broadcast %cst_53 : f32 to vector<8x1xf32>
    %139 = arith.cmpf one, %137, %138 : vector<8x1xf32>
    %cst_54 = arith.constant 1.000000e+00 : f32
    %140 = vector.broadcast %cst_54 : f32 to vector<8x1xf32>
    %141 = arith.maximumf %137, %140 : vector<8x1xf32>
    %142 = arith.divf %97, %141 : vector<8x1xf32>
    %143 = arith.select %139, %142, %97 : vector<8x1xi1>, vector<8x1xf32>
    %144 = arith.extui %82 : vector<8x8xi1> to vector<8x8xi32>
    %145 = arith.sitofp %144 : vector<8x8xi32> to vector<8x8xf32>
    %cst_55 = arith.constant dense<0.000000e+00> : vector<8xf32>
    %146 = vector.multi_reduction <add>, %145, %cst_55 [1] : vector<8x8xf32> to vector<8xf32>
    %147 = vector.shape_cast %146 : vector<8xf32> to vector<8x1xf32>
    %cst_56 = arith.constant 0.000000e+00 : f32
    %148 = vector.broadcast %cst_56 : f32 to vector<8x1xf32>
    %149 = arith.cmpf one, %147, %148 : vector<8x1xf32>
    %cst_57 = arith.constant 1.000000e+00 : f32
    %150 = vector.broadcast %cst_57 : f32 to vector<8x1xf32>
    %151 = arith.maximumf %147, %150 : vector<8x1xf32>
    %152 = arith.divf %114, %151 : vector<8x1xf32>
    %153 = arith.select %149, %152, %114 : vector<8x1xi1>, vector<8x1xf32>
    %154 = arith.extui %86 : vector<8x8xi1> to vector<8x8xi32>
    %155 = arith.sitofp %154 : vector<8x8xi32> to vector<8x8xf32>
    %cst_58 = arith.constant dense<0.000000e+00> : vector<8xf32>
    %156 = vector.multi_reduction <add>, %155, %cst_58 [1] : vector<8x8xf32> to vector<8xf32>
    %157 = vector.shape_cast %156 : vector<8xf32> to vector<8x1xf32>
    %cst_59 = arith.constant 0.000000e+00 : f32
    %158 = vector.broadcast %cst_59 : f32 to vector<8x1xf32>
    %159 = arith.cmpf one, %157, %158 : vector<8x1xf32>
    %cst_60 = arith.constant 1.000000e+00 : f32
    %160 = vector.broadcast %cst_60 : f32 to vector<8x1xf32>
    %161 = arith.maximumf %157, %160 : vector<8x1xf32>
    %162 = arith.divf %133, %161 : vector<8x1xf32>
    %163 = arith.select %159, %162, %133 : vector<8x1xi1>, vector<8x1xf32>
    %164 = arith.addf %143, %153 : vector<8x1xf32>
    %165 = arith.addf %164, %163 : vector<8x1xf32>
    %cst_61 = arith.constant 1.000000e+00 : f32
    %166 = vector.broadcast %cst_61 : f32 to vector<8x1xf32>
    %167 = arith.mulf %166, %165 : vector<8x1xf32>
    %cst_62 = arith.constant 1.000000e+00 : f32
    %168 = vector.broadcast %cst_62 : f32 to vector<8x1xf32>
    %169 = arith.mulf %168, %74 : vector<8x1xf32>
    %170 = arith.addf %167, %169 : vector<8x1xf32>
    %171 = tpu.iota {dimensions = array<i32: 0>} : vector<8x1xi32>
    %c8_i32 = arith.constant 8 : i32
    %172 = arith.muli %arg0, %c8_i32 : i32
    %173 = vector.broadcast %172 : i32 to vector<8x1xi32>
    %174 = arith.addi %171, %173 : vector<8x1xi32>
    %c16_i32 = arith.constant 16 : i32
    %175 = vector.broadcast %c16_i32 : i32 to vector<8x1xi32>
    %176 = arith.cmpi slt, %174, %175 : vector<8x1xi32>
    %cst_63 = arith.constant 0.000000e+00 : f32
    %177 = vector.broadcast %cst_63 : f32 to vector<8x1xf32>
    %178 = arith.select %176, %170, %177 : vector<8x1xi1>, vector<8x1xf32>
    %179 = vector.shape_cast %178 : vector<8x1xf32> to vector<1x8x1xf32>
    %cst_64 = arith.constant dense<0.000000e+00> : vector<1xf32>
    %180 = vector.multi_reduction <add>, %179, %cst_64 [1, 2] : vector<1x8x1xf32> to vector<1xf32>
    %181 = vector.shape_cast %180 : vector<1xf32> to vector<1x1x1xf32>
    %182 = vector.extract %181[0, 0, 0] : f32 from vector<1x1x1xf32>
    %183 = vector.broadcast %182 : f32 to vector<8x128xf32>
    %c0_65 = arith.constant 0 : index
    %c0_66 = arith.constant 0 : index
    %184 = vector.load %arg5[%c0_65, %c0_66] : memref<8x128xf32, #tpu.memory_space<vmem>>, vector<8x128xf32>
    tpu.vector_store %arg5[%c0_65, %c0_66], %183 {strides = array<i32>} : memref<8x128xf32, #tpu.memory_space<vmem>>, vector<8x128xf32>,
    return
  }
  func.func @transform_0(%arg0: i32) -> (i32, i32) {
    %c0_i32 = arith.constant 0 : i32
    %c0_i32_0 = arith.constant 0 : i32
    return %arg0, %c0_i32 : i32, i32
  }
  func.func @transform_1(%arg0: i32) -> (i32, i32) {
    %c0_i32 = arith.constant 0 : i32
    %c0_i32_0 = arith.constant 0 : i32
    return %arg0, %c0_i32 : i32, i32
  }
  func.func @transform_2(%arg0: i32) -> (i32, i32) {
    %c0_i32 = arith.constant 0 : i32
    %c0_i32_0 = arith.constant 0 : i32
    return %arg0, %c0_i32 : i32, i32
  }
  func.func @transform_3(%arg0: i32) -> (i32, i32) {
    %c0_i32 = arith.constant 0 : i32
    %c0_i32_0 = arith.constant 0 : i32
    %c0_i32_1 = arith.constant 0 : i32
    return %c0_i32, %c0_i32_0 : i32, i32
  }
  func.func @transform_4(%arg0: i32) -> (i32, i32) {
    %c0_i32 = arith.constant 0 : i32
    %c0_i32_0 = arith.constant 0 : i32
    return %arg0, %c0_i32 : i32, i32
  }
}

</mosaic_0001>

<bundles_post_ra>
// kernel: tpu_custom_call.1
= control target key start
LH: loop header
LB: loop body
LE: loop exit
PB: predicated region body
PF: predicated region fallthrough
CT: control target
= control target key end

     0   :  { %9 = vsyncpa [#allocation3], 0  ;;  %s5560_s0 = inlined_call_operand.vmem [shape: s32[768,1], index: 0, kind: input, shape index: {}]   ;;  %s5561_s1 = inlined_call_operand.vmem [shape: s32[16,48], index: 1, kind: input, shape index: {}]   ;;  %s5562_s2 = inlined_call_operand.vmem [shape: f32[16,128], index: 2, kind: input, shape index: {}]   ;;  %s5563_s3 = inlined_call_operand.vmem [shape: f32[512,128], index: 3, kind: input, shape index: {}]   ;;  %s5564_s4 = inlined_call_operand.hbm [shape: f32[16,128], index: 4, kind: output, shape index: {}]  }
   0x1   :  { %11 = vsyncpa [#allocation3 + $0x1], 0  ;;  %s3884_s15 = smov 0   ;;  %s3886_s16 = smov 0  }
   0x2   :  { %s3888_s17 = smov 0   ;;  %s3890_s18 = smov 0  }
   0x3 LB: > { %s3905_s19 = sadd.s32 4294967295, %s3847_s18   ;;  %s3054_s20 = sadd.s32 4294967294, %s3847_s18   ;;  %s3847_s18 = sphi %s3890_s18, %s5594_s18   ;;  %s3843_s17 = sphi %s3888_s17, %s5593_s17   ;;  %s3839_s16 = sphi %s3886_s16, %s5592_s16   ;;  %s3835_s15 = sphi %s3884_s15, %s5591_s15  }
   0x4   : > { %s3909_s21 = sadd.s32 1, %s3847_s18   ;;  %s123_s22 = sadd.s32 1, %s3843_s17 }
   0x5   : > { %s120_s23 = ssub.s32 %s3847_s18, %s3909_s21  ;;  %p133_p0 = scmp.ne.s32.totalorder %s3843_s17, %s3839_s16 }
   0x6   : > { %p121_p1 = scmp.eq.s32.totalorder %s120_s23, 0  ;;  %p134_p2 = scmp.eq.s32.totalorder %s3905_s19, 1 }
   0x7   : > { %p139_p3 = scmp.ne.s32.totalorder %s3839_s16, %s3835_s15  ;;  %p140_p4 = scmp.eq.s32.totalorder %s3054_s20, 1 }
   0x8   : > { %s3920_s24 = scalar_select %p121_p1, %s3843_s17, %s123_s22  }
   0x9   : > { %p3922_p5 = por %p134_p2, %p133_p0  ;;  %p3926_p6 = por %p140_p4, %p139_p3 }
   0xa   : > { %p3057_p7 = scmp.ge.s32.totalorder %s3847_s18, 1  ;;  %p184_p8 = scmp.lt.s32.totalorder %s3847_s18, 3 }
   0xc   : > { %p185_p9 = pnand %p3057_p7, %p184_p8 }
   0xd   : > { %s218_s27 = smul.u32 (!%p185_p9), 48, %s3905_s19  ;;  %v1005_v0 = vld [vmem:[%s5563_s3] sm:$0xff] (!%p185_p9)  ;;  %v1006_v1 = vld [vmem:[%s5563_s3 + $0x8] sm:$0xff] (!%p185_p9)  ;;  %v3849_v3 = vmov (!%p185_p9), 0   ;;  %v1007_v6 = vld [vmem:[%s5563_s3 + $0x10] sm:$0xff] (!%p185_p9)  ;;  %v3850_v8 = vmov (!%p185_p9), 0.0|0.0  }
   0xe   : > { %188 = sbr.rel (%p185_p9) target bundleno = 1229 (0x4cd), region = 36  ;;  %v1037_v2 = vld [vmem:[%s5563_s3 + $0x100] sm:$0xff] (!%p185_p9)  ;;  %3647 = vset.pattern.permute.xlu1 (!%p185_p9), %v3849_v3  ;;  %3646 = vset.pattern.permute.xlu0 (!%p185_p9), %v3849_v3  ;;  %v3453_v4 = vpack.c.bf16 (!%p185_p9), %v1006_v1, %v1005_v0  ;;  %v1038_v5 = vld [vmem:[%s5563_s3 + $0x108] sm:$0xff] (!%p185_p9)  ;;  %v1008_v7 = vld [vmem:[%s5563_s3 + $0x18] sm:$0xff] (!%p185_p9)  ;;  %p224_p11 = scmp.lt.s32.totalorder (!%p185_p9), %s3905_s19, 1 }
   0xf   : > { %p219_p10 = scmp.lt.s32.totalorder (!%p185_p9), %s218_s27, 95  ;;  %3452 = vmatprep.subr.bf16.mxu1 (!%p185_p9), %v3850_v8  ;;  %3500 = vmatprep.subr.bf16.mxu0 (!%p185_p9), %v3850_v8  ;;  %v3501_v9 = vpack.c.bf16 (!%p185_p9), %v1038_v5, %v1037_v2  ;;  %v1039_v10 = vld [vmem:[%s5563_s3 + $0x110] sm:$0xff] (!%p185_p9)  ;;  %v1040_v11 = vld [vmem:[%s5563_s3 + $0x118] sm:$0xff] (!%p185_p9)  ;;  %v3456_v12 = vpack.c.bf16 (!%p185_p9), %v1008_v7, %v1007_v6  ;;  %v1009_v14 = vld [vmem:[%s5563_s3 + $0x20] sm:$0xff] (!%p185_p9)  ;;  %s3854_s12 = smov (!%p185_p9), 104  }
  0x10   : > { %3454 = vmatpush1.bf16.msra.mxu1 (!%p185_p9), %v3453_v4  ;;  %v3504_v13 = vpack.c.bf16 (!%p185_p9), %v1040_v11, %v1039_v10  ;;  %v1010_v15 = vld [vmem:[%s5563_s3 + $0x28] sm:$0xff] (!%p185_p9)  ;;  %v1041_v16 = vld [vmem:[%s5563_s3 + $0x120] sm:$0xff] (!%p185_p9)  ;;  %v1011_v19 = vld [vmem:[%s5563_s3 + $0x30] sm:$0xff] (!%p185_p9)  ;;  %s3855_s14 = smov (!%p185_p9), 88   ;;  %s3856_s20 = smov (!%p185_p9), 96  }
  0x11   : > { %3502 = vmatpush1.bf16.msra.mxu0 (!%p185_p9), %v3501_v9  ;;  %3455 = vmatprep.subr.bf16.mxu1 (!%p185_p9), %v3850_v8  ;;  %v1042_v17 = vld [vmem:[%s5563_s3 + $0x128] sm:$0xff] (!%p185_p9)  ;;  %v3459_v18 = vpack.c.bf16 (!%p185_p9), %v1010_v15, %v1009_v14  ;;  %v1012_v23 = vld [vmem:[%s5563_s3 + $0x38] sm:$0xff] (!%p185_p9)  ;;  %v1043_v24 = vld [vmem:[%s5563_s3 + $0x130] sm:$0xff] (!%p185_p9)  ;;  %s3447_s22 = sshll.u32 (!%p185_p9), %s3905_s19, 3  ;;  %s215_s23 = sand.u32 (!%p185_p9), 1, %s3839_s16  }
  0x12   : > { %3503 = vmatprep.subr.bf16.mxu0 (!%p185_p9), %v3850_v8  ;;  %v3507_v22 = vpack.c.bf16 (!%p185_p9), %v1042_v17, %v1041_v16  ;;  %v1044_v25 = vld [vmem:[%s5563_s3 + $0x138] sm:$0xff] (!%p185_p9)  ;;  %v3462_v28 = vpack.c.bf16 (!%p185_p9), %v1012_v23, %v1011_v19  ;;  %v1013_v30 = vld [vmem:[%s5563_s3 + $0x40] sm:$0xff] (!%p185_p9)  ;;  %v1014_v31 = vld [vmem:[%s5563_s3 + $0x48] sm:$0xff] (!%p185_p9)  ;;  %s3058_s28 = sshll.u32 (!%p185_p9), %s215_s23, 3  ;;  %s2958_s9 = scalar_lea.sflag (!%p185_p9), [#allocation3], %s215_s23 }
  0x13   : > { %v3510_v29 = vpack.c.bf16 (!%p185_p9), %v1044_v25, %v1043_v24  ;;  %v1045_v32 = vld [vmem:[%s5563_s3 + $0x140] sm:$0xff] (!%p185_p9)  ;;  %v1046_v33 = vld [vmem:[%s5563_s3 + $0x148] sm:$0xff] (!%p185_p9)  ;;  %v3465_v36 = vpack.c.bf16 (!%p185_p9), %v1014_v31, %v1013_v30  ;;  %v1015_v38 = vld [vmem:[%s5563_s3 + $0x50] sm:$0xff] (!%p185_p9)  ;;  %s217_s29 = scalar_lea.vmem (!%p185_p9), [#allocation2], %s3058_s28 }
  0x14   : > { %3457 = vmatpush1.bf16.msra.mxu1 (!%p185_p9), %v3456_v12  ;;  %v3513_v37 = vpack.c.bf16 (!%p185_p9), %v1046_v33, %v1045_v32  ;;  %v1016_v39 = vld [vmem:[%s5563_s3 + $0x58] sm:$0xff] (!%p185_p9)  ;;  %v1047_v40 = vld [vmem:[%s5563_s3 + $0x150] sm:$0xff] (!%p185_p9)  ;;  %v1017_v48 = vld [vmem:[%s5563_s3 + $0x60] sm:$0xff] (!%p185_p9)  ;;  %s2971_s30 = sshll.u32 (!%p185_p9), %s217_s29, 4  ;;  %s5515_s30 = int_to_ptr.vmem [resolvable:$true] %s2971_s30 }
  0x15   : > { %s5596_s27 = smov (!%p219_p10, %s218_s27), 95  ;;  %3505 = vmatpush1.bf16.msra.mxu0 %v3504_v13  ;;  %3458 = vmatprep.subr.bf16.mxu1 %v3850_v8  ;;  %v1048_v41 = vld [vmem:[%s5563_s3 + $0x158] sm:$0xff]  ;;  %v3468_v44 = vpack.c.bf16 %v1016_v39, %v1015_v38  ;;  %v1018_v49 = vld [vmem:[%s5563_s3 + $0x68] sm:$0xff]  ;;  %v1049_v51 = vld [vmem:[%s5563_s3 + $0x160] sm:$0xff] }
  0x16   : > { %s3059_s10 = sshll.u32 %s5596_s27, 3  ;;  %3506 = vmatprep.subr.bf16.mxu0 %v3850_v8  ;;  %v3516_v45 = vpack.c.bf16 %v1048_v41, %v1047_v40  ;;  %v3471_v50 = vpack.c.bf16 %v1018_v49, %v1017_v48  ;;  %v1050_v52 = vld [vmem:[%s5563_s3 + $0x168] sm:$0xff]  ;;  %v1019_v55 = vld [vmem:[%s5563_s3 + $0x70] sm:$0xff]  ;;  %v1020_v56 = vld [vmem:[%s5563_s3 + $0x78] sm:$0xff]  ;;  %s3857_s27 = smov 112  }
  0x17   : > { %s3976_s13 = scalar_lea.vmem %s5560_s0, %s3059_s10  ;;  %v3519_v54 = vpack.c.bf16 %v1050_v52, %v1049_v51  ;;  %v1051_v58 = vld [vmem:[%s5563_s3 + $0x170] sm:$0xff]  ;;  %v1052_v59 = vld [vmem:[%s5563_s3 + $0x178] sm:$0xff]  ;;  %v3474_v60 = vpack.c.bf16 %v1020_v56, %v1019_v55  ;;  %v1021_v62 = vld [vmem:[%s5563_s3 + $0x80] sm:$0xff]  ;;  %s3785_s10 = scalar_lea.vmem %s5515_s30, 128 }
  0x18   : > { %v234_v20 = vld [vmem:[%s3976_s13 + $0x10] sm:$0xff]  ;;  %v232_v21 = vld [vmem:[%s3976_s13] sm:$0xff]  ;;  %v235_v26 = vld [vmem:[%s3976_s13 + $0x18] sm:$0xff]  ;;  %3460 = vmatpush1.bf16.msra.mxu1 %v3459_v18  ;;  %v3522_v61 = vpack.c.bf16 %v1052_v59, %v1051_v58  ;;  %p3786_p12 = scmp.ne.s32.totalorder %s5515_s30, %s3785_s10 }
  0x19   : > { %292 = vperm.xlu1 %3647, %v234_v20   ;;  %286 = vperm.xlu0 %3646, %v232_v21   ;;  %v233_v27 = vld [vmem:[%s3976_s13 + $0x8] sm:$0xff]  ;;  %v236_v35 = vld [vmem:[%s3976_s13 + $0x20] sm:$0xff]  ;;  %v239_v42 = vld [vmem:[%s3976_s13 + $0x38] sm:$0xff] }
  0x1a   : > { %3508 = vmatpush1.bf16.msra.mxu0 %v3507_v22  ;;  %3461 = vmatprep.subr.bf16.mxu1 %v3850_v8  ;;  %v237_v34 = vld [vmem:[%s3976_s13 + $0x28] sm:$0xff]  ;;  %v238_v43 = vld [vmem:[%s3976_s13 + $0x30] sm:$0xff]  ;;  %v240_v47 = vld [vmem:[%s3976_s13 + $0x40] sm:$0xff]  ;;  %p3787_p13 = pnand %p3786_p12, %p3922_p5 }
  0x1b   : > { %3509 = vmatprep.subr.bf16.mxu0 %v3850_v8  ;;  %v241_v46 = vld [vmem:[%s3976_s13 + $0x48] sm:$0xff]  ;;  %v243_v53 = vld [vmem:[%s3976_s13 + $0x58] sm:$0xff]  ;;  %v242_v57 = vld [vmem:[%s3976_s13 + $0x50] sm:$0xff] }
  0x1c   : > { %3463 = vmatpush1.bf16.msra.mxu1 %v3462_v28  ;;  %v1022_v63 = vld [vmem:[%s5563_s3 + $0x88] sm:$0xff]  ;;  %v1053_v0 = vld [vmem:[%s5563_s3 + $0x180] sm:$0xff]  ;;  %v1023_v6 = vld [vmem:[%s5563_s3 + $0x90] sm:$0xff]  ;;  %p3788_p0 = pneg %p3787_p13 }
  0x1d   : > { %295 = vperm.xlu1 %3647, %v235_v26   ;;  %289 = vperm.xlu0 %3646, %v233_v27   ;;  %v1054_v1 = vld [vmem:[%s5563_s3 + $0x188] sm:$0xff]  ;;  %v244_v3 = vld [vmem:[%s3976_s13 + $0x60] sm:$0xff]  ;;  %v3477_v4 = vpack.c.bf16 %v1022_v63, %v1021_v62  ;;  %v1024_v7 = vld [vmem:[%s5563_s3 + $0x98] sm:$0xff] }
  0x1e   : > { %3511 = vmatpush1.bf16.msra.mxu0 %v3510_v29  ;;  %3464 = vmatprep.subr.bf16.mxu1 %v3850_v8  ;;  %v245_v2 = vld [vmem:[%s3976_s13 + $0x68] sm:$0xff]  ;;  %v3525_v5 = vpack.c.bf16 %v1054_v1, %v1053_v0  ;;  %v1055_v9 = vld [vmem:[%s5563_s3 + $0x190] sm:$0xff]  ;;  %v1056_v10 = vld [vmem:[%s5563_s3 + $0x198] sm:$0xff]  ;;  %v3480_v13 = vpack.c.bf16 %v1024_v7, %v1023_v6 }
  0x1f   : > { %3512 = vmatprep.subr.bf16.mxu0 %v3850_v8  ;;  %v247_v11 = vld [vmem:[%s3976_s13 + $0x78] sm:$0xff]  ;;  %v246_v12 = vld [vmem:[%s3976_s13 + $0x70] sm:$0xff]  ;;  %v3528_v14 = vpack.c.bf16 %v1056_v10, %v1055_v9  ;;  %v1025_v15 = vld [vmem:[%s5563_s3 + $0xa0] sm:$0xff] }
  0x20   : > { %3466 = vmatpush1.bf16.msra.mxu1 %v3465_v36  ;;  %v1026_v16 = vld [vmem:[%s5563_s3 + $0xa8] sm:$0xff]  ;;  %v1057_v17 = vld [vmem:[%s5563_s3 + $0x1a0] sm:$0xff]  ;;  %v1027_v23 = vld [vmem:[%s5563_s3 + $0xb0] sm:$0xff] }
  0x21   : > { %301 = vperm.xlu1 %3647, %v237_v34   ;;  %298 = vperm.xlu0 %3646, %v236_v35   ;;  %v1058_v18 = vld [vmem:[%s5563_s3 + $0x1a8] sm:$0xff]  ;;  %v248_v20 = vld [vmem:[%s3976_s13 + $0x80] sm:$0xff]  ;;  %v3483_v21 = vpack.c.bf16 %v1026_v16, %v1025_v15  ;;  %v1028_v24 = vld [vmem:[%s5563_s3 + $0xb8] sm:$0xff] }
  0x22   : > { %3514 = vmatpush1.bf16.msra.mxu0 %v3513_v37  ;;  %3467 = vmatprep.subr.bf16.mxu1 %v3850_v8  ;;  %v249_v19 = vld [vmem:[%s3976_s13 + $0x88] sm:$0xff]  ;;  %v3531_v22 = vpack.c.bf16 %v1058_v18, %v1057_v17  ;;  %v1059_v25 = vld [vmem:[%s5563_s3 + $0x1b0] sm:$0xff]  ;;  %v1060_v26 = vld [vmem:[%s5563_s3 + $0x1b8] sm:$0xff]  ;;  %v3486_v29 = vpack.c.bf16 %v1028_v24, %v1027_v23 }
  0x23   : > { %3515 = vmatprep.subr.bf16.mxu0 %v3850_v8  ;;  %v251_v27 = vld [vmem:[%s3976_s13 + $0x98] sm:$0xff]  ;;  %v250_v28 = vld [vmem:[%s3976_s13 + $0x90] sm:$0xff]  ;;  %v3534_v30 = vpack.c.bf16 %v1060_v26, %v1059_v25  ;;  %v1029_v31 = vld [vmem:[%s5563_s3 + $0xc0] sm:$0xff]  ;;  %v3851_v25 = vmov 1.0  }
  0x24   : > { %3469 = vmatpush1.bf16.msra.mxu1 %v3468_v44  ;;  %v1030_v32 = vld [vmem:[%s5563_s3 + $0xc8] sm:$0xff]  ;;  %v1061_v33 = vld [vmem:[%s5563_s3 + $0x1c0] sm:$0xff]  ;;  %v1031_v39 = vld [vmem:[%s5563_s3 + $0xd0] sm:$0xff] }
  0x25   : > { %307 = vperm.xlu1 %3647, %v239_v42   ;;  %304 = vperm.xlu0 %3646, %v238_v43   ;;  %v1062_v34 = vld [vmem:[%s5563_s3 + $0x1c8] sm:$0xff]  ;;  %v252_v36 = vld [vmem:[%s3976_s13 + $0xa0] sm:$0xff]  ;;  %v3489_v37 = vpack.c.bf16 %v1030_v32, %v1029_v31  ;;  %v1032_v40 = vld [vmem:[%s5563_s3 + $0xd8] sm:$0xff] }
  0x26   : > { %3517 = vmatpush1.bf16.msra.mxu0 %v3516_v45  ;;  %3470 = vmatprep.subr.bf16.mxu1 %v3850_v8  ;;  %v253_v35 = vld [vmem:[%s3976_s13 + $0xa8] sm:$0xff]  ;;  %v3537_v38 = vpack.c.bf16 %v1062_v34, %v1061_v33  ;;  %v1063_v41 = vld [vmem:[%s5563_s3 + $0x1d0] sm:$0xff]  ;;  %v1064_v42 = vld [vmem:[%s5563_s3 + $0x1d8] sm:$0xff]  ;;  %v3492_v45 = vpack.c.bf16 %v1032_v40, %v1031_v39 }
  0x27   : > { %3518 = vmatprep.subr.bf16.mxu0 %v3850_v8  ;;  %v255_v43 = vld [vmem:[%s3976_s13 + $0xb8] sm:$0xff]  ;;  %v254_v44 = vld [vmem:[%s3976_s13 + $0xb0] sm:$0xff]  ;;  %v1034_v48 = vld [vmem:[%s5563_s3 + $0xe8] sm:$0xff] }
  0x28   : > { %3472 = vmatpush1.bf16.msra.mxu1 %v3471_v50  ;;  %v1065_v49 = vld [vmem:[%s5563_s3 + $0x1e0] sm:$0xff]  ;;  %v1066_v50 = vld [vmem:[%s5563_s3 + $0x1e8] sm:$0xff]  ;;  %v1035_v55 = vld [vmem:[%s5563_s3 + $0xf0] sm:$0xff] }
  0x29   : > { %313 = vperm.xlu1 %3647, %v241_v46   ;;  %310 = vperm.xlu0 %3646, %v240_v47   ;;  %v3540_v46 = vpack.c.bf16 %v1064_v42, %v1063_v41  ;;  %v1033_v47 = vld [vmem:[%s5563_s3 + $0xe0] sm:$0xff]  ;;  %v257_v51 = vld [vmem:[%s3976_s13 + $0xc8] sm:$0xff]  ;;  %v1036_v56 = vld [vmem:[%s5563_s3 + $0xf8] sm:$0xff] }
  0x2a   : > { %3520 = vmatpush1.bf16.msra.mxu0 %v3519_v54  ;;  %3473 = vmatprep.subr.bf16.mxu1 %v3850_v8  ;;  %v256_v52 = vld [vmem:[%s3976_s13 + $0xc0] sm:$0xff]  ;;  %v3543_v54 = vpack.c.bf16 %v1066_v50, %v1065_v49  ;;  %v1068_v58 = vld [vmem:[%s5563_s3 + $0x1f8] sm:$0xff]  ;;  %v261_v63 = vld [vmem:[%s3976_s13 + $0xe8] sm:$0xff] }
  0x2b   : > { %3521 = vmatprep.subr.bf16.mxu0 %v3850_v8  ;;  %v259_v59 = vld [vmem:[%s3976_s13 + $0xd8] sm:$0xff]  ;;  %v260_v0 = vld [vmem:[%s3976_s13 + $0xe0] sm:$0xff]  ;;  %v269_v6 = vld [vmem:[%s3976_s13 + $0x128] sm:$0xff] }
  0x2c   : > { %3475 = vmatpush1.bf16.msra.mxu1 %v3474_v60  ;;  %v258_v60 = vld [vmem:[%s3976_s13 + $0xd0] sm:$0xff]  ;;  %v263_v1 = vld [vmem:[%s3976_s13 + $0xf8] sm:$0xff]  ;;  %v268_v7 = vld [vmem:[%s3976_s13 + $0x120] sm:$0xff] }
  0x2d   : > { %319 = vperm.xlu1 %3647, %v243_v53   ;;  %316 = vperm.xlu0 %3646, %v242_v57   ;;  %v3495_v53 = vpack.c.bf16 %v1034_v48, %v1033_v47  ;;  %v1067_v57 = vld [vmem:[%s5563_s3 + $0x1f0] sm:$0xff]  ;;  %v271_v9 = vld [vmem:[%s3976_s13 + $0x138] sm:$0xff]  ;;  %v277_v15 = vld [vmem:[%s3976_s13 + $0x168] sm:$0xff] }
  0x2e   : > { %3523 = vmatpush1.bf16.msra.mxu0 %v3522_v61  ;;  %3476 = vmatprep.subr.bf16.mxu1 %v3850_v8  ;;  %v3498_v61 = vpack.c.bf16 %v1036_v56, %v1035_v55  ;;  %v3546_v62 = vpack.c.bf16 %v1068_v58, %v1067_v57  ;;  %v270_v10 = vld [vmem:[%s3976_s13 + $0x130] sm:$0xff]  ;;  %v276_v16 = vld [vmem:[%s3976_s13 + $0x160] sm:$0xff]  ;;  %v279_v17 = vld [vmem:[%s3976_s13 + $0x178] sm:$0xff] }
  0x2f   : > { %3524 = vmatprep.subr.bf16.mxu0 %v3850_v8  ;;  %v278_v18 = vld [vmem:[%s3976_s13 + $0x170] sm:$0xff] }
  0x30   : > { %3478 = vmatpush1.bf16.msra.mxu1 %v3477_v4  ;;  %v264_v4 = vld [vmem:[%s3976_s13 + $0x100] sm:$0xff] }
  0x31   : > { %325 = vperm.xlu1 %3647, %v245_v2   ;;  %322 = vperm.xlu0 %3646, %v244_v3   ;;  %v262_v2 = vld [vmem:[%s3976_s13 + $0xf0] sm:$0xff]  ;;  %v265_v3 = vld [vmem:[%s3976_s13 + $0x108] sm:$0xff] }
  0x32   : > { %3526 = vmatpush1.bf16.msra.mxu0 %v3525_v5  ;;  %3479 = vmatprep.subr.bf16.mxu1 %v3850_v8  ;;  %v267_v5 = vld [vmem:[%s3976_s13 + $0x118] sm:$0xff] }
  0x33   : > { %3527 = vmatprep.subr.bf16.mxu0 %v3850_v8 }
  0x34   : > { %3481 = vmatpush1.bf16.msra.mxu1 %v3480_v13  ;;  %v275_v13 = vld [vmem:[%s3976_s13 + $0x158] sm:$0xff] }
  0x35   : > { %331 = vperm.xlu1 %3647, %v247_v11   ;;  %328 = vperm.xlu0 %3646, %v246_v12   ;;  %v273_v11 = vld [vmem:[%s3976_s13 + $0x148] sm:$0xff]  ;;  %v272_v12 = vld [vmem:[%s3976_s13 + $0x140] sm:$0xff] }
  0x36   : > { %3529 = vmatpush1.bf16.msra.mxu0 %v3528_v14  ;;  %3482 = vmatprep.subr.bf16.mxu1 %v3850_v8  ;;  %v274_v14 = vld [vmem:[%s3976_s13 + $0x150] sm:$0xff] }
  0x37   : > { %3530 = vmatprep.subr.bf16.mxu0 %v3850_v8 }
  0x38   : > { %3484 = vmatpush1.bf16.msra.mxu1 %v3483_v21 }
  0x39   : > { %337 = vperm.xlu1 %3647, %v249_v19   ;;  %334 = vperm.xlu0 %3646, %v248_v20   ;;  %v280_v19 = vlaneseq }
  0x3a   : > { %3532 = vmatpush1.bf16.msra.mxu0 %v3531_v22  ;;  %3485 = vmatprep.subr.bf16.mxu1 %v3850_v8 }
  0x3b   : > { %3533 = vmatprep.subr.bf16.mxu0 %v3850_v8  ;;  %v4211_v20 = vand.u32 127, %v280_v19 }
  0x3c   : > { %3487 = vmatpush1.bf16.msra.mxu1 %v3486_v29 }
  0x3d   : > { %343 = vperm.xlu1 %3647, %v251_v27   ;;  %340 = vperm.xlu0 %3646, %v250_v28   ;;  %v4214_v21 = vadd.s32 128, %v4211_v20  ;;  %v4217_v22 = vadd.s32 384, %v4211_v20  ;;  %v4220_v23 = vadd.s32 256, %v4211_v20 }
  0x3e   : > { %3535 = vmatpush1.bf16.msra.mxu0 %v3534_v30  ;;  %3488 = vmatprep.subr.bf16.mxu1 %v3850_v8 }
  0x3f   : > { %3536 = vmatprep.subr.bf16.mxu0 %v3850_v8 }
  0x40   : > { %3490 = vmatpush1.bf16.msra.mxu1 %v3489_v37 }
  0x41   : > { %349 = vperm.xlu1 %3647, %v253_v35   ;;  %346 = vperm.xlu0 %3646, %v252_v36  }
  0x42   : > { %3538 = vmatpush1.bf16.msra.mxu0 %v3537_v38  ;;  %3491 = vmatprep.subr.bf16.mxu1 %v3850_v8 }
  0x43   : > { %3539 = vmatprep.subr.bf16.mxu0 %v3850_v8 }
  0x44   : > { %3493 = vmatpush1.bf16.msra.mxu1 %v3492_v45 }
  0x45   : > { %355 = vperm.xlu1 %3647, %v255_v43   ;;  %352 = vperm.xlu0 %3646, %v254_v44  }
  0x46   : > { %3541 = vmatpush1.bf16.msra.mxu0 %v3540_v46  ;;  %3494 = vmatprep.subr.bf16.mxu1 %v3850_v8 }
  0x47   : > { %3542 = vmatprep.subr.bf16.mxu0 %v3850_v8 }
  0x48   : > { %3496 = vmatpush1.bf16.msra.mxu1 %v3495_v53 }
  0x49   : > { %361 = vperm.xlu1 %3647, %v257_v51   ;;  %358 = vperm.xlu0 %3646, %v256_v52  }
  0x4a   : > { %3544 = vmatpush1.bf16.msra.mxu0 %v3543_v54  ;;  %3497 = vmatprep.subr.bf16.mxu1 %v3850_v8 }
  0x4b   : > { %3545 = vmatprep.subr.bf16.mxu0 %v3850_v8  ;;  %v266_v8 = vld [vmem:[%s3976_s13 + $0x110] sm:$0xff]  ;;  %s4608_s13 = scalar_select %p224_p11, %s3905_s19, 1 }
  0x4c   : > { %3499 = vmatpush1.bf16.msra.mxu1 %v3498_v61 }
  0x4d   : > { %367 = vperm.xlu1 %3647, %v259_v59   ;;  %364 = vperm.xlu0 %3646, %v258_v60   ;;  %s3060_s5 = sshll.u32 %s4608_s13, 3  ;;  %s3449_s13 = sshll.u32 %s3905_s19, 7 }
  0x4e   : > { %3547 = vmatpush1.bf16.msra.mxu0 %v3546_v62  ;;  %s231_s8 = scalar_lea.vmem %s5562_s2, %s3060_s5  ;;  %s227_s11 = scalar_lea.vmem %s5561_s1, %s3060_s5 }
  0x4f   : > { %s3858_s19 = smov [#allocation2]  }
  0x51   : > { %373 = vperm.xlu1 %3647, %v261_v63   ;;  %370 = vperm.xlu0 %3646, %v260_v0  }
  0x55   : > { %379 = vperm.xlu1 %3647, %v263_v1   ;;  %376 = vperm.xlu0 %3646, %v262_v2  }
  0x59   : > { %385 = vperm.xlu1 %3647, %v265_v3   ;;  %382 = vperm.xlu0 %3646, %v264_v4  }
  0x5d   : > { %391 = vperm.xlu1 %3647, %v267_v5   ;;  %388 = vperm.xlu0 %3646, %v266_v8  }
  0x61   : > { %397 = vperm.xlu1 %3647, %v269_v6   ;;  %394 = vperm.xlu0 %3646, %v268_v7  }
  0x65   : > { %403 = vperm.xlu1 %3647, %v271_v9   ;;  %400 = vperm.xlu0 %3646, %v270_v10   ;;  %v3852_v9 = vmov 1966171168  }
  0x66   : > { %v1683_v10 = vunpack.c.l.s4 %v3852_v9 }
  0x69   : > { %409 = vperm.xlu1 %3647, %v273_v11   ;;  %406 = vperm.xlu0 %3646, %v272_v12   ;;  %v1684_v11 = vunpack.c.0.s8 %v1683_v10  ;;  %v4612_v12 = vshrl.u32 %v280_v19, 7 }
  0x6d   : > { %415 = vperm.xlu1 %3647, %v275_v13   ;;  %412 = vperm.xlu0 %3646, %v274_v14   ;;  %v4620_v13 = vsub.s32 %v1684_v11, %v4612_v12  ;;  %v4622_v14 = vld [vmem:[%s231_s8] sm:$0xff]  ;;  %s5520_s8 = scalar_lea.hbm %s5564_s4, %s3449_s13 }
  0x71   : > { %421 = vperm.xlu1 %3647, %v277_v15   ;;  %418 = vperm.xlu0 %3646, %v276_v16   ;;  %v1688_v15 = vrot.slane %v4622_v14, %v4620_v13 }
  0x73   : > { %v4627_v16 = vrot.slane %v1688_v15, %v4620_v13 }
  0x75   : > { %427 = vperm.xlu1 %3647, %v279_v17   ;;  %424 = vperm.xlu0 %3646, %v278_v18   ;;  %v4630_v17 = vsub.s32 0, %v4612_v12 }
  0x77   : > { %v1733_v18 = vrot.slane %v4627_v16, %v4630_v17 }
  0x98   : > { %v287_v24 = vpop.permute.xlu0 %286  ;;  %v293_v26 = vpop.permute.xlu1 %292 }
  0x99   : > { %vm430_vm0 = vcmp.eq.s32.totalorder %v4214_v21, %v287_v24  ;;  %vm432_vm1 = vcmp.eq.s32.totalorder %v4217_v22, %v287_v24  ;;  %vm429_vm2 = vcmp.eq.s32.totalorder %v4211_v20, %v287_v24  ;;  %vm431_vm3 = vcmp.eq.s32.totalorder %v4220_v23, %v287_v24 }
  0x9a   : > { %3254 = vmatprep.mubr.msk.f32.mxu1 %vm430_vm0, %v3851_v25  ;;  %3350 = vmatprep.mubr.msk.f32.mxu0 %vm432_vm1, %v3851_v25  ;;  %vm438_vm4 = vcmp.eq.s32.totalorder %v4214_v21, %v293_v26  ;;  %vm440_vm5 = vcmp.eq.s32.totalorder %v4217_v22, %v293_v26  ;;  %vm437_vm10 = vcmp.eq.s32.totalorder %v4211_v20, %v293_v26 }
  0x9b   : > { %3255 = vmatmul.mubr.msk.f32.vlgmr.msra.gmra.mrb[0].mxu1 %vm429_vm2, %v3851_v25  ;;  %3351 = vmatmul.mubr.msk.f32.vlgmr.msra.gmra.mrb[0].mxu0 %vm431_vm3, %v3851_v25  ;;  %vm439_vm11 = vcmp.eq.s32.totalorder %v4220_v23, %v293_v26 }
  0x9c   : > { %v290_v27 = vpop.permute.xlu0 %289  ;;  %v296_v28 = vpop.permute.xlu1 %295 }
  0x9d   : > { %vm434_vm6 = vcmp.eq.s32.totalorder %v4214_v21, %v290_v27  ;;  %vm436_vm7 = vcmp.eq.s32.totalorder %v4217_v22, %v290_v27  ;;  %vm433_vm8 = vcmp.eq.s32.totalorder %v4211_v20, %v290_v27  ;;  %vm435_vm9 = vcmp.eq.s32.totalorder %v4220_v23, %v290_v27 }
  0x9e   : > { %3256 = vmatprep.mubr.msk.f32.mxu1 %vm434_vm6, %v3851_v25  ;;  %3352 = vmatprep.mubr.msk.f32.mxu0 %vm436_vm7, %v3851_v25  ;;  %vm442_vm12 = vcmp.eq.s32.totalorder %v4214_v21, %v296_v28  ;;  %vm444_vm13 = vcmp.eq.s32.totalorder %v4217_v22, %v296_v28  ;;  %vm441_vm14 = vcmp.eq.s32.totalorder %v4211_v20, %v296_v28 }
  0x9f   : > { %3257 = vmatmul.mubr.msk.f32.gmra.mrb[2].mxu1 %vm433_vm8, %v3851_v25  ;;  %3353 = vmatmul.mubr.msk.f32.gmra.mrb[2].mxu0 %vm435_vm9, %v3851_v25  ;;  %vm443_vm15 = vcmp.eq.s32.totalorder %v4220_v23, %v296_v28 }
  0xa0   : > { %3258 = vmatprep.mubr.msk.f32.mxu1 %vm438_vm4, %v3851_v25  ;;  %3354 = vmatprep.mubr.msk.f32.mxu0 %vm440_vm5, %v3851_v25  ;;  %v299_v29 = vpop.permute.xlu0 %298  ;;  %v302_v30 = vpop.permute.xlu1 %301 }
  0xa1   : > { %vm446_vm0 = vcmp.eq.s32.totalorder %v4214_v21, %v299_v29  ;;  %vm448_vm1 = vcmp.eq.s32.totalorder %v4217_v22, %v299_v29  ;;  %vm445_vm2 = vcmp.eq.s32.totalorder %v4211_v20, %v299_v29  ;;  %vm447_vm3 = vcmp.eq.s32.totalorder %v4220_v23, %v299_v29 }
  0xa2   : > { %vm450_vm4 = vcmp.eq.s32.totalorder %v4214_v21, %v302_v30  ;;  %vm452_vm5 = vcmp.eq.s32.totalorder %v4217_v22, %v302_v30  ;;  %vm449_vm6 = vcmp.eq.s32.totalorder %v4211_v20, %v302_v30  ;;  %vm451_vm7 = vcmp.eq.s32.totalorder %v4220_v23, %v302_v30 }
  0xa3   : > { %3259 = vmatmul.mubr.msk.f32.gmra.mrb[4].mxu1 %vm437_vm10, %v3851_v25  ;;  %3355 = vmatmul.mubr.msk.f32.gmra.mrb[4].mxu0 %vm439_vm11, %v3851_v25 }
  0xa4   : > { %3260 = vmatprep.mubr.msk.f32.mxu1 %vm442_vm12, %v3851_v25  ;;  %3356 = vmatprep.mubr.msk.f32.mxu0 %vm444_vm13, %v3851_v25  ;;  %v305_v31 = vpop.permute.xlu0 %304  ;;  %v308_v32 = vpop.permute.xlu1 %307 }
  0xa5   : > { %vm454_vm8 = vcmp.eq.s32.totalorder %v4214_v21, %v305_v31  ;;  %vm456_vm9 = vcmp.eq.s32.totalorder %v4217_v22, %v305_v31  ;;  %vm453_vm10 = vcmp.eq.s32.totalorder %v4211_v20, %v305_v31  ;;  %vm455_vm11 = vcmp.eq.s32.totalorder %v4220_v23, %v305_v31 }
  0xa6   : > { %vm458_vm12 = vcmp.eq.s32.totalorder %v4214_v21, %v308_v32  ;;  %vm460_vm13 = vcmp.eq.s32.totalorder %v4217_v22, %v308_v32 }
  0xa7   : > { %3261 = vmatmul.mubr.msk.f32.gmra.mrb[6].mxu1 %vm441_vm14, %v3851_v25  ;;  %3357 = vmatmul.mubr.msk.f32.gmra.mrb[6].mxu0 %vm443_vm15, %v3851_v25  ;;  %vm457_vm14 = vcmp.eq.s32.totalorder %v4211_v20, %v308_v32  ;;  %vm459_vm15 = vcmp.eq.s32.totalorder %v4220_v23, %v308_v32 }
  0xa8   : > { %3262 = vmatprep.mubr.msk.f32.mxu1 %vm446_vm0, %v3851_v25  ;;  %3358 = vmatprep.mubr.msk.f32.mxu0 %vm448_vm1, %v3851_v25  ;;  %v311_v33 = vpop.permute.xlu0 %310  ;;  %v314_v34 = vpop.permute.xlu1 %313 }
  0xa9   : > { %vm462_vm0 = vcmp.eq.s32.totalorder %v4214_v21, %v311_v33  ;;  %vm464_vm1 = vcmp.eq.s32.totalorder %v4217_v22, %v311_v33 }
  0xab   : > { %3263 = vmatmul.mubr.msk.f32.gmra.mrb[8].mxu1 %vm445_vm2, %v3851_v25  ;;  %3359 = vmatmul.mubr.msk.f32.gmra.mrb[8].mxu0 %vm447_vm3, %v3851_v25  ;;  %vm461_vm2 = vcmp.eq.s32.totalorder %v4211_v20, %v311_v33  ;;  %vm463_vm3 = vcmp.eq.s32.totalorder %v4220_v23, %v311_v33 }
  0xac   : > { %3264 = vmatprep.mubr.msk.f32.mxu1 %vm450_vm4, %v3851_v25  ;;  %3360 = vmatprep.mubr.msk.f32.mxu0 %vm452_vm5, %v3851_v25  ;;  %vm466_vm4 = vcmp.eq.s32.totalorder %v4214_v21, %v314_v34  ;;  %vm468_vm5 = vcmp.eq.s32.totalorder %v4217_v22, %v314_v34  ;;  %v317_v35 = vpop.permute.xlu0 %316  ;;  %v320_v36 = vpop.permute.xlu1 %319 }
  0xaf   : > { %3265 = vmatmul.mubr.msk.f32.gmra.mrb[10].mxu1 %vm449_vm6, %v3851_v25  ;;  %3361 = vmatmul.mubr.msk.f32.gmra.mrb[10].mxu0 %vm451_vm7, %v3851_v25  ;;  %vm465_vm6 = vcmp.eq.s32.totalorder %v4211_v20, %v314_v34  ;;  %vm467_vm7 = vcmp.eq.s32.totalorder %v4220_v23, %v314_v34 }
  0xb0   : > { %3266 = vmatprep.mubr.msk.f32.mxu1 %vm454_vm8, %v3851_v25  ;;  %3362 = vmatprep.mubr.msk.f32.mxu0 %vm456_vm9, %v3851_v25  ;;  %vm470_vm8 = vcmp.eq.s32.totalorder %v4214_v21, %v317_v35  ;;  %vm472_vm9 = vcmp.eq.s32.totalorder %v4217_v22, %v317_v35  ;;  %v323_v37 = vpop.permute.xlu0 %322  ;;  %v326_v38 = vpop.permute.xlu1 %325 }
  0xb3   : > { %3267 = vmatmul.mubr.msk.f32.gmra.mrb[12].mxu1 %vm453_vm10, %v3851_v25  ;;  %3363 = vmatmul.mubr.msk.f32.gmra.mrb[12].mxu0 %vm455_vm11, %v3851_v25  ;;  %vm469_vm10 = vcmp.eq.s32.totalorder %v4211_v20, %v317_v35  ;;  %vm471_vm11 = vcmp.eq.s32.totalorder %v4220_v23, %v317_v35 }
  0xb4   : > { %3268 = vmatprep.mubr.msk.f32.mxu1 %vm458_vm12, %v3851_v25  ;;  %3364 = vmatprep.mubr.msk.f32.mxu0 %vm460_vm13, %v3851_v25  ;;  %vm474_vm12 = vcmp.eq.s32.totalorder %v4214_v21, %v320_v36  ;;  %vm476_vm13 = vcmp.eq.s32.totalorder %v4217_v22, %v320_v36  ;;  %v329_v39 = vpop.permute.xlu0 %328  ;;  %v332_v40 = vpop.permute.xlu1 %331 }
  0xb7   : > { %3269 = vmatmul.mubr.msk.f32.gmra.mrb[14].mxu1 %vm457_vm14, %v3851_v25  ;;  %3365 = vmatmul.mubr.msk.f32.gmra.mrb[14].mxu0 %vm459_vm15, %v3851_v25  ;;  %vm473_vm14 = vcmp.eq.s32.totalorder %v4211_v20, %v320_v36  ;;  %vm475_vm15 = vcmp.eq.s32.totalorder %v4220_v23, %v320_v36 }
  0xb8   : > { %3270 = vmatprep.mubr.msk.f32.mxu1 %vm462_vm0, %v3851_v25  ;;  %3366 = vmatprep.mubr.msk.f32.mxu0 %vm464_vm1, %v3851_v25  ;;  %vm478_vm0 = vcmp.eq.s32.totalorder %v4214_v21, %v323_v37  ;;  %vm480_vm1 = vcmp.eq.s32.totalorder %v4217_v22, %v323_v37  ;;  %v335_v41 = vpop.permute.xlu0 %334  ;;  %v338_v42 = vpop.permute.xlu1 %337 }
  0xbb   : > { %3271 = vmatmul.mubr.msk.f32.gmra.mrb[16].mxu1 %vm461_vm2, %v3851_v25  ;;  %3367 = vmatmul.mubr.msk.f32.gmra.mrb[16].mxu0 %vm463_vm3, %v3851_v25  ;;  %vm477_vm2 = vcmp.eq.s32.totalorder %v4211_v20, %v323_v37  ;;  %vm479_vm3 = vcmp.eq.s32.totalorder %v4220_v23, %v323_v37 }
  0xbc   : > { %3272 = vmatprep.mubr.msk.f32.mxu1 %vm466_vm4, %v3851_v25  ;;  %3368 = vmatprep.mubr.msk.f32.mxu0 %vm468_vm5, %v3851_v25  ;;  %vm482_vm4 = vcmp.eq.s32.totalorder %v4214_v21, %v326_v38  ;;  %vm484_vm5 = vcmp.eq.s32.totalorder %v4217_v22, %v326_v38  ;;  %v341_v43 = vpop.permute.xlu0 %340  ;;  %v344_v44 = vpop.permute.xlu1 %343 }
  0xbf   : > { %3273 = vmatmul.mubr.msk.f32.gmra.mrb[18].mxu1 %vm465_vm6, %v3851_v25  ;;  %3369 = vmatmul.mubr.msk.f32.gmra.mrb[18].mxu0 %vm467_vm7, %v3851_v25  ;;  %vm481_vm6 = vcmp.eq.s32.totalorder %v4211_v20, %v326_v38  ;;  %vm483_vm7 = vcmp.eq.s32.totalorder %v4220_v23, %v326_v38 }
  0xc0   : > { %3274 = vmatprep.mubr.msk.f32.mxu1 %vm470_vm8, %v3851_v25  ;;  %3370 = vmatprep.mubr.msk.f32.mxu0 %vm472_vm9, %v3851_v25  ;;  %vm486_vm8 = vcmp.eq.s32.totalorder %v4214_v21, %v329_v39  ;;  %vm488_vm9 = vcmp.eq.s32.totalorder %v4217_v22, %v329_v39  ;;  %v347_v45 = vpop.permute.xlu0 %346  ;;  %v350_v46 = vpop.permute.xlu1 %349 }
  0xc3   : > { %3275 = vmatmul.mubr.msk.f32.gmra.mrb[20].mxu1 %vm469_vm10, %v3851_v25  ;;  %3371 = vmatmul.mubr.msk.f32.gmra.mrb[20].mxu0 %vm471_vm11, %v3851_v25  ;;  %vm485_vm10 = vcmp.eq.s32.totalorder %v4211_v20, %v329_v39  ;;  %vm487_vm11 = vcmp.eq.s32.totalorder %v4220_v23, %v329_v39 }
  0xc4   : > { %3276 = vmatprep.mubr.msk.f32.mxu1 %vm474_vm12, %v3851_v25  ;;  %3372 = vmatprep.mubr.msk.f32.mxu0 %vm476_vm13, %v3851_v25  ;;  %vm490_vm12 = vcmp.eq.s32.totalorder %v4214_v21, %v332_v40  ;;  %vm492_vm13 = vcmp.eq.s32.totalorder %v4217_v22, %v332_v40  ;;  %v353_v47 = vpop.permute.xlu0 %352  ;;  %v356_v48 = vpop.permute.xlu1 %355 }
  0xc7   : > { %3277 = vmatmul.mubr.msk.f32.gmra.mrb[22].mxu1 %vm473_vm14, %v3851_v25  ;;  %3373 = vmatmul.mubr.msk.f32.gmra.mrb[22].mxu0 %vm475_vm15, %v3851_v25  ;;  %vm489_vm14 = vcmp.eq.s32.totalorder %v4211_v20, %v332_v40  ;;  %vm491_vm15 = vcmp.eq.s32.totalorder %v4220_v23, %v332_v40 }
  0xc8   : > { %3278 = vmatprep.mubr.msk.f32.mxu1 %vm478_vm0, %v3851_v25  ;;  %3374 = vmatprep.mubr.msk.f32.mxu0 %vm480_vm1, %v3851_v25  ;;  %vm494_vm0 = vcmp.eq.s32.totalorder %v4214_v21, %v335_v41  ;;  %vm496_vm1 = vcmp.eq.s32.totalorder %v4217_v22, %v335_v41  ;;  %v359_v49 = vpop.permute.xlu0 %358  ;;  %v362_v50 = vpop.permute.xlu1 %361 }
  0xcb   : > { %3279 = vmatmul.mubr.msk.f32.gmra.mrb[24].mxu1 %vm477_vm2, %v3851_v25  ;;  %3375 = vmatmul.mubr.msk.f32.gmra.mrb[24].mxu0 %vm479_vm3, %v3851_v25  ;;  %vm493_vm2 = vcmp.eq.s32.totalorder %v4211_v20, %v335_v41  ;;  %vm495_vm3 = vcmp.eq.s32.totalorder %v4220_v23, %v335_v41 }
  0xcc   : > { %3280 = vmatprep.mubr.msk.f32.mxu1 %vm482_vm4, %v3851_v25  ;;  %3376 = vmatprep.mubr.msk.f32.mxu0 %vm484_vm5, %v3851_v25  ;;  %vm498_vm4 = vcmp.eq.s32.totalorder %v4214_v21, %v338_v42  ;;  %vm500_vm5 = vcmp.eq.s32.totalorder %v4217_v22, %v338_v42  ;;  %v365_v51 = vpop.permute.xlu0 %364  ;;  %v368_v52 = vpop.permute.xlu1 %367 }
  0xcf   : > { %3281 = vmatmul.mubr.msk.f32.gmra.mrb[26].mxu1 %vm481_vm6, %v3851_v25  ;;  %3377 = vmatmul.mubr.msk.f32.gmra.mrb[26].mxu0 %vm483_vm7, %v3851_v25  ;;  %vm497_vm6 = vcmp.eq.s32.totalorder %v4211_v20, %v338_v42  ;;  %vm499_vm7 = vcmp.eq.s32.totalorder %v4220_v23, %v338_v42 }
  0xd0   : > { %3282 = vmatprep.mubr.msk.f32.mxu1 %vm486_vm8, %v3851_v25  ;;  %3378 = vmatprep.mubr.msk.f32.mxu0 %vm488_vm9, %v3851_v25  ;;  %vm502_vm8 = vcmp.eq.s32.totalorder %v4214_v21, %v341_v43  ;;  %vm504_vm9 = vcmp.eq.s32.totalorder %v4217_v22, %v341_v43  ;;  %v371_v53 = vpop.permute.xlu0 %370  ;;  %v374_v54 = vpop.permute.xlu1 %373 }
  0xd3   : > { %3283 = vmatmul.mubr.msk.f32.gmra.mrb[28].mxu1 %vm485_vm10, %v3851_v25  ;;  %3379 = vmatmul.mubr.msk.f32.gmra.mrb[28].mxu0 %vm487_vm11, %v3851_v25  ;;  %vm501_vm10 = vcmp.eq.s32.totalorder %v4211_v20, %v341_v43  ;;  %vm503_vm11 = vcmp.eq.s32.totalorder %v4220_v23, %v341_v43  ;;  %v1696_v43 = vcombine.high %v1688_v15, %v1688_v15 }
  0xd4   : > { %3284 = vmatprep.mubr.msk.f32.mxu1 %vm490_vm12, %v3851_v25  ;;  %3380 = vmatprep.mubr.msk.f32.mxu0 %vm492_vm13, %v3851_v25  ;;  %vm506_vm12 = vcmp.eq.s32.totalorder %v4214_v21, %v344_v44  ;;  %vm508_vm13 = vcmp.eq.s32.totalorder %v4217_v22, %v344_v44  ;;  %v377_v55 = vpop.permute.xlu0 %376  ;;  %v380_v56 = vpop.permute.xlu1 %379 }
  0xd7   : > { %3285 = vmatmul.mubr.msk.f32.gmra.mrb[30].mxu1 %vm489_vm14, %v3851_v25  ;;  %3381 = vmatmul.mubr.msk.f32.gmra.mrb[30].mxu0 %vm491_vm15, %v3851_v25  ;;  %vm505_vm14 = vcmp.eq.s32.totalorder %v4211_v20, %v344_v44  ;;  %vm507_vm15 = vcmp.eq.s32.totalorder %v4220_v23, %v344_v44 }
  0xd8   : > { %3286 = vmatprep.mubr.msk.f32.mxu1 %vm494_vm0, %v3851_v25  ;;  %3382 = vmatprep.mubr.msk.f32.mxu0 %vm496_vm1, %v3851_v25  ;;  %vm510_vm0 = vcmp.eq.s32.totalorder %v4214_v21, %v347_v45  ;;  %vm512_vm1 = vcmp.eq.s32.totalorder %v4217_v22, %v347_v45  ;;  %v383_v57 = vpop.permute.xlu0 %382  ;;  %v386_v58 = vpop.permute.xlu1 %385 }
  0xdb   : > { %3287 = vmatmul.mubr.msk.f32.gmra.mrb[32].mxu1 %vm493_vm2, %v3851_v25  ;;  %3383 = vmatmul.mubr.msk.f32.gmra.mrb[32].mxu0 %vm495_vm3, %v3851_v25  ;;  %vm509_vm2 = vcmp.eq.s32.totalorder %v4211_v20, %v347_v45  ;;  %vm511_vm3 = vcmp.eq.s32.totalorder %v4220_v23, %v347_v45 }
  0xdc   : > { %3288 = vmatprep.mubr.msk.f32.mxu1 %vm498_vm4, %v3851_v25  ;;  %3384 = vmatprep.mubr.msk.f32.mxu0 %vm500_vm5, %v3851_v25  ;;  %vm514_vm4 = vcmp.eq.s32.totalorder %v4214_v21, %v350_v46  ;;  %vm516_vm5 = vcmp.eq.s32.totalorder %v4217_v22, %v350_v46  ;;  %v389_v59 = vpop.permute.xlu0 %388  ;;  %v392_v60 = vpop.permute.xlu1 %391 }
  0xdf   : > { %3289 = vmatmul.mubr.msk.f32.gmra.mrb[34].mxu1 %vm497_vm6, %v3851_v25  ;;  %3385 = vmatmul.mubr.msk.f32.gmra.mrb[34].mxu0 %vm499_vm7, %v3851_v25  ;;  %vm513_vm6 = vcmp.eq.s32.totalorder %v4211_v20, %v350_v46  ;;  %vm515_vm7 = vcmp.eq.s32.totalorder %v4220_v23, %v350_v46 }
  0xe0   : > { %3290 = vmatprep.mubr.msk.f32.mxu1 %vm502_vm8, %v3851_v25  ;;  %3386 = vmatprep.mubr.msk.f32.mxu0 %vm504_vm9, %v3851_v25  ;;  %vm518_vm8 = vcmp.eq.s32.totalorder %v4214_v21, %v353_v47  ;;  %vm520_vm9 = vcmp.eq.s32.totalorder %v4217_v22, %v353_v47  ;;  %v395_v61 = vpop.permute.xlu0 %394  ;;  %v398_v62 = vpop.permute.xlu1 %397 }
  0xe3   : > { %3291 = vmatmul.mubr.msk.f32.gmra.mrb[36].mxu1 %vm501_vm10, %v3851_v25  ;;  %3387 = vmatmul.mubr.msk.f32.gmra.mrb[36].mxu0 %vm503_vm11, %v3851_v25  ;;  %vm517_vm10 = vcmp.eq.s32.totalorder %v4211_v20, %v353_v47  ;;  %vm519_vm11 = vcmp.eq.s32.totalorder %v4220_v23, %v353_v47 }
  0xe4   : > { %3292 = vmatprep.mubr.msk.f32.mxu1 %vm506_vm12, %v3851_v25  ;;  %3388 = vmatprep.mubr.msk.f32.mxu0 %vm508_vm13, %v3851_v25  ;;  %vm522_vm12 = vcmp.eq.s32.totalorder %v4214_v21, %v356_v48  ;;  %vm524_vm13 = vcmp.eq.s32.totalorder %v4217_v22, %v356_v48  ;;  %v401_v63 = vpop.permute.xlu0 %400  ;;  %v404_v0 = vpop.permute.xlu1 %403 }
  0xe7   : > { %3293 = vmatmul.mubr.msk.f32.gmra.mrb[38].mxu1 %vm505_vm14, %v3851_v25  ;;  %3389 = vmatmul.mubr.msk.f32.gmra.mrb[38].mxu0 %vm507_vm15, %v3851_v25  ;;  %vm521_vm14 = vcmp.eq.s32.totalorder %v4211_v20, %v356_v48  ;;  %vm523_vm15 = vcmp.eq.s32.totalorder %v4220_v23, %v356_v48 }
  0xe8   : > { %3294 = vmatprep.mubr.msk.f32.mxu1 %vm510_vm0, %v3851_v25  ;;  %3390 = vmatprep.mubr.msk.f32.mxu0 %vm512_vm1, %v3851_v25  ;;  %vm526_vm0 = vcmp.eq.s32.totalorder %v4214_v21, %v359_v49  ;;  %vm528_vm1 = vcmp.eq.s32.totalorder %v4217_v22, %v359_v49  ;;  %v407_v1 = vpop.permute.xlu0 %406  ;;  %v410_v2 = vpop.permute.xlu1 %409 }
  0xeb   : > { %3295 = vmatmul.mubr.msk.f32.gmra.mrb[40].mxu1 %vm509_vm2, %v3851_v25  ;;  %3391 = vmatmul.mubr.msk.f32.gmra.mrb[40].mxu0 %vm511_vm3, %v3851_v25  ;;  %vm525_vm2 = vcmp.eq.s32.totalorder %v4211_v20, %v359_v49  ;;  %vm527_vm3 = vcmp.eq.s32.totalorder %v4220_v23, %v359_v49 }
  0xec   : > { %3296 = vmatprep.mubr.msk.f32.mxu1 %vm514_vm4, %v3851_v25  ;;  %3392 = vmatprep.mubr.msk.f32.mxu0 %vm516_vm5, %v3851_v25  ;;  %vm530_vm4 = vcmp.eq.s32.totalorder %v4214_v21, %v362_v50  ;;  %vm532_vm5 = vcmp.eq.s32.totalorder %v4217_v22, %v362_v50  ;;  %v413_v3 = vpop.permute.xlu0 %412  ;;  %v416_v4 = vpop.permute.xlu1 %415 }
  0xef   : > { %3297 = vmatmul.mubr.msk.f32.gmra.mrb[42].mxu1 %vm513_vm6, %v3851_v25  ;;  %3393 = vmatmul.mubr.msk.f32.gmra.mrb[42].mxu0 %vm515_vm7, %v3851_v25  ;;  %vm529_vm6 = vcmp.eq.s32.totalorder %v4211_v20, %v362_v50  ;;  %vm531_vm7 = vcmp.eq.s32.totalorder %v4220_v23, %v362_v50 }
  0xf0   : > { %3298 = vmatprep.mubr.msk.f32.mxu1 %vm518_vm8, %v3851_v25  ;;  %3394 = vmatprep.mubr.msk.f32.mxu0 %vm520_vm9, %v3851_v25  ;;  %vm534_vm8 = vcmp.eq.s32.totalorder %v4214_v21, %v365_v51  ;;  %vm536_vm9 = vcmp.eq.s32.totalorder %v4217_v22, %v365_v51  ;;  %v419_v5 = vpop.permute.xlu0 %418  ;;  %v422_v8 = vpop.permute.xlu1 %421 }
  0xf3   : > { %3299 = vmatmul.mubr.msk.f32.gmra.mrb[44].mxu1 %vm517_vm10, %v3851_v25  ;;  %3395 = vmatmul.mubr.msk.f32.gmra.mrb[44].mxu0 %vm519_vm11, %v3851_v25  ;;  %vm533_vm10 = vcmp.eq.s32.totalorder %v4211_v20, %v365_v51  ;;  %vm535_vm11 = vcmp.eq.s32.totalorder %v4220_v23, %v365_v51  ;;  %v4641_v51 = vrot.slane %v1696_v43, %v4620_v13 }
  0xf4   : > { %3300 = vmatprep.mubr.msk.f32.mxu1 %vm522_vm12, %v3851_v25  ;;  %3396 = vmatprep.mubr.msk.f32.mxu0 %vm524_vm13, %v3851_v25  ;;  %vm538_vm12 = vcmp.eq.s32.totalorder %v4214_v21, %v368_v52  ;;  %vm540_vm13 = vcmp.eq.s32.totalorder %v4217_v22, %v368_v52  ;;  %v425_v6 = vpop.permute.xlu0 %424  ;;  %v428_v7 = vpop.permute.xlu1 %427 }
  0xf7   : > { %3301 = vmatmul.mubr.msk.f32.gmra.mrb[46].mxu1 %vm521_vm14, %v3851_v25  ;;  %3397 = vmatmul.mubr.msk.f32.gmra.mrb[46].mxu0 %vm523_vm15, %v3851_v25  ;;  %vm537_vm14 = vcmp.eq.s32.totalorder %v4211_v20, %v368_v52  ;;  %vm539_vm15 = vcmp.eq.s32.totalorder %v4220_v23, %v368_v52 }
  0xf8   : > { %3302 = vmatprep.mubr.msk.f32.mxu1 %vm526_vm0, %v3851_v25  ;;  %3398 = vmatprep.mubr.msk.f32.mxu0 %vm528_vm1, %v3851_v25  ;;  %vm542_vm0 = vcmp.eq.s32.totalorder %v4214_v21, %v371_v53  ;;  %vm544_vm1 = vcmp.eq.s32.totalorder %v4217_v22, %v371_v53 }
  0xfb   : > { %3303 = vmatmul.mubr.msk.f32.gmra.mrb[48].mxu1 %vm525_vm2, %v3851_v25  ;;  %3399 = vmatmul.mubr.msk.f32.gmra.mrb[48].mxu0 %vm527_vm3, %v3851_v25  ;;  %vm541_vm2 = vcmp.eq.s32.totalorder %v4211_v20, %v371_v53  ;;  %vm543_vm3 = vcmp.eq.s32.totalorder %v4220_v23, %v371_v53 }
  0xfc   : > { %3304 = vmatprep.mubr.msk.f32.mxu1 %vm530_vm4, %v3851_v25  ;;  %3400 = vmatprep.mubr.msk.f32.mxu0 %vm532_vm5, %v3851_v25  ;;  %vm546_vm4 = vcmp.eq.s32.totalorder %v4214_v21, %v374_v54  ;;  %vm548_vm5 = vcmp.eq.s32.totalorder %v4217_v22, %v374_v54 }
  0xff   : > { %3305 = vmatmul.mubr.msk.f32.gmra.mrb[50].mxu1 %vm529_vm6, %v3851_v25  ;;  %3401 = vmatmul.mubr.msk.f32.gmra.mrb[50].mxu0 %vm531_vm7, %v3851_v25  ;;  %vm545_vm6 = vcmp.eq.s32.totalorder %v4211_v20, %v374_v54  ;;  %vm547_vm7 = vcmp.eq.s32.totalorder %v4220_v23, %v374_v54 }
 0x100   : > { %3306 = vmatprep.mubr.msk.f32.mxu1 %vm534_vm8, %v3851_v25  ;;  %3402 = vmatprep.mubr.msk.f32.mxu0 %vm536_vm9, %v3851_v25  ;;  %vm550_vm8 = vcmp.eq.s32.totalorder %v4214_v21, %v377_v55  ;;  %vm552_vm9 = vcmp.eq.s32.totalorder %v4217_v22, %v377_v55 }
 0x103   : > { %3307 = vmatmul.mubr.msk.f32.gmra.mrb[52].mxu1 %vm533_vm10, %v3851_v25  ;;  %3403 = vmatmul.mubr.msk.f32.gmra.mrb[52].mxu0 %vm535_vm11, %v3851_v25  ;;  %vm549_vm10 = vcmp.eq.s32.totalorder %v4211_v20, %v377_v55  ;;  %vm551_vm11 = vcmp.eq.s32.totalorder %v4220_v23, %v377_v55 }
 0x104   : > { %3308 = vmatprep.mubr.msk.f32.mxu1 %vm538_vm12, %v3851_v25  ;;  %3404 = vmatprep.mubr.msk.f32.mxu0 %vm540_vm13, %v3851_v25  ;;  %vm554_vm12 = vcmp.eq.s32.totalorder %v4214_v21, %v380_v56  ;;  %vm556_vm13 = vcmp.eq.s32.totalorder %v4217_v22, %v380_v56 }
 0x107   : > { %3309 = vmatmul.mubr.msk.f32.gmra.mrb[54].mxu1 %vm537_vm14, %v3851_v25  ;;  %3405 = vmatmul.mubr.msk.f32.gmra.mrb[54].mxu0 %vm539_vm15, %v3851_v25  ;;  %vm553_vm14 = vcmp.eq.s32.totalorder %v4211_v20, %v380_v56  ;;  %vm555_vm15 = vcmp.eq.s32.totalorder %v4220_v23, %v380_v56 }
 0x108   : > { %3310 = vmatprep.mubr.msk.f32.mxu1 %vm542_vm0, %v3851_v25  ;;  %3406 = vmatprep.mubr.msk.f32.mxu0 %vm544_vm1, %v3851_v25  ;;  %vm558_vm0 = vcmp.eq.s32.totalorder %v4214_v21, %v383_v57  ;;  %vm560_vm1 = vcmp.eq.s32.totalorder %v4217_v22, %v383_v57 }
 0x10b   : > { %3311 = vmatmul.mubr.msk.f32.gmra.mrb[56].mxu1 %vm541_vm2, %v3851_v25  ;;  %3407 = vmatmul.mubr.msk.f32.gmra.mrb[56].mxu0 %vm543_vm3, %v3851_v25  ;;  %vm557_vm2 = vcmp.eq.s32.totalorder %v4211_v20, %v383_v57  ;;  %vm559_vm3 = vcmp.eq.s32.totalorder %v4220_v23, %v383_v57 }
 0x10c   : > { %3312 = vmatprep.mubr.msk.f32.mxu1 %vm546_vm4, %v3851_v25  ;;  %3408 = vmatprep.mubr.msk.f32.mxu0 %vm548_vm5, %v3851_v25  ;;  %vm562_vm4 = vcmp.eq.s32.totalorder %v4214_v21, %v386_v58  ;;  %vm564_vm5 = vcmp.eq.s32.totalorder %v4217_v22, %v386_v58 }
 0x10f   : > { %3313 = vmatmul.mubr.msk.f32.gmra.mrb[58].mxu1 %vm545_vm6, %v3851_v25  ;;  %3409 = vmatmul.mubr.msk.f32.gmra.mrb[58].mxu0 %vm547_vm7, %v3851_v25  ;;  %vm561_vm6 = vcmp.eq.s32.totalorder %v4211_v20, %v386_v58  ;;  %vm563_vm7 = vcmp.eq.s32.totalorder %v4220_v23, %v386_v58 }
 0x110   : > { %3314 = vmatprep.mubr.msk.f32.mxu1 %vm550_vm8, %v3851_v25  ;;  %3410 = vmatprep.mubr.msk.f32.mxu0 %vm552_vm9, %v3851_v25  ;;  %vm566_vm8 = vcmp.eq.s32.totalorder %v4214_v21, %v389_v59  ;;  %vm568_vm9 = vcmp.eq.s32.totalorder %v4217_v22, %v389_v59 }
 0x113   : > { %3315 = vmatmul.mubr.msk.f32.gmra.mrb[60].mxu1 %vm549_vm10, %v3851_v25  ;;  %3411 = vmatmul.mubr.msk.f32.gmra.mrb[60].mxu0 %vm551_vm11, %v3851_v25  ;;  %vm565_vm10 = vcmp.eq.s32.totalorder %v4211_v20, %v389_v59  ;;  %vm567_vm11 = vcmp.eq.s32.totalorder %v4220_v23, %v389_v59  ;;  %v1737_v59 = vrot.slane %v4641_v51, %v4630_v17 }
 0x114   : > { %3316 = vmatprep.mubr.msk.f32.mxu1 %vm554_vm12, %v3851_v25  ;;  %3412 = vmatprep.mubr.msk.f32.mxu0 %vm556_vm13, %v3851_v25  ;;  %vm570_vm12 = vcmp.eq.s32.totalorder %v4214_v21, %v392_v60  ;;  %vm572_vm13 = vcmp.eq.s32.totalorder %v4217_v22, %v392_v60 }
 0x117   : > { %3317 = vmatmul.mubr.msk.f32.gmra.mrb[62].mxu1 %vm553_vm14, %v3851_v25  ;;  %3413 = vmatmul.mubr.msk.f32.gmra.mrb[62].mxu0 %vm555_vm15, %v3851_v25  ;;  %vm569_vm14 = vcmp.eq.s32.totalorder %v4211_v20, %v392_v60  ;;  %vm571_vm15 = vcmp.eq.s32.totalorder %v4220_v23, %v392_v60 }
 0x118   : > { %3318 = vmatprep.mubr.msk.f32.mxu1 %vm558_vm0, %v3851_v25  ;;  %3414 = vmatprep.mubr.msk.f32.mxu0 %vm560_vm1, %v3851_v25  ;;  %vm574_vm0 = vcmp.eq.s32.totalorder %v4214_v21, %v395_v61  ;;  %vm576_vm1 = vcmp.eq.s32.totalorder %v4217_v22, %v395_v61 }
 0x11b   : > { %3319 = vmatmul.mubr.msk.f32.gmra.mrb[64].mxu1 %vm557_vm2, %v3851_v25  ;;  %3415 = vmatmul.mubr.msk.f32.gmra.mrb[64].mxu0 %vm559_vm3, %v3851_v25  ;;  %vm573_vm2 = vcmp.eq.s32.totalorder %v4211_v20, %v395_v61  ;;  %vm575_vm3 = vcmp.eq.s32.totalorder %v4220_v23, %v395_v61 }
 0x11c   : > { %3320 = vmatprep.mubr.msk.f32.mxu1 %vm562_vm4, %v3851_v25  ;;  %3416 = vmatprep.mubr.msk.f32.mxu0 %vm564_vm5, %v3851_v25  ;;  %vm578_vm4 = vcmp.eq.s32.totalorder %v4214_v21, %v398_v62  ;;  %vm580_vm5 = vcmp.eq.s32.totalorder %v4217_v22, %v398_v62 }
 0x11f   : > { %3321 = vmatmul.mubr.msk.f32.gmra.mrb[66].mxu1 %vm561_vm6, %v3851_v25  ;;  %3417 = vmatmul.mubr.msk.f32.gmra.mrb[66].mxu0 %vm563_vm7, %v3851_v25  ;;  %vm577_vm6 = vcmp.eq.s32.totalorder %v4211_v20, %v398_v62  ;;  %vm579_vm7 = vcmp.eq.s32.totalorder %v4220_v23, %v398_v62 }
 0x120   : > { %3322 = vmatprep.mubr.msk.f32.mxu1 %vm566_vm8, %v3851_v25  ;;  %3418 = vmatprep.mubr.msk.f32.mxu0 %vm568_vm9, %v3851_v25  ;;  %vm582_vm8 = vcmp.eq.s32.totalorder %v4214_v21, %v401_v63  ;;  %vm584_vm9 = vcmp.eq.s32.totalorder %v4217_v22, %v401_v63 }
 0x123   : > { %3323 = vmatmul.mubr.msk.f32.gmra.mrb[68].mxu1 %vm565_vm10, %v3851_v25  ;;  %3419 = vmatmul.mubr.msk.f32.gmra.mrb[68].mxu0 %vm567_vm11, %v3851_v25  ;;  %vm581_vm10 = vcmp.eq.s32.totalorder %v4211_v20, %v401_v63  ;;  %vm583_vm11 = vcmp.eq.s32.totalorder %v4220_v23, %v401_v63 }
 0x124   : > { %3324 = vmatprep.mubr.msk.f32.mxu1 %vm570_vm12, %v3851_v25  ;;  %3420 = vmatprep.mubr.msk.f32.mxu0 %vm572_vm13, %v3851_v25  ;;  %vm586_vm12 = vcmp.eq.s32.totalorder %v4214_v21, %v404_v0  ;;  %vm588_vm13 = vcmp.eq.s32.totalorder %v4217_v22, %v404_v0 }
 0x127   : > { %3325 = vmatmul.mubr.msk.f32.gmra.mrb[70].mxu1 %vm569_vm14, %v3851_v25  ;;  %3421 = vmatmul.mubr.msk.f32.gmra.mrb[70].mxu0 %vm571_vm15, %v3851_v25  ;;  %vm585_vm14 = vcmp.eq.s32.totalorder %v4211_v20, %v404_v0  ;;  %vm587_vm15 = vcmp.eq.s32.totalorder %v4220_v23, %v404_v0 }
 0x128   : > { %3326 = vmatprep.mubr.msk.f32.mxu1 %vm574_vm0, %v3851_v25  ;;  %3422 = vmatprep.mubr.msk.f32.mxu0 %vm576_vm1, %v3851_v25  ;;  %vm590_vm0 = vcmp.eq.s32.totalorder %v4214_v21, %v407_v1  ;;  %vm592_vm1 = vcmp.eq.s32.totalorder %v4217_v22, %v407_v1 }
 0x12b   : > { %3327 = vmatmul.mubr.msk.f32.gmra.mrb[72].mxu1 %vm573_vm2, %v3851_v25  ;;  %3423 = vmatmul.mubr.msk.f32.gmra.mrb[72].mxu0 %vm575_vm3, %v3851_v25  ;;  %vm589_vm2 = vcmp.eq.s32.totalorder %v4211_v20, %v407_v1  ;;  %vm591_vm3 = vcmp.eq.s32.totalorder %v4220_v23, %v407_v1 }
 0x12c   : > { %3328 = vmatprep.mubr.msk.f32.mxu1 %vm578_vm4, %v3851_v25  ;;  %3424 = vmatprep.mubr.msk.f32.mxu0 %vm580_vm5, %v3851_v25  ;;  %vm594_vm4 = vcmp.eq.s32.totalorder %v4214_v21, %v410_v2  ;;  %vm596_vm5 = vcmp.eq.s32.totalorder %v4217_v22, %v410_v2 }
 0x12f   : > { %3329 = vmatmul.mubr.msk.f32.gmra.mrb[74].mxu1 %vm577_vm6, %v3851_v25  ;;  %3425 = vmatmul.mubr.msk.f32.gmra.mrb[74].mxu0 %vm579_vm7, %v3851_v25  ;;  %vm593_vm6 = vcmp.eq.s32.totalorder %v4211_v20, %v410_v2  ;;  %vm595_vm7 = vcmp.eq.s32.totalorder %v4220_v23, %v410_v2 }
 0x130   : > { %3330 = vmatprep.mubr.msk.f32.mxu1 %vm582_vm8, %v3851_v25  ;;  %3426 = vmatprep.mubr.msk.f32.mxu0 %vm584_vm9, %v3851_v25  ;;  %vm598_vm8 = vcmp.eq.s32.totalorder %v4214_v21, %v413_v3  ;;  %vm600_vm9 = vcmp.eq.s32.totalorder %v4217_v22, %v413_v3 }
 0x133   : > { %3331 = vmatmul.mubr.msk.f32.gmra.mrb[76].mxu1 %vm581_vm10, %v3851_v25  ;;  %3427 = vmatmul.mubr.msk.f32.gmra.mrb[76].mxu0 %vm583_vm11, %v3851_v25  ;;  %vm597_vm10 = vcmp.eq.s32.totalorder %v4211_v20, %v413_v3  ;;  %vm599_vm11 = vcmp.eq.s32.totalorder %v4220_v23, %v413_v3 }
 0x134   : > { %3332 = vmatprep.mubr.msk.f32.mxu1 %vm586_vm12, %v3851_v25  ;;  %3428 = vmatprep.mubr.msk.f32.mxu0 %vm588_vm13, %v3851_v25  ;;  %vm602_vm12 = vcmp.eq.s32.totalorder %v4214_v21, %v416_v4  ;;  %vm604_vm13 = vcmp.eq.s32.totalorder %v4217_v22, %v416_v4 }
 0x137   : > { %3333 = vmatmul.mubr.msk.f32.gmra.mrb[78].mxu1 %vm585_vm14, %v3851_v25  ;;  %3429 = vmatmul.mubr.msk.f32.gmra.mrb[78].mxu0 %vm587_vm15, %v3851_v25  ;;  %vm601_vm14 = vcmp.eq.s32.totalorder %v4211_v20, %v416_v4  ;;  %vm603_vm15 = vcmp.eq.s32.totalorder %v4220_v23, %v416_v4 }
 0x138   : > { %3334 = vmatprep.mubr.msk.f32.mxu1 %vm590_vm0, %v3851_v25  ;;  %3430 = vmatprep.mubr.msk.f32.mxu0 %vm592_vm1, %v3851_v25  ;;  %vm606_vm0 = vcmp.eq.s32.totalorder %v4214_v21, %v419_v5  ;;  %vm608_vm1 = vcmp.eq.s32.totalorder %v4217_v22, %v419_v5 }
 0x13b   : > { %3335 = vmatmul.mubr.msk.f32.gmra.mrb[80].mxu1 %vm589_vm2, %v3851_v25  ;;  %3431 = vmatmul.mubr.msk.f32.gmra.mrb[80].mxu0 %vm591_vm3, %v3851_v25  ;;  %vm605_vm2 = vcmp.eq.s32.totalorder %v4211_v20, %v419_v5  ;;  %vm607_vm3 = vcmp.eq.s32.totalorder %v4220_v23, %v419_v5 }
 0x13c   : > { %3336 = vmatprep.mubr.msk.f32.mxu1 %vm594_vm4, %v3851_v25  ;;  %3432 = vmatprep.mubr.msk.f32.mxu0 %vm596_vm5, %v3851_v25  ;;  %vm610_vm4 = vcmp.eq.s32.totalorder %v4214_v21, %v422_v8  ;;  %vm612_vm5 = vcmp.eq.s32.totalorder %v4217_v22, %v422_v8 }
 0x13f   : > { %3337 = vmatmul.mubr.msk.f32.gmra.mrb[82].mxu1 %vm593_vm6, %v3851_v25  ;;  %3433 = vmatmul.mubr.msk.f32.gmra.mrb[82].mxu0 %vm595_vm7, %v3851_v25  ;;  %vm609_vm6 = vcmp.eq.s32.totalorder %v4211_v20, %v422_v8  ;;  %vm611_vm7 = vcmp.eq.s32.totalorder %v4220_v23, %v422_v8 }
 0x140   : > { %3338 = vmatprep.mubr.msk.f32.mxu1 %vm598_vm8, %v3851_v25  ;;  %3434 = vmatprep.mubr.msk.f32.mxu0 %vm600_vm9, %v3851_v25  ;;  %vm614_vm8 = vcmp.eq.s32.totalorder %v4214_v21, %v425_v6  ;;  %vm616_vm9 = vcmp.eq.s32.totalorder %v4217_v22, %v425_v6 }
 0x143   : > { %3339 = vmatmul.mubr.msk.f32.gmra.mrb[84].mxu1 %vm597_vm10, %v3851_v25  ;;  %3435 = vmatmul.mubr.msk.f32.gmra.mrb[84].mxu0 %vm599_vm11, %v3851_v25  ;;  %vm613_vm10 = vcmp.eq.s32.totalorder %v4211_v20, %v425_v6  ;;  %vm615_vm11 = vcmp.eq.s32.totalorder %v4220_v23, %v425_v6 }
 0x144   : > { %3340 = vmatprep.mubr.msk.f32.mxu1 %vm602_vm12, %v3851_v25  ;;  %3436 = vmatprep.mubr.msk.f32.mxu0 %vm604_vm13, %v3851_v25  ;;  %vm618_vm12 = vcmp.eq.s32.totalorder %v4214_v21, %v428_v7  ;;  %vm620_vm13 = vcmp.eq.s32.totalorder %v4217_v22, %v428_v7 }
 0x147   : > { %3341 = vmatmul.mubr.msk.f32.gmra.mrb[86].mxu1 %vm601_vm14, %v3851_v25  ;;  %3437 = vmatmul.mubr.msk.f32.gmra.mrb[86].mxu0 %vm603_vm15, %v3851_v25  ;;  %vm617_vm14 = vcmp.eq.s32.totalorder %v4211_v20, %v428_v7  ;;  %vm619_vm15 = vcmp.eq.s32.totalorder %v4220_v23, %v428_v7 }
 0x148   : > { %3342 = vmatprep.mubr.msk.f32.mxu1 %vm606_vm0, %v3851_v25  ;;  %3438 = vmatprep.mubr.msk.f32.mxu0 %vm608_vm1, %v3851_v25 }
 0x14b   : > { %3343 = vmatmul.mubr.msk.f32.gmra.mrb[88].mxu1 %vm605_vm2, %v3851_v25  ;;  %3439 = vmatmul.mubr.msk.f32.gmra.mrb[88].mxu0 %vm607_vm3, %v3851_v25 }
 0x14c   : > { %3344 = vmatprep.mubr.msk.f32.mxu1 %vm610_vm4, %v3851_v25  ;;  %3440 = vmatprep.mubr.msk.f32.mxu0 %vm612_vm5, %v3851_v25 }
 0x14f   : > { %3345 = vmatmul.mubr.msk.f32.gmra.mrb[90].mxu1 %vm609_vm6, %v3851_v25  ;;  %3441 = vmatmul.mubr.msk.f32.gmra.mrb[90].mxu0 %vm611_vm7, %v3851_v25  ;;  %vm1964_vm6 = vcmask 1041409  }
 0x150   : > { %3346 = vmatprep.mubr.msk.f32.mxu1 %vm614_vm8, %v3851_v25  ;;  %3442 = vmatprep.mubr.msk.f32.mxu0 %vm616_vm9, %v3851_v25  ;;  %vm1966_vm9 = vcmask 1042434  }
 0x153   : > { %3347 = vmatmul.mubr.msk.f32.gmra.mrb[92].mxu1 %vm613_vm10, %v3851_v25  ;;  %3443 = vmatmul.mubr.msk.f32.gmra.mrb[92].mxu0 %vm615_vm11, %v3851_v25 }
 0x154   : > { %3348 = vmatprep.mubr.msk.f32.mxu1 %vm618_vm12, %v3851_v25  ;;  %3444 = vmatprep.mubr.msk.f32.mxu0 %vm620_vm13, %v3851_v25  ;;  %vm1968_vm13 = vcmask 1043459  }
 0x157   : > { %3349 = vmatmul.mubr.msk.f32.gmra.mrb[94].mxu1 %vm617_vm14, %v3851_v25  ;;  %3445 = vmatmul.mubr.msk.f32.gmra.mrb[94].mxu0 %vm619_vm15, %v3851_v25 }
 0x16e   : > { %v1135_v19 = vpop.f32.mrb[0].mxu1  ;;  %v1440_v21 = vpop.f32.mrb[0].mxu0 }
 0x16f   : > { %v1441_v22 = vadd.f32 %v1440_v21, %v1135_v19  ;;  %v1137_v23 = vpop.f32.mrb[1].mxu1  ;;  %v1442_v24 = vpop.f32.mrb[1].mxu0 }
 0x171   : > { %v4634_v25 = vmul.f32 %v1733_v18, %v1441_v22 }
 0x172   : > { %v1140_v26 = vpop.f32.mrb[2].mxu1  ;;  %v1445_v27 = vpop.f32.mrb[2].mxu0 }
 0x173   : > { %v1446_v28 = vadd.f32 %v1445_v27, %v1140_v26  ;;  %v1142_v29 = vpop.f32.mrb[3].mxu1  ;;  %v1447_v30 = vpop.f32.mrb[3].mxu0 }
 0x175   : > { %v4636_v31 = vmul.f32 %v1733_v18, %v1446_v28 }
 0x176   : > { %v1145_v32 = vpop.f32.mrb[4].mxu1  ;;  %v1450_v33 = vpop.f32.mrb[4].mxu0 }
 0x177   : > { %v1451_v34 = vadd.f32 %v1450_v33, %v1145_v32  ;;  %v1147_v35 = vpop.f32.mrb[5].mxu1  ;;  %v1452_v36 = vpop.f32.mrb[5].mxu0 }
 0x178   : > { %v1726_v35 = vcombine.high %v4627_v16, %v4627_v16 }
 0x179   : > { %v2236_v37 = vmul.f32 %v1733_v18, %v1451_v34 }
 0x17a   : > { %v1150_v38 = vpop.f32.mrb[6].mxu1  ;;  %v1455_v39 = vpop.f32.mrb[6].mxu0  ;;  %v1741_v43 = vrot.slane %v1726_v35, %v4630_v17 }
 0x17b   : > { %v1456_v40 = vadd.f32 %v1455_v39, %v1150_v38  ;;  %v1457_v41 = vpop.f32.mrb[7].mxu0  ;;  %2244 = vadd.xlane.f32.xlu0 %v2236_v37  ;;  %v1152_v42 = vpop.f32.mrb[7].mxu1 }
 0x17d   : > { %v4638_v44 = vsub.f32 %v1456_v40, %v1733_v18 }
 0x17e   : > { %v1155_v45 = vpop.f32.mrb[8].mxu1  ;;  %v1460_v46 = vpop.f32.mrb[8].mxu0 }
 0x17f   : > { %v1461_v47 = vadd.f32 %v1460_v46, %v1155_v45  ;;  %v1157_v48 = vpop.f32.mrb[9].mxu1  ;;  %v1462_v49 = vpop.f32.mrb[9].mxu0 }
 0x181   : > { %v2586_v50 = vsub.f32 %v1461_v47, %v1733_v18 }
 0x182   : > { %v1160_v52 = vpop.f32.mrb[10].mxu1  ;;  %v1465_v53 = vpop.f32.mrb[10].mxu0 }
 0x183   : > { %v1466_v54 = vadd.f32 %v1465_v53, %v1160_v52  ;;  %v1162_v55 = vpop.f32.mrb[11].mxu1  ;;  %v1467_v56 = vpop.f32.mrb[11].mxu0  ;;  %v2594_v57 = vmul.f32 %v2586_v50, %v2586_v50 }
 0x185   : > { %2602 = vadd.xlane.f32.xlu1 %v2594_v57  ;;  %v2743_v58 = vsub.f32 %v1466_v54, %v1733_v18 }
 0x186   : > { %v1165_v60 = vpop.f32.mrb[12].mxu1  ;;  %v1470_v61 = vpop.f32.mrb[12].mxu0 }
 0x187   : > { %v1471_v62 = vadd.f32 %v1470_v61, %v1165_v60  ;;  %v1167_v63 = vpop.f32.mrb[13].mxu1  ;;  %v1472_v0 = vpop.f32.mrb[13].mxu0  ;;  %v2751_v1 = vmul.f32 %v2743_v58, %v2743_v58 }
 0x189   : > { %2759 = vadd.xlane.f32.xlu1 %v2751_v1  ;;  %v4645_v2 = vmul.f32 %v1737_v59, %v1471_v62 }
 0x18a   : > { %v1170_v3 = vpop.f32.mrb[14].mxu1  ;;  %v1475_v4 = vpop.f32.mrb[14].mxu0 }
 0x18b   : > { %v1476_v5 = vadd.f32 %v1475_v4, %v1170_v3  ;;  %v1172_v8 = vpop.f32.mrb[15].mxu1  ;;  %v1477_v6 = vpop.f32.mrb[15].mxu0 }
 0x18d   : > { %v4647_v7 = vmul.f32 %v1737_v59, %v1476_v5 }
 0x18e   : > { %v1175_v9 = vpop.f32.mrb[16].mxu1  ;;  %v1480_v10 = vpop.f32.mrb[16].mxu0 }
 0x18f   : > { %v1481_v11 = vadd.f32 %v1480_v10, %v1175_v9  ;;  %v1177_v15 = vpop.f32.mrb[17].mxu1  ;;  %v1482_v18 = vpop.f32.mrb[17].mxu0 }
 0x191   : > { %v2237_v19 = vmul.f32 %v1737_v59, %v1481_v11 }
 0x192   : > { %v1180_v21 = vpop.f32.mrb[18].mxu1  ;;  %v1485_v22 = vpop.f32.mrb[18].mxu0 }
 0x193   : > { %v1486_v23 = vadd.f32 %v1485_v22, %v1180_v21  ;;  %v1487_v24 = vpop.f32.mrb[19].mxu0  ;;  %2246 = vadd.xlane.f32.xlu1 %v2237_v19  ;;  %v1182_v26 = vpop.f32.mrb[19].mxu1  ;;  %v1728_v19 = vcombine.high %v4641_v51, %v4641_v51 }
 0x195   : > { %v4649_v27 = vsub.f32 %v1486_v23, %v1737_v59 }
 0x196   : > { %v1185_v28 = vpop.f32.mrb[20].mxu1  ;;  %v1490_v29 = vpop.f32.mrb[20].mxu0 }
 0x197   : > { %v1491_v30 = vadd.f32 %v1490_v29, %v1185_v28  ;;  %v1187_v32 = vpop.f32.mrb[21].mxu1  ;;  %v1492_v33 = vpop.f32.mrb[21].mxu0 }
 0x199   : > { %v2587_v34 = vsub.f32 %v1491_v30, %v1737_v59  ;;  %v1745_v30 = vrot.slane %v1728_v19, %v4630_v17 }
 0x19a   : > { %v1190_v36 = vpop.f32.mrb[22].mxu1  ;;  %v1495_v37 = vpop.f32.mrb[22].mxu0 }
 0x19b   : > { %v1496_v38 = vadd.f32 %v1495_v37, %v1190_v36  ;;  %v1192_v39 = vpop.f32.mrb[23].mxu1  ;;  %v1497_v40 = vpop.f32.mrb[23].mxu0  ;;  %v2595_v41 = vmul.f32 %v2587_v34, %v2587_v34 }
 0x19d   : > { %2604 = vadd.xlane.f32.xlu0 %v2595_v41  ;;  %v2744_v42 = vsub.f32 %v1496_v38, %v1737_v59 }
 0x19e   : > { %v1195_v45 = vpop.f32.mrb[24].mxu1  ;;  %v1500_v46 = vpop.f32.mrb[24].mxu0 }
 0x19f   : > { %v1501_v47 = vadd.f32 %v1500_v46, %v1195_v45  ;;  %v1197_v48 = vpop.f32.mrb[25].mxu1  ;;  %v1502_v49 = vpop.f32.mrb[25].mxu0  ;;  %v2752_v50 = vmul.f32 %v2744_v42, %v2744_v42 }
 0x1a1   : > { %2761 = vadd.xlane.f32.xlu0 %v2752_v50  ;;  %v4654_v52 = vmul.f32 %v1741_v43, %v1501_v47 }
 0x1a2   : > { %v1200_v16 = vpop.f32.mrb[26].mxu1  ;;  %v1505_v53 = vpop.f32.mrb[26].mxu0 }
 0x1a3   : > { %v1506_v54 = vadd.f32 %v1505_v53, %v1200_v16  ;;  %v1202_v55 = vpop.f32.mrb[27].mxu1  ;;  %v1507_v56 = vpop.f32.mrb[27].mxu0  ;;  %v1681_v16 = vcombine.high %v4622_v14, %v4622_v14 }
 0x1a5   : > { %v4656_v57 = vmul.f32 %v1741_v43, %v1506_v54 }
 0x1a6   : > { %v1205_v58 = vpop.f32.mrb[28].mxu1  ;;  %v1510_v59 = vpop.f32.mrb[28].mxu0 }
 0x1a7   : > { %v1511_v60 = vadd.f32 %v1510_v59, %v1205_v58  ;;  %v1207_v61 = vpop.f32.mrb[29].mxu1  ;;  %v1512_v62 = vpop.f32.mrb[29].mxu0  ;;  %v1695_v59 = vrot.slane %v1681_v16, %v4620_v13 }
 0x1a9   : > { %v2238_v63 = vmul.f32 %v1741_v43, %v1511_v60 }
 0x1aa   : > { %v1210_v0 = vpop.f32.mrb[30].mxu1  ;;  %v1515_v1 = vpop.f32.mrb[30].mxu0 }
 0x1ab   : > { %v1516_v3 = vadd.f32 %v1515_v1, %v1210_v0  ;;  %v1517_v4 = vpop.f32.mrb[31].mxu0  ;;  %2248 = vadd.xlane.f32.xlu0 %v2238_v63  ;;  %v1212_v5 = vpop.f32.mrb[31].mxu1 }
 0x1ac   : > { %v4673_v4 = vrot.slane %v1695_v59, %v4620_v13 }
 0x1ad   : > { %v4658_v8 = vsub.f32 %v1516_v3, %v1741_v43 }
 0x1ae   : > { %v1215_v6 = vpop.f32.mrb[32].mxu1  ;;  %v1520_v9 = vpop.f32.mrb[32].mxu0 }
 0x1af   : > { %v1521_v10 = vadd.f32 %v1520_v9, %v1215_v6  ;;  %v1217_v11 = vpop.f32.mrb[33].mxu1  ;;  %v1522_v15 = vpop.f32.mrb[33].mxu0 }
 0x1b1   : > { %v2588_v18 = vsub.f32 %v1521_v10, %v1741_v43 }
 0x1b2   : > { %v1220_v21 = vpop.f32.mrb[34].mxu1  ;;  %v1525_v22 = vpop.f32.mrb[34].mxu0 }
 0x1b3   : > { %v1526_v23 = vadd.f32 %v1525_v22, %v1220_v21  ;;  %v1222_v24 = vpop.f32.mrb[35].mxu1  ;;  %v1527_v26 = vpop.f32.mrb[35].mxu0  ;;  %v2596_v28 = vmul.f32 %v2588_v18, %v2588_v18  ;;  %v1749_v18 = vrot.slane %v4673_v4, %v4630_v17 }
 0x1b5   : > { %2606 = vadd.xlane.f32.xlu1 %v2596_v28  ;;  %v2745_v29 = vsub.f32 %v1526_v23, %v1741_v43 }
 0x1b6   : > { %v1225_v32 = vpop.f32.mrb[36].mxu1  ;;  %v1530_v33 = vpop.f32.mrb[36].mxu0 }
 0x1b7   : > { %v1531_v34 = vadd.f32 %v1530_v33, %v1225_v32  ;;  %v1227_v35 = vpop.f32.mrb[37].mxu1  ;;  %v1532_v36 = vpop.f32.mrb[37].mxu0  ;;  %v2753_v37 = vmul.f32 %v2745_v29, %v2745_v29 }
 0x1b9   : > { %2763 = vadd.xlane.f32.xlu0 %v2753_v37  ;;  %v4663_v38 = vmul.f32 %v1745_v30, %v1531_v34 }
 0x1ba   : > { %v1230_v51 = vpop.f32.mrb[38].mxu1  ;;  %v1535_v39 = vpop.f32.mrb[38].mxu0 }
 0x1bb   : > { %v1536_v40 = vadd.f32 %v1535_v39, %v1230_v51  ;;  %v1232_v41 = vpop.f32.mrb[39].mxu1  ;;  %v1537_v42 = vpop.f32.mrb[39].mxu0 }
 0x1bd   : > { %v4665_v45 = vmul.f32 %v1745_v30, %v1536_v40 }
 0x1be   : > { %v1235_v46 = vpop.f32.mrb[40].mxu1  ;;  %v1540_v43 = vpop.f32.mrb[40].mxu0 }
 0x1bf   : > { %v1541_v47 = vadd.f32 %v1540_v43, %v1235_v46  ;;  %v1237_v48 = vpop.f32.mrb[41].mxu1  ;;  %v1542_v49 = vpop.f32.mrb[41].mxu0 }
 0x1c0   : > { %v1697_v49 = vcombine.high %v1695_v59, %v1695_v59 }
 0x1c1   : > { %v2239_v50 = vmul.f32 %v1745_v30, %v1541_v47 }
 0x1c2   : > { %v1240_v53 = vpop.f32.mrb[42].mxu1  ;;  %v1545_v54 = vpop.f32.mrb[42].mxu0 }
 0x1c3   : > { %v1546_v55 = vadd.f32 %v1545_v54, %v1240_v53  ;;  %v1547_v56 = vpop.f32.mrb[43].mxu0  ;;  %2250 = vadd.xlane.f32.xlu0 %v2239_v50  ;;  %v1242_v58 = vpop.f32.mrb[43].mxu1 }
 0x1c5   : > { %v4670_v60 = vsub.f32 %v1546_v55, %v1745_v30 }
 0x1c6   : > { %v1245_v61 = vpop.f32.mrb[44].mxu1  ;;  %v1550_v62 = vpop.f32.mrb[44].mxu0 }
 0x1c7   : > { %v1551_v63 = vadd.f32 %v1550_v62, %v1245_v61  ;;  %v1247_v0 = vpop.f32.mrb[45].mxu1  ;;  %v1552_v1 = vpop.f32.mrb[45].mxu0  ;;  %v4684_v61 = vrot.slane %v1697_v49, %v4620_v13 }
 0x1c9   : > { %v2589_v3 = vsub.f32 %v1551_v63, %v1745_v30  ;;  %v4688_v59 = vrot.slane %v4684_v61, %v4630_v17 }
 0x1ca   : > { %v1250_v14 = vpop.f32.mrb[46].mxu1  ;;  %v1555_v5 = vpop.f32.mrb[46].mxu0 }
 0x1cb   : > { %v1556_v6 = vadd.f32 %v1555_v5, %v1250_v14  ;;  %v1252_v9 = vpop.f32.mrb[47].mxu1  ;;  %v1557_v10 = vpop.f32.mrb[47].mxu0  ;;  %v2597_v11 = vmul.f32 %v2589_v3, %v2589_v3 }
 0x1cd   : > { %2608 = vadd.xlane.f32.xlu0 %v2597_v11  ;;  %v2746_v15 = vsub.f32 %v1556_v6, %v1745_v30 }
 0x1ce   : > { %v1255_v19 = vpop.f32.mrb[48].mxu1  ;;  %v1560_v21 = vpop.f32.mrb[48].mxu0 }
 0x1cf   : > { %v1561_v22 = vadd.f32 %v1560_v21, %v1255_v19  ;;  %v1257_v23 = vpop.f32.mrb[49].mxu1  ;;  %v1562_v24 = vpop.f32.mrb[49].mxu0  ;;  %v2754_v26 = vmul.f32 %v2746_v15, %v2746_v15 }
 0x1d1   : > { %2765 = vadd.xlane.f32.xlu0 %v2754_v26  ;;  %v4677_v28 = vmul.f32 %v1749_v18, %v1561_v22 }
 0x1d2   : > { %v1260_v29 = vpop.f32.mrb[50].mxu1  ;;  %v1565_v32 = vpop.f32.mrb[50].mxu0 }
 0x1d3   : > { %v1566_v33 = vadd.f32 %v1565_v32, %v1260_v29  ;;  %v1262_v34 = vpop.f32.mrb[51].mxu1  ;;  %v1567_v35 = vpop.f32.mrb[51].mxu0 }
 0x1d5   : > { %v4679_v36 = vmul.f32 %v1749_v18, %v1566_v33 }
 0x1d6   : > { %v1265_v30 = vpop.f32.mrb[52].mxu1  ;;  %v1570_v37 = vpop.f32.mrb[52].mxu0 }
 0x1d7   : > { %v1571_v51 = vadd.f32 %v1570_v37, %v1265_v30  ;;  %v1267_v39 = vpop.f32.mrb[53].mxu1  ;;  %v1572_v40 = vpop.f32.mrb[53].mxu0 }
 0x1d9   : > { %v2240_v41 = vmul.f32 %v1749_v18, %v1571_v51 }
 0x1da   : > { %v1270_v42 = vpop.f32.mrb[54].mxu1  ;;  %v1575_v46 = vpop.f32.mrb[54].mxu0 }
 0x1db   : > { %v1576_v43 = vadd.f32 %v1575_v46, %v1270_v42  ;;  %v1577_v47 = vpop.f32.mrb[55].mxu0  ;;  %2252 = vadd.xlane.f32.xlu1 %v2240_v41  ;;  %v1272_v48 = vpop.f32.mrb[55].mxu1 }
 0x1dd   : > { %v4681_v50 = vsub.f32 %v1576_v43, %v1749_v18 }
 0x1de   : > { %v1275_v16 = vpop.f32.mrb[56].mxu1  ;;  %v1580_v53 = vpop.f32.mrb[56].mxu0 }
 0x1df   : > { %v1581_v54 = vadd.f32 %v1580_v53, %v1275_v16  ;;  %v1277_v55 = vpop.f32.mrb[57].mxu1  ;;  %v1582_v56 = vpop.f32.mrb[57].mxu0  ;;  %v1727_v16 = vcombine.high %v4673_v4, %v4673_v4 }
 0x1e1   : > { %v2590_v58 = vsub.f32 %v1581_v54, %v1749_v18 }
 0x1e2   : > { %v1280_v62 = vpop.f32.mrb[58].mxu1  ;;  %v1585_v63 = vpop.f32.mrb[58].mxu0 }
 0x1e3   : > { %v1586_v0 = vadd.f32 %v1585_v63, %v1280_v62  ;;  %v1282_v1 = vpop.f32.mrb[59].mxu1  ;;  %v1587_v3 = vpop.f32.mrb[59].mxu0  ;;  %v2598_v14 = vmul.f32 %v2590_v58, %v2590_v58  ;;  %v4708_v63 = vrot.slane %v1727_v16, %v4630_v17 }
 0x1e5   : > { %2610 = vadd.xlane.f32.xlu1 %v2598_v14  ;;  %v4690_v5 = vsub.f32 %v1586_v0, %v1749_v18 }
 0x1e6   : > { %v1285_v6 = vpop.f32.mrb[60].mxu1  ;;  %v1590_v9 = vpop.f32.mrb[60].mxu0 }
 0x1e7   : > { %v1591_v10 = vadd.f32 %v1590_v9, %v1285_v6  ;;  %v1287_v11 = vpop.f32.mrb[61].mxu1  ;;  %v1592_v15 = vpop.f32.mrb[61].mxu0 }
 0x1e9   : > { %v4693_v13 = vmul.f32 %v4688_v59, %v1591_v10 }
 0x1ea   : > { %v1290_v19 = vpop.f32.mrb[62].mxu1  ;;  %v1595_v21 = vpop.f32.mrb[62].mxu0 }
 0x1eb   : > { %v1596_v22 = vadd.f32 %v1595_v21, %v1290_v19  ;;  %v1292_v23 = vpop.f32.mrb[63].mxu1  ;;  %v1597_v24 = vpop.f32.mrb[63].mxu0 }
 0x1ed   : > { %v4696_v26 = vmul.f32 %v4688_v59, %v1596_v22 }
 0x1ee   : > { %v1295_v29 = vpop.f32.mrb[64].mxu1  ;;  %v1600_v32 = vpop.f32.mrb[64].mxu0 }
 0x1ef   : > { %v1601_v18 = vadd.f32 %v1600_v32, %v1295_v29  ;;  %v1297_v33 = vpop.f32.mrb[65].mxu1  ;;  %v1602_v34 = vpop.f32.mrb[65].mxu0 }
 0x1f1   : > { %v2241_v35 = vmul.f32 %v4688_v59, %v1601_v18 }
 0x1f2   : > { %v1300_v30 = vpop.f32.mrb[66].mxu1  ;;  %v1605_v37 = vpop.f32.mrb[66].mxu0 }
 0x1f3   : > { %v1606_v51 = vadd.f32 %v1605_v37, %v1300_v30  ;;  %v1607_v39 = vpop.f32.mrb[67].mxu0  ;;  %2254 = vadd.xlane.f32.xlu0 %v2241_v35  ;;  %v1302_v40 = vpop.f32.mrb[67].mxu1 }
 0x1f5   : > { %v4700_v41 = vsub.f32 %v1606_v51, %v4688_v59 }
 0x1f6   : > { %v1305_v42 = vpop.f32.mrb[68].mxu1  ;;  %v1610_v46 = vpop.f32.mrb[68].mxu0 }
 0x1f7   : > { %v1611_v43 = vadd.f32 %v1610_v46, %v1305_v42  ;;  %v1307_v47 = vpop.f32.mrb[69].mxu1  ;;  %v1612_v48 = vpop.f32.mrb[69].mxu0 }
 0x1f9   : > { %v2591_v49 = vsub.f32 %v1611_v43, %v4688_v59 }
 0x1fa   : > { %v1310_v53 = vpop.f32.mrb[70].mxu1  ;;  %v1615_v54 = vpop.f32.mrb[70].mxu0 }
 0x1fb   : > { %v4705_v55 = vadd.f32 %v1615_v54, %v1310_v53  ;;  %v1312_v56 = vpop.f32.mrb[71].mxu1  ;;  %v1617_v58 = vpop.f32.mrb[71].mxu0  ;;  %v2599_v62 = vmul.f32 %v2591_v49, %v2591_v49 }
 0x1fd   : > { %2612 = vadd.xlane.f32.xlu1 %v2599_v62 }
 0x1fe   : > { %v1315_v0 = vpop.f32.mrb[72].mxu1  ;;  %v1620_v1 = vpop.f32.mrb[72].mxu0 }
 0x1ff   : > { %v1621_v3 = vadd.f32 %v1620_v1, %v1315_v0  ;;  %v1317_v14 = vpop.f32.mrb[73].mxu1  ;;  %v1622_v6 = vpop.f32.mrb[73].mxu0 }
 0x201   : > { %v4711_v9 = vmul.f32 %v4708_v63, %v1621_v3 }
 0x202   : > { %v1320_v4 = vpop.f32.mrb[74].mxu1  ;;  %v1625_v10 = vpop.f32.mrb[74].mxu0 }
 0x203   : > { %v1626_v11 = vadd.f32 %v1625_v10, %v1320_v4  ;;  %v1322_v15 = vpop.f32.mrb[75].mxu1  ;;  %v1627_v19 = vpop.f32.mrb[75].mxu0 }
 0x205   : > { %v4714_v21 = vmul.f32 %v4708_v63, %v1626_v11  ;;  %v1729_v11 = vcombine.high %v4684_v61, %v4684_v61  ;;  %v2748_v61 = vsub.f32 %v4705_v55, %v4688_v59 }
 0x206   : > { %v1325_v22 = vpop.f32.mrb[76].mxu1  ;;  %v1630_v23 = vpop.f32.mrb[76].mxu0 }
 0x207   : > { %v1631_v24 = vadd.f32 %v1630_v23, %v1325_v22  ;;  %v1327_v29 = vpop.f32.mrb[77].mxu1  ;;  %v1632_v32 = vpop.f32.mrb[77].mxu0 }
 0x208   : > { %v4727_v29 = vrot.slane %v1729_v11, %v4630_v17 }
 0x209   : > { %v2242_v18 = vmul.f32 %v4708_v63, %v1631_v24 }
 0x20a   : > { %v1330_v33 = vpop.f32.mrb[78].mxu1  ;;  %v1635_v34 = vpop.f32.mrb[78].mxu0 }
 0x20b   : > { %v4717_v35 = vadd.f32 %v1635_v34, %v1330_v33  ;;  %v1637_v30 = vpop.f32.mrb[79].mxu0  ;;  %2256 = vadd.xlane.f32.xlu1 %v2242_v18  ;;  %v1332_v37 = vpop.f32.mrb[79].mxu1 }
 0x20e   : > { %v1335_v51 = vpop.f32.mrb[80].mxu1  ;;  %v1640_v39 = vpop.f32.mrb[80].mxu0 }
 0x20f   : > { %v1641_v40 = vadd.f32 %v1640_v39, %v1335_v51  ;;  %v1337_v42 = vpop.f32.mrb[81].mxu1  ;;  %v1642_v46 = vpop.f32.mrb[81].mxu0  ;;  %v2755_v51 = vmul.f32 %v4690_v5, %v4690_v5 }
 0x211   : > { %v2592_v43 = vsub.f32 %v1641_v40, %v4708_v63 }
 0x212   : > { %v1340_v47 = vpop.f32.mrb[82].mxu1  ;;  %v1645_v48 = vpop.f32.mrb[82].mxu0 }
 0x213   : > { %v1342_v49 = vpop.f32.mrb[83].mxu1  ;;  %v2600_v16 = vmul.f32 %v2592_v43, %v2592_v43  ;;  %v1646_v53 = vadd.f32 %v1645_v48, %v1340_v47  ;;  %v1647_v54 = vpop.f32.mrb[83].mxu0  ;;  %v2756_v43 = vmul.f32 %v2748_v61, %v2748_v61 }
 0x215   : > { %2614 = vadd.xlane.f32.xlu1 %v2600_v16  ;;  %v2749_v5 = vsub.f32 %v1646_v53, %v4708_v63  ;;  %v2499_v53 = vmul.f32 %v4670_v60, %v4670_v60  ;;  %v4780_v60 = vld [vmem:[%s227_s11] sm:$0xff]  ;;  %s3789_s11 = sshll.u32 %s3858_s19, 4  ;;  %s3790_s11 = int_to_ptr.vmem [resolvable:$false] %s3789_s11 }
 0x216   : > { %v1345_v56 = vpop.f32.mrb[84].mxu1  ;;  %v1650_v58 = vpop.f32.mrb[84].mxu0  ;;  %vm1771_vm0 = vcmp.ne.s32.totalorder %v4780_v60, 0  ;;  %p3792_p1 = scmp.lt.s32.totalorder %s5515_s30, %s3790_s11 }
 0x217   : > { %v1347_v62 = vpop.f32.mrb[85].mxu1  ;;  %v4720_v0 = vadd.f32 %v1650_v58, %v1345_v56  ;;  %v1652_v1 = vpop.f32.mrb[85].mxu0  ;;  %v2757_v55 = vmul.f32 %v2749_v5, %v2749_v5 }
 0x218   : > { %v2496_v1 = vmul.f32 %v4638_v44, %v4638_v44  ;;  %v2494_v44 = vsub.f32 %v4717_v35, %v4708_v63 }
 0x21a   : > { %v1350_v3 = vpop.f32.mrb[86].mxu1  ;;  %v1655_v14 = vpop.f32.mrb[86].mxu0  ;;  %v2502_v11 = vmul.f32 %v2494_v44, %v2494_v44 }
 0x21b   : > { %v4722_v6 = vadd.f32 %v1655_v14, %v1350_v3  ;;  %v1352_v4 = vpop.f32.mrb[87].mxu1  ;;  %v1657_v10 = vpop.f32.mrb[87].mxu0  ;;  %v2497_v3 = vmul.f32 %v4649_v27, %v4649_v27  ;;  %v2498_v14 = vmul.f32 %v4658_v8, %v4658_v8 }
 0x21c   : > { %v2500_v4 = vmul.f32 %v4681_v50, %v4681_v50  ;;  %v2501_v10 = vmul.f32 %v4700_v41, %v4700_v41  ;;  %v3853_v41 = vmov 0.0  }
 0x21d   : > { %v4786_v63 = vsel %vm1771_vm0, 1.0, %v3853_v41 }
 0x21e   : > { %v1355_v15 = vpop.f32.mrb[88].mxu1  ;;  %v1660_v19 = vpop.f32.mrb[88].mxu0 }
 0x21f   : > { %v1661_v22 = vadd.f32 %v1660_v19, %v1355_v15  ;;  %v1357_v23 = vpop.f32.mrb[89].mxu1  ;;  %v1662_v24 = vpop.f32.mrb[89].mxu0 }
 0x221   : > { %v2243_v32 = vmul.f32 %v4727_v29, %v1661_v22 }
 0x222   : > { %v1360_v18 = vpop.f32.mrb[90].mxu1  ;;  %v1665_v33 = vpop.f32.mrb[90].mxu0 }
 0x223   : > { %v1666_v34 = vadd.f32 %v1665_v33, %v1360_v18  ;;  %v1667_v30 = vpop.f32.mrb[91].mxu0  ;;  %2258 = vadd.xlane.f32.xlu0 %v2243_v32  ;;  %v1362_v37 = vpop.f32.mrb[91].mxu1 }
 0x225   : > { %v2495_v27 = vsub.f32 %v1666_v34, %v4727_v29 }
 0x226   : > { %v1365_v39 = vpop.f32.mrb[92].mxu1  ;;  %v1670_v40 = vpop.f32.mrb[92].mxu0 }
 0x227   : > { %v1671_v42 = vadd.f32 %v1670_v40, %v1365_v39  ;;  %2767 = vadd.xlane.f32.xlu0 %v2755_v51  ;;  %v1367_v17 = vpop.f32.mrb[93].mxu1  ;;  %v1672_v46 = vpop.f32.mrb[93].mxu0  ;;  %v2503_v8 = vmul.f32 %v2495_v27, %v2495_v27 }
 0x229   : > { %v2593_v47 = vsub.f32 %v1671_v42, %v4727_v29  ;;  %v2388_v42 = vadd.s32 4294967280, %v4211_v20 }
 0x22a   : > { %v1370_v48 = vpop.f32.mrb[94].mxu1  ;;  %v1675_v49 = vpop.f32.mrb[94].mxu0 }
 0x22b   : > { %v1676_v16 = vadd.f32 %v1675_v49, %v1370_v48  ;;  %2769 = vadd.xlane.f32.xlu0 %v2756_v43  ;;  %v1372_v54 = vpop.f32.mrb[95].mxu1  ;;  %v2601_v56 = vmul.f32 %v2593_v47, %v2593_v47  ;;  %v1677_v58 = vpop.f32.mrb[95].mxu0  ;;  %v2690_v48 = vadd.s32 4294967264, %v4211_v20 }
 0x22c   : > { %v4831_v58 = vsub.s32 %v2388_v42, %v4612_v12 }
 0x22d   : > { %2616 = vadd.xlane.f32.xlu1 %v2601_v56  ;;  %v2750_v59 = vsub.f32 %v1676_v16, %v4727_v29  ;;  %v2847_v16 = vadd.s32 4294967256, %v4211_v20 }
 0x22f   : > { %v2758_v62 = vmul.f32 %v2750_v59, %v2750_v59  ;;  %v4841_v44 = vsub.s32 %v2847_v16, %v4612_v12 }
 0x231   : > { %2771 = vadd.xlane.f32.xlu1 %v2757_v55  ;;  %2773 = vadd.xlane.f32.xlu0 %v2758_v62 }
 0x235   : > { %2504 = vadd.xlane.f32.xlu1 %v2496_v1  ;;  %2506 = vadd.xlane.f32.xlu0 %v2497_v3  ;;  %v4834_v3 = vsub.s32 %v2690_v48, %v4612_v12 }
 0x239   : > { %2508 = vadd.xlane.f32.xlu1 %v2498_v14  ;;  %2510 = vadd.xlane.f32.xlu0 %v2499_v53 }
 0x23d   : > { %2512 = vadd.xlane.f32.xlu1 %v2500_v4  ;;  %2514 = vadd.xlane.f32.xlu0 %v2501_v10 }
 0x241   : > { %2516 = vadd.xlane.f32.xlu1 %v2502_v11  ;;  %2518 = vadd.xlane.f32.xlu0 %v2503_v8 }
 0x245   : > { %1780 = vadd.xlane.f32.xlu1 %v4634_v25  ;;  %1782 = vadd.xlane.f32.xlu0 %v4645_v2  ;;  %v1779_v25 = vmul.f32 %v4727_v29, %v4720_v0  ;;  %v2603_v2 = vpop.xlane.xlu1 %2602 }
 0x246   : > { %v4801_v19 = vadd.f32 1e-09, %v2603_v2 }
 0x248   : > { %vm2628_vm1 = vcmp.eq.f32.partialorder %v4801_v19, inf  ;;  %v2631_v11 = vand.u32 2147483648, %v4801_v19  ;;  %vm2630_vm4 = vcmp.eq.f32.partialorder %v4801_v19, 0.0 }
 0x249   : > { %1784 = vadd.xlane.f32.xlu1 %v4654_v52  ;;  %1786 = vadd.xlane.f32.xlu0 %v4663_v38  ;;  %v2760_v52 = vpop.xlane.xlu1 %2759 }
 0x24a   : > { %v4803_v22 = vadd.f32 1e-09, %v2760_v52 }
 0x24c   : > { %vm2785_vm2 = vcmp.eq.f32.partialorder %v4803_v22, inf  ;;  %vm2787_vm5 = vcmp.eq.f32.partialorder %v4803_v22, 0.0 }
 0x24d   : > { %1788 = vadd.xlane.f32.xlu1 %v4677_v28  ;;  %2047 = vadd.xlane.f32.xlu0 %v4636_v31  ;;  %v2046_v31 = vmul.f32 %v4727_v29, %v4722_v6  ;;  %v4778_v38 = vpop.xlane.xlu1 %2246 }
 0x251   : > { %2049 = vadd.xlane.f32.xlu1 %v4647_v7  ;;  %1790 = vadd.xlane.f32.xlu0 %v4693_v13  ;;  %v4770_v7 = vpop.xlane.xlu0 %2244  ;;  %v2607_v37 = vpop.xlane.xlu1 %2606 }
 0x252   : > { %v2260_v4 = vmax.f32 %v4770_v7, 0.0  ;;  %v4847_v8 = vadd.f32 1e-09, %v2607_v37 }
 0x254   : > { %vm2642_vm14 = vcmp.eq.f32.partialorder %v4847_v8, inf  ;;  %vm2644_vm15 = vcmp.eq.f32.partialorder %v4847_v8, 0.0 }
 0x255   : > { %2051 = vadd.xlane.f32.xlu1 %v4656_v57  ;;  %1792 = vadd.xlane.f32.xlu0 %v4711_v9  ;;  %v2268_v57 = vand.u32 2147483647, %v4770_v7 }
 0x257   : > { %v2276_v28 = vsub.f32 0.0, %v2268_v57 }
 0x259   : > { %2053 = vadd.xlane.f32.xlu1 %v4665_v45  ;;  %1794 = vadd.xlane.f32.xlu0 %v1779_v25  ;;  %v2605_v45 = vpop.xlane.xlu0 %2604  ;;  %v2284_v50 = vmul.f32 1.442695, %v2276_v28 }
 0x25a   : > { %v4809_v18 = vadd.f32 1e-09, %v2605_v45  ;;  %v2788_v45 = vand.u32 2147483648, %v4803_v22 }
 0x25b   : > { %3649 = vpow2.f32 %v2284_v50 }
 0x25c   : > { %vm2635_vm7 = vcmp.eq.f32.partialorder %v4809_v18, inf  ;;  %vm2637_vm8 = vcmp.eq.f32.partialorder %v4809_v18, 0.0  ;;  %v2638_v48 = vand.u32 2147483648, %v4809_v18 }
 0x25d   : > { %2055 = vadd.xlane.f32.xlu1 %v4679_v36  ;;  %2057 = vadd.xlane.f32.xlu0 %v4696_v26  ;;  %v2269_v36 = vand.u32 2147483647, %v4778_v38  ;;  %v2762_v26 = vpop.xlane.xlu0 %2761 }
 0x25e   : > { %v4812_v33 = vadd.f32 1e-09, %v2762_v26 }
 0x25f   : > { %v2277_v13 = vsub.f32 0.0, %v2269_v36 }
 0x260   : > { %vm2792_vm11 = vcmp.eq.f32.partialorder %v4812_v33, inf  ;;  %v2795_v16 = vand.u32 2147483648, %v4812_v33  ;;  %vm2794_vm12 = vcmp.eq.f32.partialorder %v4812_v33, 0.0 }
 0x261   : > { %2059 = vadd.xlane.f32.xlu1 %v4714_v21  ;;  %2061 = vadd.xlane.f32.xlu0 %v2046_v31  ;;  %v2286_v9 = vmul.f32 1.442695, %v2277_v13  ;;  %v4790_v21 = vpop.xlane.xlu0 %2248  ;;  %v2261_v13 = vmax.f32 %v4778_v38, 0.0 }
 0x262   : > { %v2270_v0 = vand.u32 2147483647, %v4790_v21 }
 0x263   : > { %3651 = vpow2.f32 %v2286_v9 }
 0x264   : > { %v2278_v23 = vsub.f32 0.0, %v2270_v0  ;;  %3653 = vrsqrt.f32 %v4801_v19 }
 0x265   : > { %v4794_v35 = vpop.xlane.xlu0 %2763  ;;  %v3650_v15 = vpop.eup %3649  ;;  %3655 = vrsqrt.f32 %v4803_v22 }
 0x266   : > { %v2300_v24 = vadd.f32 1.0, %v3650_v15  ;;  %v2288_v30 = vmul.f32 1.442695, %v2278_v23  ;;  %v2303_v47 = vmul.f32 -0.5, %v3650_v15  ;;  %v2306_v1 = vand.u32 2147483647, %v3650_v15 }
 0x268   : > { %3657 = vlog2.f32 %v2300_v24  ;;  %v4821_v40 = vpop.xlane.xlu1 %2252  ;;  %v2304_v62 = vadd.f32 1.0, %v2303_v47  ;;  %vm4853_vm3 = vcmp.lt.f32.partialorder %v2306_v1, 0.0004427343 }
 0x269   : > { %v4799_v6 = vpop.xlane.xlu0 %2250  ;;  %3659 = vrsqrt.f32 %v4809_v18  ;;  %v2272_v46 = vand.u32 2147483647, %v4821_v40 }
 0x26a   : > { %v2271_v34 = vand.u32 2147483647, %v4799_v6  ;;  %3661 = vrsqrt.f32 %v4812_v33  ;;  %v2305_v36 = vmul.f32 %v3650_v15, %v2304_v62  ;;  %v2444_v62 = vrot.slane %v4778_v38, %v4831_v58 }
 0x26b   : > { %3663 = vpow2.f32 %v2288_v30  ;;  %v2280_v59 = vsub.f32 0.0, %v2272_v46  ;;  %v2452_v47 = vrot.slane %v4799_v6, %v4831_v58 }
 0x26c   : > { %v2279_v61 = vsub.f32 0.0, %v2271_v34 }
 0x26d   : > { %v4805_v29 = vpop.xlane.xlu0 %2608  ;;  %v4807_v32 = vpop.eup %3651  ;;  %v2292_v28 = vmul.f32 1.442695, %v2280_v59 }
 0x26e   : > { %v2309_v51 = vadd.f32 1.0, %v4807_v32  ;;  %v2290_v17 = vmul.f32 1.442695, %v2279_v61  ;;  %v3654_v49 = vpop.eup %3653  ;;  %v2312_v14 = vmul.f32 -0.5, %v4807_v32  ;;  %v2315_v9 = vand.u32 2147483647, %v4807_v32 }
 0x26f   : > { %v3656_v54 = vpop.eup %3655  ;;  %v2627_v10 = vmul.f32 %v3654_v49, %v4801_v19  ;;  %v4876_v61 = vadd.f32 1e-09, %v4805_v29 }
 0x270   : > { %3665 = vlog2.f32 %v2309_v51  ;;  %v2784_v57 = vmul.f32 %v3656_v54, %v4803_v22  ;;  %v2313_v26 = vadd.f32 1.0, %v2312_v14  ;;  %vm4886_vm10 = vcmp.lt.f32.partialorder %v2315_v9, 0.0004427343 }
 0x271   : > { %v4819_v39 = vpop.xlane.xlu0 %2765  ;;  %3667 = vpow2.f32 %v2290_v17  ;;  %v2629_v41 = vsel %vm2628_vm1, %v4801_v19, %v2627_v10  ;;  %v4882_v17 = vadd.f32 1e-09, %v4794_v35 }
 0x272   : > { %2901 = vrot.lane.b32.xlu1 %v4786_v63, %s3854_s12  ;;  %v3658_v5 = vpop.eup %3657  ;;  %v4849_v25 = vpop.xlane.xlu1 %2610  ;;  %3669 = vrsqrt.f32 %v4847_v8  ;;  %v2786_v51 = vsel %vm2785_vm2, %v4803_v22, %v2784_v57  ;;  %v2314_v42 = vmul.f32 %v4807_v32, %v2313_v26  ;;  %v4901_v54 = vadd.f32 1e-09, %v4819_v39 }
 0x273   : > { %v3660_v55 = vpop.eup %3659  ;;  %v2302_v52 = vmul.f32 0.6931472, %v3658_v5  ;;  %3671 = vpow2.f32 %v2292_v28  ;;  %v2440_v39 = vrot.slane %v4770_v7, %v4831_v58  ;;  %v2262_v28 = vmax.f32 %v4790_v21, 0.0 }
 0x274   : > { %v3662_v53 = vpop.eup %3661  ;;  %v2634_v0 = vmul.f32 %v3660_v55, %v4809_v18  ;;  %vm2799_vm1 = vcmp.eq.f32.partialorder %v4882_v17, inf }
 0x275   : > { %v4843_v27 = vpop.eup %3663  ;;  %v2791_v24 = vmul.f32 %v3662_v53, %v4812_v33  ;;  %v2308_v37 = vsel %vm4853_vm3, %v2305_v36, %v2302_v52  ;;  %v2536_v36 = vadd.s32 4294967272, %v4211_v20  ;;  %vm2801_vm3 = vcmp.eq.f32.partialorder %v4882_v17, 0.0 }
 0x276   : > { %2923 = vrot.lane.b32.xlu1 %v4786_v63, %s3855_s14  ;;  %v2318_v15 = vadd.f32 1.0, %v4843_v27  ;;  %v2636_v29 = vsel %vm2635_vm7, %v4809_v18, %v2634_v0  ;;  %v2372_v53 = vadd.f32 %v2308_v37, %v2260_v4  ;;  %v2632_v18 = vsel %vm2630_vm4, %v2631_v11, %v2629_v41 }
 0x277   : > { %2912 = vrot.lane.b32.xlu0 %v4786_v63, %s3856_s20  ;;  %v2793_v49 = vsel %vm2792_vm11, %v4812_v33, %v2791_v24  ;;  %v2639_v5 = vsel %vm2637_vm8, %v2638_v48, %v2636_v29  ;;  %v2789_v33 = vsel %vm2787_vm5, %v2788_v45, %v2786_v51  ;;  %v2321_v52 = vmul.f32 -0.5, %v4843_v27 }
 0x278   : > { %3673 = vlog2.f32 %v2318_v15  ;;  %v2796_v1 = vsel %vm2794_vm12, %v2795_v16, %v2793_v49  ;;  %v2698_v10 = vrot.slane %v2639_v5, %v4834_v3  ;;  %v2694_v19 = vrot.slane %v2632_v18, %v4834_v3 }
 0x279   : > { %v2855_v4 = vrot.slane %v2796_v1, %v4841_v44  ;;  %v2469_v11 = vsel %vm1964_vm6, %v2444_v62, %v2440_v39  ;;  %v2392_v57 = vrot.slane %v2372_v53, %v4831_v58  ;;  %v2851_v45 = vrot.slane %v2789_v33, %v4841_v44 }
 0x27a   : > { %v3666_v31 = vpop.eup %3665  ;;  %v4935_v41 = vadd.f32 1e-09, %v4849_v25  ;;  %v4938_v9 = vsel %vm1964_vm6, %v2698_v10, %v2694_v19  ;;  %v2322_v15 = vadd.f32 1.0, %v2321_v52  ;;  %v2324_v25 = vand.u32 2147483647, %v4843_v27 }
 0x27b   : > { %v2311_v23 = vmul.f32 0.6931472, %v3666_v31  ;;  %v4884_v46 = vpop.eup %3667  ;;  %v2645_v37 = vand.u32 2147483648, %v4847_v8  ;;  %v4957_v29 = vsub.s32 %v2536_v36, %v4612_v12  ;;  %vm2649_vm4 = vcmp.eq.f32.partialorder %v4876_v61, inf }
 0x27c   : > { %v2327_v59 = vadd.f32 1.0, %v4884_v46  ;;  %v3670_v31 = vpop.eup %3669  ;;  %v2330_v48 = vmul.f32 -0.5, %v4884_v46  ;;  %vm4968_vm2 = vcmp.lt.f32.partialorder %v2324_v25, 0.0004427343  ;;  %vm1970_vm5 = vcmask 1044484  }
 0x27d   : > { %v2317_v32 = vsel %vm4886_vm10, %v2314_v42, %v2311_v23  ;;  %v4923_v7 = vpop.eup %3671  ;;  %v2641_v26 = vmul.f32 %v3670_v31, %v4847_v8  ;;  %v4945_v23 = vsel %vm1964_vm6, %v2855_v4, %v2851_v45  ;;  %v2652_v19 = vand.u32 2147483648, %v4876_v61 }
 0x27e   : > { %v2373_v55 = vadd.f32 %v2317_v32, %v2261_v13  ;;  %v2331_v10 = vadd.f32 1.0, %v2330_v48  ;;  %vm2651_vm7 = vcmp.eq.f32.partialorder %v4876_v61, 0.0  ;;  %vm2806_vm8 = vcmp.eq.f32.partialorder %v4901_v54, inf }
 0x27f   : > { %v2643_v32 = vsel %vm2642_vm14, %v4847_v8, %v2641_v26  ;;  %vm2808_vm11 = vcmp.eq.f32.partialorder %v4901_v54, 0.0  ;;  %v2456_v25 = vrot.slane %v4821_v40, %v4831_v58  ;;  %vm2656_vm12 = vcmp.eq.f32.partialorder %v4935_v41, inf }
 0x280   : > { %v4825_v43 = vpop.xlane.xlu0 %2254  ;;  %v2396_v22 = vrot.slane %v2373_v55, %v4831_v58  ;;  %v2646_v39 = vsel %vm2644_vm15, %v2645_v37, %v2643_v32  ;;  %vm1972_vm15 = vcmask 1045509  }
 0x281   : > { %v2273_v56 = vand.u32 2147483647, %v4825_v43 }
 0x282   : > { %v3674_v50 = vpop.eup %3673 }
 0x283   : > { %v2281_v2 = vsub.f32 0.0, %v2273_v56  ;;  %v2320_v42 = vmul.f32 0.6931472, %v3674_v50 }
 0x285   : > { %v2294_v34 = vmul.f32 1.442695, %v2281_v2  ;;  %v2448_v2 = vrot.slane %v4790_v21, %v4831_v58  ;;  %v2336_v21 = vadd.f32 1.0, %v4923_v7 }
 0x287   : > { %3675 = vpow2.f32 %v2294_v34  ;;  %v2470_v13 = vsel %vm1966_vm9, %v2448_v2, %v2469_v11  ;;  %v4948_v34 = vsel %vm1964_vm6, %v2396_v22, %v2392_v57  ;;  %v2702_v22 = vrot.slane %v2646_v39, %v4834_v3 }
 0x288   : > { %3677 = vrsqrt.f32 %v4876_v61  ;;  %v2471_v2 = vsel %vm1968_vm13, %v2452_v47, %v2470_v13  ;;  %v2332_v57 = vmul.f32 %v4884_v46, %v2331_v10  ;;  %v5012_v13 = vsub.s32 %v4211_v20, %v4612_v12 }
 0x289   : > { %3679 = vrsqrt.f32 %v4882_v17  ;;  %v2724_v32 = vsel %vm1966_vm9, %v2702_v22, %v4938_v9 }
 0x28a   : > { %v4868_v30 = vpop.xlane.xlu1 %2612  ;;  %3681 = vrsqrt.f32 %v4901_v54 }
 0x28b   : > { %3683 = vlog2.f32 %v2327_v59  ;;  %v4966_v59 = vadd.f32 1e-09, %v4868_v30  ;;  %v2263_v30 = vmax.f32 %v4799_v6, 0.0 }
 0x291   : > { %v4940_v0 = vpop.eup %3675 }
 0x292   : > { %v3678_v24 = vpop.eup %3677  ;;  %v2345_v49 = vadd.f32 1.0, %v4940_v0  ;;  %v2348_v37 = vmul.f32 -0.5, %v4940_v0 }
 0x293   : > { %v3680_v51 = vpop.eup %3679  ;;  %v2648_v5 = vmul.f32 %v3678_v24, %v4876_v61 }
 0x294   : > { %v3682_v55 = vpop.eup %3681  ;;  %v2798_v1 = vmul.f32 %v3680_v51, %v4882_v17 }
 0x295   : > { %v3684_v53 = vpop.eup %3683  ;;  %v2650_v31 = vsel %vm2649_vm4, %v4876_v61, %v2648_v5  ;;  %v2805_v8 = vmul.f32 %v3682_v55, %v4901_v54  ;;  %v2264_v55 = vmax.f32 %v4821_v40, 0.0  ;;  %v2351_v40 = vand.u32 2147483647, %v4940_v0 }
 0x296   : > { %v2800_v4 = vsel %vm2799_vm1, %v4882_v17, %v2798_v1  ;;  %v2329_v52 = vmul.f32 0.6931472, %v3684_v53  ;;  %v2653_v45 = vsel %vm2651_vm7, %v2652_v19, %v2650_v31  ;;  %v5044_v53 = vsel %vm1970_vm5, %v2456_v25, %v2471_v2 }
 0x297   : > { %v2807_v61 = vsel %vm2806_vm8, %v4901_v54, %v2805_v8  ;;  %v2706_v24 = vrot.slane %v2653_v45, %v4834_v3  ;;  %vm2658_vm1 = vcmp.eq.f32.partialorder %v4935_v41, 0.0  ;;  %v2659_v19 = vand.u32 2147483648, %v4935_v41 }
 0x298   : > { %v4896_v35 = vpop.xlane.xlu1 %2256  ;;  %vm2665_vm7 = vcmp.eq.f32.partialorder %v4966_v59, 0.0  ;;  %vm1974_vm8 = vcmask 1046534  }
 0x299   : > { %v2274_v56 = vand.u32 2147483647, %v4896_v35  ;;  %v2266_v8 = vmax.f32 %v4896_v35, 0.0 }
 0x29b   : > { %v2282_v14 = vsub.f32 0.0, %v2274_v56  ;;  %v2323_v56 = vmul.f32 %v4843_v27, %v2322_v15 }
 0x29d   : > { %v2296_v38 = vmul.f32 1.442695, %v2282_v14  ;;  %v2802_v14 = vand.u32 2147483648, %v4882_v17  ;;  %v2326_v27 = vsel %vm4968_vm2, %v2323_v56, %v2320_v42  ;;  %v2809_v17 = vand.u32 2147483648, %v4901_v54 }
 0x29e   : > { %v2374_v6 = vadd.f32 %v2326_v27, %v2262_v28  ;;  %v2339_v28 = vmul.f32 -0.5, %v4923_v7  ;;  %v2349_v27 = vadd.f32 1.0, %v2348_v37  ;;  %vm5069_vm2 = vcmp.lt.f32.partialorder %v2351_v40, 0.0004427343 }
 0x29f   : > { %3685 = vpow2.f32 %v2296_v38  ;;  %v2333_v38 = vand.u32 2147483647, %v4884_v46  ;;  %v5003_v36 = vsel %vm2801_vm3, %v2802_v14, %v2800_v4  ;;  %v5025_v51 = vsel %vm2808_vm11, %v2809_v17, %v2807_v61 }
 0x2a0   : > { %3687 = vrsqrt.f32 %v4935_v41  ;;  %v2400_v26 = vrot.slane %v2374_v6, %v4831_v58  ;;  %v2340_v42 = vadd.f32 1.0, %v2339_v28  ;;  %v2859_v54 = vrot.slane %v5003_v36, %v4841_v44 }
 0x2a1   : > { %3689 = vlog2.f32 %v2336_v21  ;;  %vm5005_vm10 = vcmp.lt.f32.partialorder %v2333_v38, 0.0004427343  ;;  %v2863_v9 = vrot.slane %v5025_v51, %v4841_v44  ;;  %v2350_v22 = vmul.f32 %v4940_v0, %v2349_v27 }
 0x2a2   : > { %v2615_v16 = vpop.xlane.xlu1 %2614  ;;  %3691 = vlog2.f32 %v2345_v49  ;;  %v2335_v15 = vsel %vm5005_vm10, %v2332_v57, %v2329_v52  ;;  %v2342_v49 = vand.u32 2147483647, %v4923_v7  ;;  %v5038_v5 = vsel %vm1966_vm9, %v2400_v26, %v4948_v34 }
 0x2a3   : > { %v4980_v18 = vadd.f32 1e-09, %v2615_v16  ;;  %3693 = vrsqrt.f32 %v4966_v59  ;;  %v5032_v48 = vadd.f32 %v2335_v15, %v2263_v30  ;;  %v5047_v30 = vsel %vm1968_vm13, %v2706_v24, %v2724_v32 }
 0x2a4   : > { %v2341_v10 = vmul.f32 %v4923_v7, %v2340_v42  ;;  %vm5054_vm14 = vcmp.lt.f32.partialorder %v2342_v49, 0.0004427343  ;;  %v2265_v57 = vmax.f32 %v4825_v43, 0.0  ;;  %v2460_v28 = vrot.slane %v4825_v43, %v4831_v58 }
 0x2a5   : > { %3695 = vrsqrt.f32 %v4980_v18  ;;  %v2404_v31 = vrot.slane %v5032_v48, %v4831_v58  ;;  %vm2663_vm3 = vcmp.eq.f32.partialorder %v4966_v59, inf  ;;  %vm2670_vm4 = vcmp.eq.f32.partialorder %v4980_v18, inf }
 0x2a6   : > { %v2673_v48 = vand.u32 2147483648, %v4980_v18  ;;  %vm2672_vm10 = vcmp.eq.f32.partialorder %v4980_v18, 0.0 }
 0x2a9   : > { %v4982_v33 = vpop.eup %3685 }
 0x2aa   : > { %v2354_v11 = vadd.f32 1.0, %v4982_v33  ;;  %v3688_v46 = vpop.eup %3687  ;;  %v2357_v52 = vmul.f32 -0.5, %v4982_v33  ;;  %v2360_v43 = vand.u32 2147483647, %v4982_v33 }
 0x2ab   : > { %v3690_v21 = vpop.eup %3689  ;;  %v2655_v16 = vmul.f32 %v3688_v46, %v4935_v41 }
 0x2ac   : > { %3697 = vlog2.f32 %v2354_v11  ;;  %v3692_v56 = vpop.eup %3691  ;;  %v2338_v62 = vmul.f32 0.6931472, %v3690_v21  ;;  %v2666_v21 = vand.u32 2147483648, %v4966_v59  ;;  %v2358_v24 = vadd.f32 1.0, %v2357_v52 }
 0x2ad   : > { %v3694_v14 = vpop.eup %3693  ;;  %v2657_v2 = vsel %vm2656_vm12, %v4935_v41, %v2655_v16  ;;  %v2347_v6 = vmul.f32 0.6931472, %v3692_v56  ;;  %vm5100_vm11 = vcmp.lt.f32.partialorder %v2360_v43, 0.0004427343 }
 0x2ae   : > { %v2344_v4 = vsel %vm5054_vm14, %v2341_v10, %v2338_v62  ;;  %v2662_v7 = vmul.f32 %v3694_v14, %v4966_v59  ;;  %v2660_v15 = vsel %vm2658_vm1, %v2659_v19, %v2657_v2  ;;  %v2359_v62 = vmul.f32 %v4982_v33, %v2358_v24 }
 0x2af   : > { %v3696_v38 = vpop.eup %3695  ;;  %v2376_v26 = vadd.f32 %v2344_v4, %v2264_v55  ;;  %v2353_v41 = vsel %vm5069_vm2, %v2350_v22, %v2347_v6  ;;  %v2710_v55 = vrot.slane %v2660_v15, %v4834_v3  ;;  %v2464_v22 = vrot.slane %v4896_v35, %v4831_v58 }
 0x2b0   : > { %v5023_v20 = vpop.xlane.xlu0 %2258  ;;  %v2669_v50 = vmul.f32 %v3696_v38, %v4980_v18  ;;  %v2664_v17 = vsel %vm2663_vm3, %v4966_v59, %v2662_v7  ;;  %v2377_v42 = vadd.f32 %v2353_v41, %v2265_v57  ;;  %v5116_v38 = vsel %vm1972_vm15, %v2460_v28, %v5044_v53 }
 0x2b1   : > { %v2275_v47 = vand.u32 2147483647, %v5023_v20  ;;  %v2667_v56 = vsel %vm2665_vm7, %v2666_v21, %v2664_v17  ;;  %v2408_v14 = vrot.slane %v2376_v26, %v4831_v58  ;;  %v2726_v19 = vsel %vm1970_vm5, %v2710_v55, %v5047_v30 }
 0x2b2   : > { %v2671_v32 = vsel %vm2670_vm4, %v4980_v18, %v2669_v50  ;;  %v2412_v40 = vrot.slane %v2377_v42, %v4831_v58  ;;  %v2714_v33 = vrot.slane %v2667_v56, %v4834_v3  ;;  %v2267_v57 = vmax.f32 %v5023_v20, 0.0 }
 0x2b3   : > { %v2283_v1 = vsub.f32 0.0, %v2275_v47  ;;  %v2468_v30 = vrot.slane %v5023_v20, %v4831_v58  ;;  %vm1976_vm14 = vcmask 1047559  }
 0x2b4   : > { %v2768_v39 = vpop.xlane.xlu0 %2767  ;;  %v2727_v45 = vsel %vm1972_vm15, %v2714_v33, %v2726_v19 }
 0x2b5   : > { %v2298_v34 = vmul.f32 1.442695, %v2283_v1  ;;  %v5066_v11 = vadd.f32 1e-09, %v2768_v39  ;;  %v2674_v39 = vsel %vm2672_vm10, %v2673_v48, %v2671_v32 }
 0x2b6   : > { %v3698_v46 = vpop.eup %3697  ;;  %v2718_v52 = vrot.slane %v2674_v39, %v4834_v3 }
 0x2b7   : > { %3699 = vpow2.f32 %v2298_v34  ;;  %v2356_v47 = vmul.f32 0.6931472, %v3698_v46  ;;  %v2423_v34 = vsel %vm1968_vm13, %v2404_v31, %v5038_v5  ;;  %vm2813_vm12 = vcmp.eq.f32.partialorder %v5066_v11, inf }
 0x2b8   : > { %v2770_v61 = vpop.xlane.xlu0 %2769  ;;  %3701 = vrsqrt.f32 %v5066_v11  ;;  %v2424_v5 = vsel %vm1970_vm5, %v2408_v14, %v2423_v34  ;;  %v2728_v21 = vsel %vm1974_vm8, %v2718_v52, %v2727_v45  ;;  %vm2815_vm1 = vcmp.eq.f32.partialorder %v5066_v11, 0.0 }
 0x2b9   : > { %v5084_v25 = vadd.f32 1e-09, %v2770_v61  ;;  %v2362_v18 = vsel %vm5100_vm11, %v2359_v62, %v2356_v47  ;;  %v5132_v28 = vsel %vm1972_vm15, %v2412_v40, %v2424_v5  ;;  %v2816_v42 = vand.u32 2147483648, %v5066_v11 }
 0x2ba   : > { %v2617_v0 = vpop.xlane.xlu1 %2616  ;;  %v5125_v31 = vadd.f32 %v2362_v18, %v2266_v8 }
 0x2bb   : > { %v5086_v37 = vadd.f32 1e-09, %v2617_v0  ;;  %v2823_v47 = vand.u32 2147483648, %v5084_v25  ;;  %vm2820_vm3 = vcmp.eq.f32.partialorder %v5084_v25, inf  ;;  %vm2822_vm7 = vcmp.eq.f32.partialorder %v5084_v25, 0.0 }
 0x2bc   : > { %v2416_v43 = vrot.slane %v5125_v31, %v4831_v58  ;;  %v2474_v31 = vsel %vm1974_vm8, %v2464_v22, %v5116_v38 }
 0x2bd   : > { %3703 = vrsqrt.f32 %v5086_v37  ;;  %vm2677_vm2 = vcmp.eq.f32.partialorder %v5086_v37, inf  ;;  %vm2679_vm4 = vcmp.eq.f32.partialorder %v5086_v37, 0.0 }
 0x2be   : > { %v2772_v49 = vpop.xlane.xlu1 %2771  ;;  %v2774_v16 = vpop.xlane.xlu0 %2773  ;;  %3705 = vrsqrt.f32 %v5084_v25 }
 0x2bf   : > { %v5095_v1 = vadd.f32 1e-09, %v2772_v49  ;;  %v5097_v59 = vadd.f32 1e-09, %v2774_v16  ;;  %v2680_v49 = vand.u32 2147483648, %v5086_v37 }
 0x2c1   : > { %v5105_v10 = vpop.eup %3699  ;;  %3707 = vrsqrt.f32 %v5095_v1  ;;  %vm2827_vm10 = vcmp.eq.f32.partialorder %v5095_v1, inf  ;;  %vm2834_vm11 = vcmp.eq.f32.partialorder %v5097_v59, inf }
 0x2c2   : > { %v2363_v2 = vadd.f32 1.0, %v5105_v10  ;;  %v2505_v6 = vpop.xlane.xlu1 %2504  ;;  %v2507_v4 = vpop.xlane.xlu0 %2506  ;;  %3709 = vrsqrt.f32 %v5097_v59  ;;  %v2366_v61 = vmul.f32 -0.5, %v5105_v10 }
 0x2c3   : > { %v2520_v7 = vadd.f32 1e-09, %v2505_v6  ;;  %v2521_v53 = vadd.f32 1e-09, %v2507_v4  ;;  %v3702_v50 = vpop.eup %3701  ;;  %v2830_v6 = vand.u32 2147483648, %v5095_v1 }
 0x2c4   : > { %3711 = vlog2.f32 %v2363_v2  ;;  %v2812_v32 = vmul.f32 %v3702_v50, %v5066_v11  ;;  %v2367_v55 = vadd.f32 1.0, %v2366_v61  ;;  %v2369_v2 = vand.u32 2147483647, %v5105_v10 }
 0x2c5   : > { %v2540_v46 = vrot.slane %v2520_v7, %v4957_v29  ;;  %v2544_v26 = vrot.slane %v2521_v53, %v4957_v29 }
 0x2c6   : > { %v2509_v15 = vpop.xlane.xlu1 %2508  ;;  %v2511_v41 = vpop.xlane.xlu0 %2510  ;;  %v2814_v52 = vsel %vm2813_vm12, %v5066_v11, %v2812_v32  ;;  %v2368_v53 = vmul.f32 %v5105_v10, %v2367_v55  ;;  %vm2370_vm12 = vcmp.lt.f32.partialorder %v2369_v2, 0.0004427343 }
 0x2c7   : > { %v2522_v0 = vadd.f32 1e-09, %v2509_v15  ;;  %v2523_v17 = vadd.f32 1e-09, %v2511_v41  ;;  %v3704_v24 = vpop.eup %3703  ;;  %v2569_v62 = vsel %vm1964_vm6, %v2544_v26, %v2540_v46 }
 0x2c8   : > { %v2676_v48 = vmul.f32 %v3704_v24, %v5086_v37  ;;  %v3706_v56 = vpop.eup %3705 }
 0x2c9   : > { %v2548_v16 = vrot.slane %v2522_v0, %v4957_v29  ;;  %v2552_v14 = vrot.slane %v2523_v17, %v4957_v29  ;;  %v2819_v45 = vmul.f32 %v3706_v56, %v5084_v25 }
 0x2ca   : > { %v2513_v27 = vpop.xlane.xlu1 %2512  ;;  %v2515_v39 = vpop.xlane.xlu0 %2514  ;;  %v2678_v8 = vsel %vm2677_vm2, %v5086_v37, %v2676_v48  ;;  %v2817_v48 = vsel %vm2815_vm1, %v2816_v42, %v2814_v52  ;;  %vm2829_vm1 = vcmp.eq.f32.partialorder %v5095_v1, 0.0  ;;  %vm2836_vm2 = vcmp.eq.f32.partialorder %v5097_v59, 0.0 }
 0x2cb   : > { %v3708_v40 = vpop.eup %3707  ;;  %v2570_v18 = vsel %vm1966_vm9, %v2548_v16, %v2569_v62  ;;  %v2524_v33 = vadd.f32 1e-09, %v2513_v27  ;;  %v2525_v34 = vadd.f32 1e-09, %v2515_v39  ;;  %v2681_v4 = vsel %vm2679_vm4, %v2680_v49, %v2678_v8 }
 0x2cc   : > { %v3710_v7 = vpop.eup %3709  ;;  %v2722_v37 = vrot.slane %v2681_v4, %v4834_v3  ;;  %v2826_v50 = vmul.f32 %v3708_v40, %v5095_v1  ;;  %v2571_v61 = vsel %vm1968_vm13, %v2552_v14, %v2570_v18  ;;  %v2821_v55 = vsel %vm2820_vm3, %v5084_v25, %v2819_v45 }
 0x2cd   : > { %v2556_v19 = vrot.slane %v2524_v33, %v4957_v29  ;;  %v2560_v41 = vrot.slane %v2525_v34, %v4957_v29  ;;  %v2833_v24 = vmul.f32 %v3710_v7, %v5097_v59  ;;  %v2837_v34 = vand.u32 2147483648, %v5097_v59 }
 0x2ce   : > { %v3712_v5 = vpop.eup %3711  ;;  %v2517_v46 = vpop.xlane.xlu1 %2516  ;;  %v2729_v10 = vsel %vm1976_vm14, %v2722_v37, %v2728_v21  ;;  %v2828_v42 = vsel %vm2827_vm10, %v5095_v1, %v2826_v50  ;;  %v2824_v8 = vsel %vm2822_vm7, %v2823_v47, %v2821_v55  ;;  %v2426_v25 = vsel %vm1974_vm8, %v2416_v43, %v5132_v28 }
 0x2cf   : > { %v2519_v26 = vpop.xlane.xlu0 %2518  ;;  %v2365_v15 = vmul.f32 0.6931472, %v3712_v5  ;;  %v2526_v0 = vadd.f32 1e-09, %v2517_v46  ;;  %v2572_v3 = vsel %vm1970_vm5, %v2556_v19, %v2571_v61  ;;  %v2731_v16 = vsel %vm1771_vm0, %v2729_v10, 0.0 }
 0x2d0   : > { %v2527_v17 = vadd.f32 1e-09, %v2519_v26  ;;  %v2732_v11 = vsub.f32 1.0, %v2731_v16  ;;  %v2573_v27 = vsel %vm1972_vm15, %v2560_v41, %v2572_v3  ;;  %v2835_v33 = vsel %vm2834_vm11, %v5097_v59, %v2833_v24 }
 0x2d1   : > { %v2371_v32 = vsel %vm2370_vm12, %v2368_v53, %v2365_v15  ;;  %v2564_v49 = vrot.slane %v2526_v0, %v4957_v29  ;;  %v2831_v37 = vsel %vm2829_vm1, %v2830_v6, %v2828_v42  ;;  %v2838_v59 = vsel %vm2836_vm2, %v2837_v34, %v2835_v33 }
 0x2d2   : > { %v2379_v56 = vadd.f32 %v2371_v32, %v2267_v57  ;;  %v2568_v62 = vrot.slane %v2527_v17, %v4957_v29  ;;  %v5188_v14 = vpop.xlane.xlu1 %1780  ;;  %v2733_v29 = vmax.f32 %v2732_v11, 0.0  ;;  %v2867_v47 = vrot.slane %v2817_v48, %v4841_v44 }
 0x2d3   : > { %v5190_v21 = vpop.xlane.xlu0 %1782  ;;  %v1990_v57 = vrot.slane %v5188_v14, %v5012_v13  ;;  %v2574_v18 = vsel %vm1974_vm8, %v2564_v49, %v2573_v27  ;;  %v2871_v45 = vrot.slane %v2824_v8, %v4841_v44  ;;  %v2875_v28 = vrot.slane %v2831_v37, %v4841_v44 }
 0x2d4   : > { %v1994_v39 = vrot.slane %v5190_v21, %v5012_v13  ;;  %v2420_v40 = vrot.slane %v2379_v56, %v4831_v58  ;;  %v2734_v7 = vmul.f32 %v2733_v29, %v2733_v29  ;;  %v2575_v52 = vsel %vm1976_vm14, %v2568_v62, %v2574_v18 }
 0x2d5   : > { %v2577_v5 = vsel %vm1771_vm0, %v2575_v52, 0.0  ;;  %v2881_v43 = vsel %vm1966_vm9, %v2859_v54, %v4945_v23  ;;  %v2475_v26 = vsel %vm1976_vm14, %v2468_v30, %v2474_v31  ;;  %v2879_v38 = vrot.slane %v2838_v59, %v4841_v44 }
 0x2d6   : > { %v2019_v2 = vsel %vm1964_vm6, %v1994_v39, %v1990_v57  ;;  %v5213_v4 = vpop.xlane.xlu1 %1784  ;;  %2736 = vrot.lane.b32.xlu0 %v2734_v7, %s3856_s20  ;;  %v2427_v53 = vsel %vm1976_vm14, %v2420_v40, %v2426_v25  ;;  %2579 = vrot.lane.b32.xlu1 %v2577_v5, %s3854_s12  ;;  %v2882_v36 = vsel %vm1968_vm13, %v2863_v9, %v2881_v43  ;;  %v1796_v33 = vsub.f32 0.0, %v5188_v14  ;;  %s3791_s12 = scalar_lea.vmem %s3790_s11, 256 }
 0x2d7   : > { %v5216_v19 = vpop.xlane.xlu0 %1786  ;;  %v1998_v1 = vrot.slane %v5213_v4, %v5012_v13  ;;  %v2477_v54 = vsel %vm1771_vm0, %v2427_v53, %v2475_v26  ;;  %v2883_v22 = vsel %vm1970_vm5, %v2867_v47, %v2882_v36  ;;  %v1797_v34 = vsub.f32 0.0, %v5190_v21  ;;  %p3793_p2 = scmp.lt.s32.totalorder %s3791_s12, %s3785_s10 }
 0x2d8   : > { %v2002_v6 = vrot.slane %v5216_v19, %v5012_v13  ;;  %v2884_v20 = vsel %vm1972_vm15, %v2871_v45, %v2883_v22  ;;  %v1812_v52 = vand.u32 2147483647, %v1796_v33  ;;  %v1798_v31 = vsub.f32 0.0, %v5213_v4 }
 0x2d9   : > { %v2020_v50 = vsel %vm1966_vm9, %v1998_v1, %v2019_v2  ;;  %v2885_v44 = vsel %vm1974_vm8, %v2875_v28, %v2884_v20  ;;  %v1813_v37 = vand.u32 2147483647, %v1797_v34  ;;  %v1799_v43 = vsub.f32 0.0, %v5216_v19  ;;  %p3794_p3 = por %p3793_p2, %p3792_p1 }
 0x2da   : > { %v2021_v61 = vsel %vm1968_vm13, %v2002_v6, %v2020_v50  ;;  %v5247_v46 = vpop.xlane.xlu1 %1788  ;;  %2479 = vrot.lane.b32.xlu0 %v2477_v54, %s3857_s27  ;;  %v2886_v9 = vsel %vm1976_vm14, %v2879_v38, %v2885_v44  ;;  %v1820_v53 = vsub.f32 0.0, %v1812_v52  ;;  %vm2030_vm7 = vcmask 64512  }
 0x2db   : > { %v5253_v35 = vpop.xlane.xlu0 %2047  ;;  %v2006_v23 = vrot.slane %v5247_v46, %v5012_v13  ;;  %v2888_v0 = vsel %vm1771_vm0, %v2886_v9, 0.0  ;;  %v1821_v50 = vsub.f32 0.0, %v1813_v37  ;;  %v1815_v9 = vand.u32 2147483647, %v1799_v43  ;;  %p3795_p4 = pnand %p3794_p3, %p3788_p0 }
 0x2dc   : > { %v2071_v58 = vand.u32 2147483647, %v5253_v35  ;;  %v2889_v3 = vsub.f32 1.0, %v2888_v0  ;;  %v2063_v44 = vmax.f32 %v5253_v35, 0.0  ;;  %v1807_v21 = vmax.f32 %v1799_v43, 0.0 }
 0x2dd   : > { %v2022_v30 = vsel %vm1970_vm5, %v2006_v23, %v2021_v61  ;;  %v1828_v23 = vmul.f32 1.442695, %v1820_v53  ;;  %v1830_v20 = vmul.f32 1.442695, %v1821_v50 }
 0x2de   : > { %v2079_v51 = vsub.f32 0.0, %v2071_v58  ;;  %v5270_v15 = vpop.xlane.xlu1 %2049  ;;  %v2890_v48 = vmax.f32 %v2889_v3, 0.0  ;;  %v1800_v3 = vsub.f32 0.0, %v5247_v46 }
 0x2df   : > { %v5272_v41 = vpop.xlane.xlu0 %1790  ;;  %v2072_v17 = vand.u32 2147483647, %v5270_v15 }
 0x2e0   : > { %v2087_v24 = vmul.f32 1.442695, %v2079_v51  ;;  %v2010_v32 = vrot.slane %v5272_v41, %v5012_v13  ;;  %v2891_v62 = vmul.f32 %v2890_v48, %v2890_v48 }
 0x2e1   : > { %v2080_v10 = vsub.f32 0.0, %v2072_v17 }
 0x2e2   : > { %3713 = vpow2.f32 %v2087_v24  ;;  %v5279_v49 = vpop.xlane.xlu1 %2051  ;;  %v2023_v56 = vsel %vm1972_vm15, %v2010_v32, %v2022_v30  ;;  %2893 = vrot.lane.b32.xlu1 %v2891_v62, %s3855_s14  ;;  %v1814_v30 = vand.u32 2147483647, %v1798_v31  ;;  %v2064_v32 = vmax.f32 %v5270_v15, 0.0 }
 0x2e3   : > { %v2089_v16 = vmul.f32 1.442695, %v2080_v10  ;;  %v5282_v55 = vpop.xlane.xlu0 %1792  ;;  %v2073_v11 = vand.u32 2147483647, %v5279_v49  ;;  %v1823_v15 = vsub.f32 0.0, %v1815_v9 }
 0x2e4   : > { %v2014_v42 = vrot.slane %v5282_v55, %v5012_v13 }
 0x2e5   : > { %3715 = vpow2.f32 %v2089_v16  ;;  %v2081_v27 = vsub.f32 0.0, %v2073_v11 }
 0x2e6   : > { %v5289_v39 = vsel %vm1974_vm8, %v2014_v42, %v2023_v56  ;;  %v5293_v7 = vpop.xlane.xlu1 %2053  ;;  %v2031_v42 = vsel %vm2030_vm7, %v4786_v63, 0.0  ;;  %v1802_v63 = vsub.f32 0.0, %v5282_v55 }
 0x2e7   : > { %v2091_v57 = vmul.f32 1.442695, %v2081_v27  ;;  %v5299_v6 = vpop.xlane.xlu0 %1794  ;;  %v2074_v24 = vand.u32 2147483647, %v5293_v7  ;;  %v1822_v27 = vsub.f32 0.0, %v1814_v30 }
 0x2e9   : > { %3717 = vpow2.f32 %v2091_v57  ;;  %v2082_v35 = vsub.f32 0.0, %v2074_v24  ;;  %v1801_v57 = vsub.f32 0.0, %v5272_v41  ;;  %v1810_v41 = vmax.f32 %v1802_v63, 0.0 }
 0x2ea   : > { %v5302_v28 = vpop.xlane.xlu1 %2055 }
 0x2eb   : > { %v5308_v51 = vpop.xlane.xlu0 %2057  ;;  %v2075_v53 = vand.u32 2147483647, %v5302_v28  ;;  %v1817_v50 = vand.u32 2147483647, %v1801_v57 }
 0x2ec   : > { %v3714_v40 = vpop.eup %3713 }
 0x2ed   : > { %v2103_v29 = vadd.f32 1.0, %v3714_v40  ;;  %v2106_v2 = vmul.f32 -0.5, %v3714_v40  ;;  %v2109_v47 = vand.u32 2147483647, %v3714_v40  ;;  %v1825_v24 = vsub.f32 0.0, %v1817_v50 }
 0x2ee   : > { %v5315_v48 = vpop.xlane.xlu1 %2059 }
 0x2ef   : > { %v3716_v18 = vpop.eup %3715  ;;  %3719 = vlog2.f32 %v2103_v29  ;;  %v2107_v25 = vadd.f32 1.0, %v2106_v2  ;;  %vm2110_vm3 = vcmp.lt.f32.partialorder %v2109_v47, 0.0004427343  ;;  %v5324_v52 = vpop.xlane.xlu0 %2061 }
 0x2f0   : > { %v2112_v8 = vadd.f32 1.0, %v3716_v18  ;;  %v2115_v59 = vmul.f32 -0.5, %v3716_v18  ;;  %v2118_v36 = vand.u32 2147483647, %v3716_v18  ;;  %v2078_v9 = vand.u32 2147483647, %v5324_v52 }
 0x2f1   : > { %v2108_v26 = vmul.f32 %v3714_v40, %v2107_v25  ;;  %v2093_v40 = vmul.f32 1.442695, %v2082_v35 }
 0x2f2   : > { %3721 = vlog2.f32 %v2112_v8  ;;  %v2116_v38 = vadd.f32 1.0, %v2115_v59  ;;  %vm2119_vm4 = vcmp.lt.f32.partialorder %v2118_v36, 0.0004427343  ;;  %v2902_v37 = vpop.permute.xlu1 %2901 }
 0x2f3   : > { %v3718_v1 = vpop.eup %3717 }
 0x2f4   : > { %v2121_v5 = vadd.f32 1.0, %v3718_v1  ;;  %v2124_v22 = vmul.f32 -0.5, %v3718_v1  ;;  %v2117_v17 = vmul.f32 %v3716_v18, %v2116_v38  ;;  %v2127_v11 = vand.u32 2147483647, %v3718_v1 }
 0x2f5   : > { %v1816_v18 = vand.u32 2147483647, %v1800_v3  ;;  %v1834_v38 = vmul.f32 1.442695, %v1823_v15 }
 0x2f6   : > { %3723 = vlog2.f32 %v2121_v5  ;;  %v2125_v56 = vadd.f32 1.0, %v2124_v22  ;;  %v2065_v5 = vmax.f32 %v5279_v49, 0.0  ;;  %vm2128_vm10 = vcmp.lt.f32.partialorder %v2127_v11, 0.0004427343 }
 0x2f7   : > { %3725 = vpow2.f32 %v1828_v23  ;;  %v1824_v36 = vsub.f32 0.0, %v1816_v18  ;;  %v2083_v23 = vsub.f32 0.0, %v2075_v53  ;;  %v1818_v22 = vand.u32 2147483647, %v1802_v63 }
 0x2f8   : > { %3727 = vpow2.f32 %v1830_v20  ;;  %v2126_v59 = vmul.f32 %v3718_v1, %v2125_v56  ;;  %v2018_v49 = vrot.slane %v5299_v6, %v5012_v13  ;;  %v2077_v20 = vand.u32 2147483647, %v5315_v48 }
 0x2f9   : > { %v3720_v45 = vpop.eup %3719  ;;  %3729 = vpow2.f32 %v2093_v40  ;;  %v2086_v11 = vsub.f32 0.0, %v2078_v9  ;;  %v1826_v18 = vsub.f32 0.0, %v1818_v22 }
 0x2fa   : > { %v2105_v61 = vmul.f32 0.6931472, %v3720_v45  ;;  %v1832_v45 = vmul.f32 1.442695, %v1822_v27  ;;  %v5353_v15 = vsel %vm1976_vm14, %v2018_v49, %v5289_v39 }
 0x2fc   : > { %v2111_v54 = vsel %vm2110_vm3, %v2108_v26, %v2105_v61  ;;  %v3722_v58 = vpop.eup %3721  ;;  %v2076_v26 = vand.u32 2147483647, %v5308_v51 }
 0x2fd   : > { %v2114_v0 = vmul.f32 0.6931472, %v3722_v58  ;;  %v2175_v10 = vadd.f32 %v2111_v54, %v2063_v44  ;;  %v2913_v54 = vpop.permute.xlu0 %2912  ;;  %v2095_v44 = vmul.f32 1.442695, %v2083_v23 }
 0x2fe   : > { %v2084_v58 = vsub.f32 0.0, %v2076_v26 }
 0x2ff   : > { %v2120_v16 = vsel %vm2119_vm4, %v2117_v17, %v2114_v0  ;;  %v2194_v8 = vrot.slane %v2175_v10, %v5012_v13  ;;  %v2904_v0 = vsel %vm2030_vm7, %v2902_v37, 0.0  ;;  %v2924_v17 = vpop.permute.xlu1 %2923  ;;  %3731 = vpow2.f32 %v2095_v44 }
 0x300   : > { %v2176_v62 = vadd.f32 %v2120_v16, %v2064_v32  ;;  %v3724_v29 = vpop.eup %3723  ;;  %v2097_v10 = vmul.f32 1.442695, %v2084_v58  ;;  %v2085_v32 = vsub.f32 0.0, %v2077_v20  ;;  %v2915_v16 = vsel %vm2030_vm7, %v2913_v54, 0.0 }
 0x301   : > { %v2123_v25 = vmul.f32 0.6931472, %v3724_v29  ;;  %v5342_v56 = vpop.eup %3725  ;;  %2916 = vadd.xlane.f32.xlu0 %v2915_v16  ;;  %v2926_v29 = vsel %vm2030_vm7, %v2924_v17, 0.0  ;;  %v1836_v37 = vmul.f32 1.442695, %v1824_v36 }
 0x302   : > { %v2198_v2 = vrot.slane %v2176_v62, %v5012_v13  ;;  %v1803_v62 = vsub.f32 0.0, %v5299_v6  ;;  %v5348_v27 = vpop.eup %3727  ;;  %3733 = vpow2.f32 %v2097_v10  ;;  %v2099_v40 = vmul.f32 1.442695, %v2085_v32 }
 0x303   : > { %v2129_v61 = vsel %vm2128_vm10, %v2126_v59, %v2123_v25  ;;  %3735 = vpow2.f32 %v1832_v45  ;;  %v1838_v59 = vmul.f32 1.442695, %v1825_v24  ;;  %v1844_v58 = vadd.f32 1.0, %v5342_v56 }
 0x304   : > { %v2223_v47 = vsel %vm1964_vm6, %v2198_v2, %v2194_v8  ;;  %v2177_v1 = vadd.f32 %v2129_v61, %v2065_v5  ;;  %v2101_v8 = vmul.f32 1.442695, %v2086_v11  ;;  %v3730_v2 = vpop.eup %3729  ;;  %3737 = vpow2.f32 %v2099_v40 }
 0x305   : > { %v2130_v25 = vadd.f32 1.0, %v3730_v2  ;;  %2927 = vadd.xlane.f32.xlu0 %v2926_v29  ;;  %v1840_v5 = vmul.f32 1.442695, %v1826_v18  ;;  %v2133_v39 = vmul.f32 -0.5, %v3730_v2  ;;  %v2136_v54 = vand.u32 2147483647, %v3730_v2 }
 0x306   : > { %v2202_v30 = vrot.slane %v2177_v1, %v5012_v13  ;;  %2905 = vadd.xlane.f32.xlu1 %v2904_v0  ;;  %3739 = vpow2.f32 %v2101_v8  ;;  %v1853_v20 = vadd.f32 1.0, %v5348_v27  ;;  %v2066_v11 = vmax.f32 %v5293_v7, 0.0 }
 0x307   : > { %3741 = vpow2.f32 %v1834_v38  ;;  %v2134_v36 = vadd.f32 1.0, %v2133_v39  ;;  %vm2137_vm11 = vcmp.lt.f32.partialorder %v2136_v54, 0.0004427343 }
 0x308   : > { %v5345_v35 = vsel %vm1966_vm9, %v2202_v30, %v2223_v47  ;;  %v1819_v47 = vand.u32 2147483647, %v1803_v62  ;;  %3743 = vlog2.f32 %v2130_v25 }
 0x309   : > { %3745 = vpow2.f32 %v1836_v37  ;;  %v3732_v45 = vpop.eup %3731  ;;  %v2135_v24 = vmul.f32 %v3730_v2, %v2134_v36  ;;  %v5384_v2 = vmul.f32 -0.5, %v5342_v56 }
 0x30a   : > { %2032 = vadd.xlane.f32.xlu1 %v2031_v42  ;;  %3747 = vpow2.f32 %v1838_v59  ;;  %v1827_v53 = vsub.f32 0.0, %v1819_v47  ;;  %v2139_v42 = vadd.f32 1.0, %v3732_v45  ;;  %v2142_v9 = vmul.f32 -0.5, %v3732_v45 }
 0x30b   : > { %3749 = vpow2.f32 %v1840_v5  ;;  %v2145_v59 = vand.u32 2147483647, %v3732_v45 }
 0x30c   : > { %v5357_v50 = vpop.eup %3733  ;;  %v1842_v1 = vmul.f32 1.442695, %v1827_v53  ;;  %3751 = vlog2.f32 %v2139_v42  ;;  %v2143_v25 = vadd.f32 1.0, %v2142_v9 }
 0x30d   : > { %v5359_v61 = vpop.eup %3735  ;;  %v2148_v26 = vadd.f32 1.0, %v5357_v50  ;;  %v2151_v10 = vmul.f32 -0.5, %v5357_v50  ;;  %v2154_v53 = vand.u32 2147483647, %v5357_v50  ;;  %vm2146_vm12 = vcmp.lt.f32.partialorder %v2145_v59, 0.0004427343 }
 0x30e   : > { %v5362_v38 = vpop.eup %3737  ;;  %v1862_v44 = vadd.f32 1.0, %v5359_v61  ;;  %v2069_v59 = vmax.f32 %v5315_v48, 0.0  ;;  %v1850_v48 = vand.u32 2147483647, %v5342_v56  ;;  %v1868_v14 = vand.u32 2147483647, %v5359_v61 }
 0x30f   : > { %3753 = vlog2.f32 %v2148_v26  ;;  %v2157_v22 = vadd.f32 1.0, %v5362_v38  ;;  %v2160_v18 = vmul.f32 -0.5, %v5362_v38  ;;  %v2152_v47 = vadd.f32 1.0, %v2151_v10 }
 0x310   : > { %v5364_v23 = vpop.eup %3739  ;;  %vm2155_vm1 = vcmp.lt.f32.partialorder %v2154_v53, 0.0004427343  ;;  %vm5424_vm4 = vcmp.lt.f32.partialorder %v1850_v48, 0.0004427343 }
 0x311   : > { %v5367_v49 = vpop.eup %3741  ;;  %3755 = vlog2.f32 %v2157_v22  ;;  %v2166_v0 = vadd.f32 1.0, %v5364_v23  ;;  %v2169_v7 = vmul.f32 -0.5, %v5364_v23  ;;  %v2161_v54 = vadd.f32 1.0, %v2160_v18 }
 0x312   : > { %v3744_v30 = vpop.eup %3743  ;;  %3757 = vpow2.f32 %v1842_v1  ;;  %v1871_v16 = vadd.f32 1.0, %v5367_v49  ;;  %v2067_v1 = vmax.f32 %v5302_v28, 0.0  ;;  %v2172_v28 = vand.u32 2147483647, %v5364_v23 }
 0x313   : > { %v2132_v17 = vmul.f32 0.6931472, %v3744_v30  ;;  %v5374_v32 = vpop.eup %3745  ;;  %3759 = vlog2.f32 %v2166_v0  ;;  %v2144_v30 = vmul.f32 %v3732_v45, %v2143_v25  ;;  %v2153_v0 = vmul.f32 %v5357_v50, %v2152_v47 }
 0x314   : > { %v5378_v40 = vpop.eup %3747  ;;  %3761 = vlog2.f32 %v1844_v58  ;;  %v1880_v5 = vadd.f32 1.0, %v5374_v32  ;;  %v2162_v45 = vmul.f32 %v5362_v38, %v2161_v54  ;;  %v2070_v50 = vmax.f32 %v5324_v52, 0.0 }
 0x315   : > { %v2138_v29 = vsel %vm2137_vm11, %v2135_v24, %v2132_v17  ;;  %v5381_v8 = vpop.eup %3749  ;;  %3763 = vlog2.f32 %v1853_v20  ;;  %v1889_v26 = vadd.f32 1.0, %v5378_v40  ;;  %v2170_v17 = vadd.f32 1.0, %v2169_v7 }
 0x316   : > { %v2178_v37 = vadd.f32 %v2138_v29, %v2066_v11  ;;  %3765 = vlog2.f32 %v1862_v44  ;;  %v3752_v42 = vpop.eup %3751  ;;  %v1898_v36 = vadd.f32 1.0, %v5381_v8  ;;  %v2163_v44 = vand.u32 2147483647, %v5362_v38 }
 0x317   : > { %3767 = vlog2.f32 %v1871_v16  ;;  %v2141_v20 = vmul.f32 0.6931472, %v3752_v42  ;;  %v2068_v16 = vmax.f32 %v5308_v51, 0.0  ;;  %v2171_v53 = vmul.f32 %v5364_v23, %v2170_v17 }
 0x318   : > { %v2206_v39 = vrot.slane %v2178_v37, %v5012_v13  ;;  %vm2164_vm2 = vcmp.lt.f32.partialorder %v2163_v44, 0.0004427343  ;;  %vm2173_vm3 = vcmp.lt.f32.partialorder %v2172_v28, 0.0004427343  ;;  %3769 = vlog2.f32 %v1880_v5 }
 0x319   : > { %v3754_v22 = vpop.eup %3753  ;;  %v2147_v10 = vsel %vm2146_vm12, %v2144_v30, %v2141_v20  ;;  %3771 = vlog2.f32 %v1889_v26  ;;  %v1865_v17 = vmul.f32 -0.5, %v5359_v61  ;;  %v1804_v26 = vmax.f32 %v1796_v33, 0.0 }
 0x31a   : > { %v2225_v58 = vsel %vm1968_vm13, %v2206_v39, %v5345_v35  ;;  %v2150_v9 = vmul.f32 0.6931472, %v3754_v22  ;;  %v2179_v29 = vadd.f32 %v2147_v10, %v2067_v1  ;;  %3773 = vlog2.f32 %v1898_v36 }
 0x31b   : > { %v3756_v24 = vpop.eup %3755  ;;  %v1848_v28 = vadd.f32 1.0, %v5384_v2  ;;  %v1877_v4 = vand.u32 2147483647, %v5367_v49  ;;  %v1883_v2 = vmul.f32 -0.5, %v5374_v32  ;;  %vm5448_vm11 = vcmp.lt.f32.partialorder %v1868_v14, 0.0004427343 }
 0x31c   : > { %v5399_v11 = vpop.eup %3757  ;;  %v2156_v35 = vsel %vm2155_vm1, %v2153_v0, %v2150_v9  ;;  %v2159_v18 = vmul.f32 0.6931472, %v3756_v24  ;;  %v2210_v51 = vrot.slane %v2179_v29, %v5012_v13  ;;  %v1856_v0 = vmul.f32 -0.5, %v5348_v27 }
 0x31d   : > { %v3760_v37 = vpop.eup %3759  ;;  %v2180_v25 = vadd.f32 %v2156_v35, %v2068_v16  ;;  %v1907_v1 = vadd.f32 1.0, %v5399_v11  ;;  %v1874_v24 = vmul.f32 -0.5, %v5367_v49  ;;  %v1806_v16 = vmax.f32 %v1798_v31, 0.0 }
 0x31e   : > { %v3762_v47 = vpop.eup %3761  ;;  %v2165_v7 = vsel %vm2164_vm2, %v2162_v45, %v2159_v18  ;;  %v2168_v39 = vmul.f32 0.6931472, %v3760_v37  ;;  %v2226_v52 = vsel %vm1970_vm5, %v2210_v51, %v2225_v58  ;;  %v1805_v58 = vmax.f32 %v1797_v34, 0.0 }
 0x31f   : > { %v3764_v42 = vpop.eup %3763  ;;  %v2214_v22 = vrot.slane %v2180_v25, %v5012_v13  ;;  %v2181_v38 = vadd.f32 %v2165_v7, %v2069_v59  ;;  %3775 = vlog2.f32 %v1907_v1  ;;  %v1859_v29 = vand.u32 2147483647, %v5348_v27 }
 0x320   : > { %v3766_v54 = vpop.eup %3765  ;;  %v2174_v20 = vsel %vm2173_vm3, %v2171_v53, %v2168_v39  ;;  %v1857_v18 = vadd.f32 1.0, %v1856_v0  ;;  %v1846_v33 = vmul.f32 0.6931472, %v3762_v47  ;;  %v1866_v34 = vadd.f32 1.0, %v1865_v17 }
 0x321   : > { %v3768_v30 = vpop.eup %3767  ;;  %v2218_v44 = vrot.slane %v2181_v38, %v5012_v13  ;;  %v2182_v9 = vadd.f32 %v2174_v20, %v2070_v50  ;;  %v2227_v23 = vsel %vm1972_vm15, %v2214_v22, %v2226_v52  ;;  %v1875_v31 = vadd.f32 1.0, %v1874_v24 }
 0x322   : > { %v1855_v45 = vmul.f32 0.6931472, %v3764_v42  ;;  %v1808_v37 = vmax.f32 %v1800_v3, 0.0  ;;  %v1886_v25 = vand.u32 2147483647, %v5374_v32  ;;  %v1892_v59 = vmul.f32 -0.5, %v5378_v40  ;;  %v3770_v51 = vpop.eup %3769 }
 0x323   : > { %v2222_v5 = vrot.slane %v2182_v9, %v5012_v13  ;;  %v2228_v10 = vsel %vm1974_vm8, %v2218_v44, %v2227_v23  ;;  %v1849_v50 = vmul.f32 %v5342_v56, %v1848_v28  ;;  %vm5442_vm10 = vcmp.lt.f32.partialorder %v1859_v29, 0.0004427343  ;;  %v3772_v56 = vpop.eup %3771 }
 0x324   : > { %v1864_v43 = vmul.f32 0.6931472, %v3766_v54  ;;  %v1901_v47 = vmul.f32 -0.5, %v5381_v8  ;;  %v1858_v7 = vmul.f32 %v5348_v27, %v1857_v18  ;;  %vm5452_vm12 = vcmp.lt.f32.partialorder %v1877_v4, 0.0004427343  ;;  %v3774_v27 = vpop.eup %3773 }
 0x325   : > { %v5430_v35 = vsel %vm1976_vm14, %v2222_v5, %v2228_v10  ;;  %v1910_v3 = vmul.f32 -0.5, %v5399_v11  ;;  %v1852_v53 = vsel %vm5424_vm4, %v1849_v50, %v1846_v33  ;;  %v1867_v42 = vmul.f32 %v5359_v61, %v1866_v34 }
 0x326   : > { %v1876_v1 = vmul.f32 %v5367_v49, %v1875_v31  ;;  %v1884_v22 = vadd.f32 1.0, %v1883_v2  ;;  %v1861_v38 = vsel %vm5442_vm10, %v1858_v7, %v1855_v45  ;;  %v1873_v54 = vmul.f32 0.6931472, %v3768_v30 }
 0x327   : > { %vm5463_vm1 = vcmp.lt.f32.partialorder %v1886_v25, 0.0004427343  ;;  %v1893_v20 = vadd.f32 1.0, %v1892_v59  ;;  %v1870_v44 = vsel %vm5448_vm11, %v1867_v42, %v1864_v43  ;;  %v1882_v9 = vmul.f32 0.6931472, %v3770_v51 }
 0x328   : > { %v1895_v61 = vand.u32 2147483647, %v5378_v40  ;;  %v1902_v23 = vadd.f32 1.0, %v1901_v47  ;;  %v1916_v49 = vadd.f32 %v1852_v53, %v1804_v26  ;;  %v1891_v0 = vmul.f32 0.6931472, %v3772_v56 }
 0x329   : > { %v3776_v52 = vpop.eup %3775  ;;  %v1904_v17 = vand.u32 2147483647, %v5381_v8  ;;  %v1911_v24 = vadd.f32 1.0, %v1910_v3  ;;  %v1917_v5 = vadd.f32 %v1861_v38, %v1805_v58  ;;  %v1885_v30 = vmul.f32 %v5374_v32, %v1884_v22 }
 0x32a   : > { %v1900_v10 = vmul.f32 0.6931472, %v3774_v27  ;;  %v1913_v28 = vand.u32 2147483647, %v5399_v11  ;;  %v1918_v36 = vadd.f32 %v1870_v44, %v1806_v16  ;;  %v1879_v29 = vsel %vm5452_vm12, %v1876_v1, %v1873_v54 }
 0x32b   : > { %v1894_v18 = vmul.f32 %v5378_v40, %v1893_v20  ;;  %v1909_v14 = vmul.f32 0.6931472, %v3776_v52  ;;  %v1888_v26 = vsel %vm5463_vm1, %v1885_v30, %v1882_v9  ;;  %v1809_v4 = vmax.f32 %v1801_v57, 0.0 }
 0x32c   : > { %vm1896_vm2 = vcmp.lt.f32.partialorder %v1895_v61, 0.0004427343  ;;  %v1903_v58 = vmul.f32 %v5381_v8, %v1902_v23  ;;  %v1935_v32 = vrot.slane %v1916_v49, %v5012_v13  ;;  %vm1905_vm3 = vcmp.lt.f32.partialorder %v1904_v17, 0.0004427343 }
 0x32d   : > { %v1897_v33 = vsel %vm1896_vm2, %v1894_v18, %v1891_v0  ;;  %v1912_v16 = vmul.f32 %v5399_v11, %v1911_v24  ;;  %v1939_v34 = vrot.slane %v1917_v5, %v5012_v13  ;;  %v1919_v31 = vadd.f32 %v1879_v29, %v1807_v21 }
 0x32e   : > { %v1906_v40 = vsel %vm1905_vm3, %v1903_v58, %v1900_v10  ;;  %vm1914_vm4 = vcmp.lt.f32.partialorder %v1913_v28, 0.0004427343  ;;  %v1943_v2 = vrot.slane %v1918_v36, %v5012_v13  ;;  %v1920_v45 = vadd.f32 %v1888_v26, %v1808_v37 }
 0x32f   : > { %v1915_v57 = vsel %vm1914_vm4, %v1912_v16, %v1909_v14  ;;  %v1921_v25 = vadd.f32 %v1897_v33, %v1809_v4  ;;  %v1811_v8 = vmax.f32 %v1803_v62, 0.0  ;;  %v1922_v59 = vadd.f32 %v1906_v40, %v1810_v41 }
 0x330   : > { %v1965_v50 = vsel %vm1964_vm6, %v1939_v34, %v1935_v32  ;;  %v1947_v11 = vrot.slane %v1919_v31, %v5012_v13  ;;  %v1951_v43 = vrot.slane %v1920_v45, %v5012_v13  ;;  %v2231_v38 = vsel %vm2030_vm7, %v5430_v35, 0.0 }
 0x331   : > { %v1923_v19 = vadd.f32 %v1915_v57, %v1811_v8  ;;  %v1967_v21 = vsel %vm1966_vm9, %v1943_v2, %v1965_v50  ;;  %v1955_v37 = vrot.slane %v1921_v25, %v5012_v13  ;;  %v1959_v55 = vrot.slane %v1922_v59, %v5012_v13 }
 0x332   : > { %v1969_v63 = vsel %vm1968_vm13, %v1947_v11, %v1967_v21  ;;  %v2940_v18 = vstv %s3447_s22 }
 0x333   : > { %v1963_v47 = vrot.slane %v1923_v19, %v5012_v13  ;;  %v1971_v6 = vsel %vm1970_vm5, %v1951_v43, %v1969_v63  ;;  %v2941_v34 = vadd.s32 %v2940_v18, %v4612_v12  ;;  %vm2944_vm5 = vcmask 7168  }
 0x334   : > { %v1973_v62 = vsel %vm1972_vm15, %v1955_v37, %v1971_v6 }
 0x335   : > { %v1975_v51 = vsel %vm1974_vm8, %v1959_v55, %v1973_v62  ;;  %vm2942_vm13 = vcmp.lt.s32.totalorder %v2941_v34, 16 }
 0x336   : > { %v1977_v7 = vsel %vm1976_vm14, %v1963_v47, %v1975_v51 }
 0x337   : > { %v2027_v53 = vsel %vm1771_vm0, %v1977_v7, %v5353_v15 }
 0x338   : > { %v2034_v13 = vsel %vm2030_vm7, %v2027_v53, 0.0 }
 0x348   : > { %v2737_v39 = vpop.permute.xlu0 %2736  ;;  %v2580_v46 = vpop.permute.xlu1 %2579 }
 0x349   : > { %v2739_v3 = vsel %vm2030_vm7, %v2737_v39, 0.0  ;;  %v2582_v56 = vsel %vm2030_vm7, %v2580_v46, 0.0 }
 0x34a   : > { %2740 = vadd.xlane.f32.xlu1 %v2739_v3  ;;  %2583 = vadd.xlane.f32.xlu0 %v2582_v56 }
 0x34c   : > { %v2480_v42 = vpop.permute.xlu0 %2479 }
 0x34d   : > { %v2482_v1 = vsel %vm2030_vm7, %v2480_v42, 0.0 }
 0x34e   : > { %2035 = vadd.xlane.f32.xlu1 %v2034_v13 }
 0x352   : > { %2483 = vadd.xlane.f32.xlu1 %v2482_v1 }
 0x354   : > { %v2894_v22 = vpop.permute.xlu1 %2893 }
 0x355   : > { %v2896_v27 = vsel %vm2030_vm7, %v2894_v22, 0.0 }
 0x356   : > { %2897 = vadd.xlane.f32.xlu0 %v2896_v27 }
 0x35a   : > { %2232 = vadd.xlane.f32.xlu0 %v2231_v38 }
 0x38e   : > { %v2917_v54 = vpop.xlane.xlu0 %2916 }
 0x38f   : > { %v2919_v15 = vmax.f32 %v2917_v54, 1.0  ;;  %vm2918_vm6 = vcmp.ne.f32.partialorder %v2917_v54, 0.0 }
 0x392   : > { %v2928_v20 = vpop.xlane.xlu0 %2927 }
 0x393   : > { %v2906_v48 = vpop.xlane.xlu1 %2905  ;;  %v2930_v52 = vmax.f32 %v2928_v20, 1.0  ;;  %vm2929_vm9 = vcmp.ne.f32.partialorder %v2928_v20, 0.0 }
 0x394   : > { %v2908_v60 = vmax.f32 %v2906_v48, 1.0  ;;  %vm2907_vm0 = vcmp.ne.f32.partialorder %v2906_v48, 0.0 }
 0x396   : > { %3777 = vrcp.f32 %v2908_v60 }
 0x397   : > { %3779 = vrcp.f32 %v2919_v15  ;;  %v2033_v44 = vpop.xlane.xlu1 %2032 }
 0x398   : > { %3781 = vrcp.f32 %v2930_v52 }
 0x399   : > { %3783 = vrcp.f32 %v2033_v44 }
 0x3a0   : > { %v3778_v23 = vpop.eup %3777 }
 0x3a1   : > { %v3780_v17 = vpop.eup %3779 }
 0x3a2   : > { %v3782_v24 = vpop.eup %3781 }
 0x3a3   : > { %v3784_v36 = vpop.eup %3783 }
 0x3d7   : > { %v2741_v9 = vpop.xlane.xlu1 %2740  ;;  %v2584_v61 = vpop.xlane.xlu0 %2583 }
 0x3d8   : > { %v2742_v49 = vmul.f32 0.5, %v2741_v9  ;;  %v2585_v0 = vmul.f32 0.5, %v2584_v61 }
 0x3da   : > { %v2921_v5 = vmul.f32 %v3780_v17, %v2742_v49  ;;  %v2910_v30 = vmul.f32 %v3778_v23, %v2585_v0 }
 0x3db   : > { %v2036_v35 = vpop.xlane.xlu1 %2035 }
 0x3dc   : > { %v2922_v14 = vsel %vm2918_vm6, %v2921_v5, %v2742_v49  ;;  %v2911_v26 = vsel %vm2907_vm0, %v2910_v30, %v2585_v0  ;;  %v2038_v32 = vmul.f32 %v3784_v36, %v2036_v35 }
 0x3dd   : > { %v2934_v31 = vadd.f32 %v2922_v14, %v2911_v26 }
 0x3df   : > { %v2484_v4 = vpop.xlane.xlu1 %2483 }
 0x3e0   : > { %v2485_v40 = vmul.f32 0.125, %v2484_v4 }
 0x3e3   : > { %v2898_v10 = vpop.xlane.xlu0 %2897 }
 0x3e4   : > { %v2899_v28 = vmul.f32 0.5, %v2898_v10 }
 0x3e6   : > { %v2932_v29 = vmul.f32 %v3782_v24, %v2899_v28 }
 0x3e7   : > { %v2233_v58 = vpop.xlane.xlu0 %2232 }
 0x3e8   : > { %v2235_v33 = vmul.f32 0.125, %v2233_v58  ;;  %v2933_v16 = vsel %vm2929_vm9, %v2932_v29, %v2899_v28 }
 0x3e9   : > { %v2935_v45 = vadd.f32 %v2934_v31, %v2933_v16 }
 0x3ea   : > { %v2486_v2 = vadd.f32 %v2235_v33, %v2038_v32 }
 0x3ec   : > { %v2487_v41 = vadd.f32 %v2486_v2, %v2485_v40 }
 0x3ee   : > { %v2936_v57 = vadd.f32 %v2935_v45, %v2487_v41 }
 0x3f0   : > { %v2943_v25 = vsel %vm2942_vm13, %v2936_v57, 0.0 }
 0x3f1   : > { %v2945_v8 = vsel %vm2944_vm5, %v2943_v25, 0.0 }
 0x3f2   : > { %2946 = vadd.xlane.f32.xlu0 %v2945_v8 }
 0x47f   : > { %v2947_v59 = vpop.xlane.xlu0 %2946 }
 0x480   : > { %v2948_v50 = vrot.slane %v2947_v59, 4 }
 0x482   : > { %v2949_v11 = vadd.f32 %v2948_v50, %v2947_v59 }
 0x484   : > { %v2950_v19 = vrot.slane %v2949_v11, 2 }
 0x486   : > { %v2951_v21 = vadd.f32 %v2950_v19, %v2949_v11 }
 0x488   : > { %v2952_v43 = vrot.slane %v2951_v21, 1 }
 0x48a   : > { %v2953_v12 = vadd.f32 %v2952_v43, %v2951_v21 }
 0x48c   : > { %3596 = vpush %v2953_v12 }
 0x4bd   : > { %s3597_s5 = spop %3596 }
 0x4be   : > { %v2955_v37 = vstv %s3597_s5 }
 0x4bf   : > { %2956 = vst [vmem:[%s217_s29] sm:$0xff] %v2955_v37 }
 0x4c0   : > { %3798 = shalt.err (!%p3795_p4)
}
 0x4c1   : > { %s3799_s14 = scalar_lea.hbm %s5520_s8, 128  ;;  %s3803_s22 = scalar_lea.hbm %s5564_s4, 256 }
 0x4c2   : > { %p3800_p7 = scmp.ne.s32.totalorder %s5520_s8, %s3799_s14  ;;  %p3804_p10 = scmp.lt.u32.totalorder %s5520_s8, %s5564_s4 }
 0x4c3   : > { %p3805_p11 = scmp.lt.u32.totalorder %s3803_s22, %s3799_s14  ;;  %p3807_p13 = scmp.lt.u32.totalorder %s3799_s14, %s5520_s8 }
 0x4c4   : > { %p3801_p8 = pnand %p3800_p7, %p3922_p5 }
 0x4c5   : > { %p3806_p12 = por %p3805_p11, %p3804_p10 }
 0x4c6   : > { %p3802_p9 = pneg %p3801_p8 }
 0x4c7   : > { %p3808_p0 = por %p3807_p13, %p3806_p12 }
 0x4c9   : > { %p3809_p1 = pnand %p3808_p0, %p3802_p9 }
 0x4cb   : > { %3812 = shalt.err (!%p3809_p1)
}
 0x4cc   : > { %3598 = dma.vmem_to_hbm [thread:$0]  (%p3922_p5), %s5515_s30, 128, %s5520_s8, %s2958_s9  }
 0x4cd PF: > { %p3604_p2 = scmp.ge.s32.totalorder %s3847_s18, 2  ;;  %s2983_s29 = sand.u32 1, %s3835_s15  }
 0x4ce   : > { %s2984_s13 = scalar_lea.sflag [#allocation3], %s2983_s29 }
 0x4cf   : > { %p3601_p3 = pnand %p3604_p2, %p3926_p6 }
 0x4d1   : > { %3830 = dma.done.wait (!%p3601_p3), %s2984_s13, 128  }
 0x4d2   : > { %3832 = vsyncadd (!%p3601_p3), %s2984_s13, 4294967168  ;;  %p14_p4 = scmp.ge.s32.totalorder %s3909_s21, 4   ;;  %s5591_s15 = smov %s3839_s16 }
 0x4d3   : > { %s5592_s16 = smov %s3843_s17  ;;  %s5593_s17 = smov %s3920_s24 }
 0x4d4   : > { %s5594_s18 = smov %s3909_s21  ;;  %16 = sbr.rel (!%p14_p4) target bundleno = 3 (0x3), region = 77 }
 0x4db   :  { %2989 = vsyncpa [#allocation3], 1 }
 0x4dc   :  { %2991 = vsyncpa [#allocation3 + $0x1], 1 }

</bundles_post_ra>
